<compile_context>
chip_gen: v5e
topology: v5e:2x2
jax: 0.10.0
libtpu: 0.0.40
codegen_flags: <defaults>
</compile_context>

<pallas_src>
import functools

import jax
import jax.numpy as jnp
from jax.experimental import pallas as pl
from jax.experimental.pallas import tpu as pltpu

COMPUTE_DTYPE = jnp.bfloat16            # MXU-native compute dtype
_VMEM_LIMIT = 48 * 1024 * 1024          # explicit scoped-VMEM cap
_TM, _TN, _TK = 256, 256, 512           # matmul tile targets (multiples of 8 / 128)
_TQ = 128                               # attention query-tile target


# --------------------------------------------------------------------------
# helpers
# --------------------------------------------------------------------------

def _round_up(x, m):
    return ((x + m - 1) // m) * m


def _block_dim(dim, want):
    """Return (tile, padded_extent) for one grid dimension.

    Small dims use a full-extent block (always legal w.r.t. the (8,128) rule,
    no padding); large dims use `want` (a multiple of 8 and 128) and pad up.
    """
    if dim <= want:
        return dim, dim
    return want, _round_up(dim, want)


def _pad2d(a, rows, cols):
    pr, pc = rows - a.shape[0], cols - a.shape[1]
    if pr == 0 and pc == 0:
        return a
    return jnp.pad(a, ((0, pr), (0, pc)))


# --------------------------------------------------------------------------
# tiled linear kernel (bias + activation fused, f32 accumulator)
# --------------------------------------------------------------------------

def _linear_kernel(x_ref, w_ref, b_ref, o_ref, acc_ref, *, act):
    @pl.when(pl.program_id(2) == 0)
    def _init():
        acc_ref[...] = jnp.zeros_like(acc_ref)

    acc_ref[...] += jnp.dot(x_ref[...], w_ref[...],
                            preferred_element_type=jnp.float32)

    @pl.when(pl.program_id(2) == pl.num_programs(2) - 1)
    def _finalize():
        acc = acc_ref[...] + b_ref[...].astype(jnp.float32)
        if act == "relu":
            acc = jnp.maximum(acc, 0.0)
        elif act == "gelu":
            acc = jax.nn.gelu(acc)
        o_ref[...] = acc.astype(o_ref.dtype)


def linear(x, w, b=None, act=None, out_dtype=None):
    """y = act(x @ w + b).  x: (..., K), w: (K, N), b: (N,) or None."""
    *lead, K = x.shape
    N = w.shape[1]
    x2 = x.reshape(-1, K)
    M = x2.shape[0]
    out_dtype = x.dtype if out_dtype is None else out_dtype

    tm, Mp = _block_dim(M, _TM)
    tn, Np = _block_dim(N, _TN)
    tk, Kp = _block_dim(K, _TK)

    xp = _pad2d(x2, Mp, Kp)
    wp = _pad2d(w, Kp, Np)
    if b is None:
        b = jnp.zeros((N,), w.dtype)
    bp = _pad2d(b.reshape(1, N), 1, Np)

    out = pl.pallas_call(
        functools.partial(_linear_kernel, act=act),
        out_shape=jax.ShapeDtypeStruct((Mp, Np), out_dtype),
        grid_spec=pltpu.PrefetchScalarGridSpec(
            num_scalar_prefetch=0,
            grid=(Mp // tm, Np // tn, Kp // tk),
            in_specs=[
                pl.BlockSpec((tm, tk), lambda i, j, k: (i, k)),
                pl.BlockSpec((tk, tn), lambda i, j, k: (k, j)),
                pl.BlockSpec((1, tn), lambda i, j, k: (0, j)),
            ],
            out_specs=pl.BlockSpec((tm, tn), lambda i, j, k: (i, j)),
            scratch_shapes=[pltpu.VMEM((tm, tn), jnp.float32)],
        ),
        compiler_params=pltpu.CompilerParams(
            dimension_semantics=("parallel", "parallel", "arbitrary"),
            vmem_limit_bytes=_VMEM_LIMIT,
        ),
    )(xp, wp, bp)

    if (Mp, Np) != (M, N):
        out = out[:M, :N]
    return out.reshape(*lead, N)


# --------------------------------------------------------------------------
# LayerNorm kernels (optionally fused with the residual add), tiled over rows
# --------------------------------------------------------------------------

def _ln_math(x, g, b, eps):
    mean = jnp.mean(x, axis=-1, keepdims=True)
    var = jnp.mean(jnp.square(x - mean), axis=-1, keepdims=True)
    return (x - mean) * jax.lax.rsqrt(var + eps) * g + b


def _ln_kernel(x_ref, g_ref, b_ref, o_ref, *, eps):
    x = x_ref[...].astype(jnp.float32)
    g = g_ref[...].astype(jnp.float32)
    b = b_ref[...].astype(jnp.float32)
    o_ref[...] = _ln_math(x, g, b, eps).astype(o_ref.dtype)


def _add_ln_kernel(x_ref, r_ref, g_ref, b_ref, o_ref, *, eps):
    x = x_ref[...].astype(jnp.float32) + r_ref[...].astype(jnp.float32)
    g = g_ref[...].astype(jnp.float32)
    b = b_ref[...].astype(jnp.float32)
    o_ref[...] = _ln_math(x, g, b, eps).astype(o_ref.dtype)


def layer_norm(x, gamma, beta, eps, residual=None):
    """LayerNorm over the last dim; if `residual` is given computes LN(x + residual)."""
    *lead, D = x.shape
    x2 = x.reshape(-1, D)
    M = x2.shape[0]
    tm, Mp = _block_dim(M, 256)
    xp = _pad2d(x2, Mp, D)
    g2 = gamma.reshape(1, D)
    b2 = beta.reshape(1, D)

    row_spec = pl.BlockSpec((tm, D), lambda i: (i, 0))
    vec_spec = pl.BlockSpec((1, D), lambda i: (0, 0))
    cparams = pltpu.CompilerParams(dimension_semantics=("parallel",),
                                   vmem_limit_bytes=_VMEM_LIMIT)

    if residual is None:
        out = pl.pallas_call(
            functools.partial(_ln_kernel, eps=float(eps)),
            out_shape=jax.ShapeDtypeStruct((Mp, D), x.dtype),
            grid=(Mp // tm,),
            in_specs=[row_spec, vec_spec, vec_spec],
            out_specs=row_spec,
            compiler_params=cparams,
        )(xp, g2, b2)
    else:
        rp = _pad2d(residual.reshape(-1, D), Mp, D)
        out = pl.pallas_call(
            functools.partial(_add_ln_kernel, eps=float(eps)),
            out_shape=jax.ShapeDtypeStruct((Mp, D), x.dtype),
            grid=(Mp // tm,),
            in_specs=[row_spec, row_spec, vec_spec, vec_spec],
            out_specs=row_spec,
            compiler_params=cparams,
        )(xp, rp, g2, b2)

    if Mp != M:
        out = out[:M]
    return out.reshape(*lead, D)


# --------------------------------------------------------------------------
# Attention kernel: grid over (batch, query-tile), all heads per block,
# in-kernel masks (key padding + optional causal)
# --------------------------------------------------------------------------

def _mha_kernel(keep_ref, q_ref, k_ref, v_ref, o_ref, *, scale, causal, tq):
    # blocks: keep (1,1,Sk) f32 ; q (1,tq,1,H,Dh) ; k/v (1,Sk,1,H,Dh) ; out (1,tq,H,Dh)
    q = jnp.swapaxes(q_ref[...][0, :, 0], 0, 1) * scale   # (H, Tq, Dh), scale folded into q
    k = jnp.swapaxes(k_ref[...][0, :, 0], 0, 1)           # (H, Sk, Dh)
    v = jnp.swapaxes(v_ref[...][0, :, 0], 0, 1)           # (H, Sk, Dh)

    # scores per head, f32 accumulation on the MXU
    s = jnp.einsum("hqd,hkd->hqk", q, k, preferred_element_type=jnp.float32)

    neg = jnp.float32(-1e9)
    keep = keep_ref[...][0]                                # (1, Sk); 1 = keep, 0 = pad
    s = s + jnp.where(keep > 0, jnp.float32(0.0), neg)[None, :, :]
    if causal:
        nq, nk = s.shape[1], s.shape[2]
        q0 = pl.program_id(1) * tq                         # absolute query offset of this tile
        row = q0 + jax.lax.broadcasted_iota(jnp.int32, (nq, nk), 0)
        col = jax.lax.broadcasted_iota(jnp.int32, (nq, nk), 1)
        s = jnp.where((col <= row)[None, :, :], s, neg)

    s = s - jnp.max(s, axis=-1, keepdims=True)
    p = jnp.exp(s)
    p = p * pl.reciprocal(jnp.sum(p, axis=-1, keepdims=True), approx=True)  # EUP slot

    o = jnp.einsum("hqk,hkd->hqd", p.astype(v.dtype), v,
                   preferred_element_type=jnp.float32)     # (H, Tq, Dh)
    o_ref[...] = jnp.swapaxes(o, 0, 1)[None].astype(o_ref.dtype)  # (1, Tq, H, Dh)


def sdp_attention(q_arr, q_idx, k_arr, k_idx, v_arr, v_idx, keep, *, causal):
    """q_arr: (B, Sq, Gq, H, Dh); k_arr/v_arr: (B, Sk, Gk, H, Dh).

    Gq/Gk pack fused projection outputs (QKV or KV); *_idx selects which packed
    slot each operand reads, so the fused projections are DMA'd straight from HBM
    without any JAX-side slicing/transposes.  keep: (B, 1, Sk) key-padding mask.
    Returns (B, Sq, H, Dh) -> free reshape to (B, Sq, D).
    """
    B, Sq, _, H, Dh = q_arr.shape
    Sk = k_arr.shape[1]
    scale = 1.0 / (Dh ** 0.5)

    # tile the query axis (keys stay whole; scores footprint is (H, tq, Sk) f32)
    tq, Sqp = _block_dim(Sq, _TQ)
    if Sqp != Sq:
        q_arr = jnp.pad(q_arr, ((0, 0), (0, Sqp - Sq), (0, 0), (0, 0), (0, 0)))

    # TODO(synk): switch to an online-softmax (flash) form tiled over Sk for very
    # long key sequences.
    out = pl.pallas_call(
        functools.partial(_mha_kernel, scale=scale, causal=causal, tq=tq),
        out_shape=jax.ShapeDtypeStruct((B, Sqp, H, Dh), q_arr.dtype),
        grid=(B, Sqp // tq),
        in_specs=[
            pl.BlockSpec((1, 1, Sk), lambda b, qi: (b, 0, 0)),
            pl.BlockSpec((1, tq, 1, H, Dh), lambda b, qi: (b, qi, q_idx, 0, 0)),
            pl.BlockSpec((1, Sk, 1, H, Dh), lambda b, qi: (b, 0, k_idx, 0, 0)),
            pl.BlockSpec((1, Sk, 1, H, Dh), lambda b, qi: (b, 0, v_idx, 0, 0)),
        ],
        out_specs=pl.BlockSpec((1, tq, H, Dh), lambda b, qi: (b, qi, 0, 0)),
        compiler_params=pltpu.CompilerParams(
            dimension_semantics=("parallel", "parallel"),
            vmem_limit_bytes=_VMEM_LIMIT,
        ),
    )(keep, q_arr, k_arr, v_arr)

    if Sqp != Sq:
        out = out[:, :Sq]
    return out


# --------------------------------------------------------------------------
# Transformer building blocks
# --------------------------------------------------------------------------

def self_attention(x, p, keep, n_heads, causal):
    B, S, D = x.shape
    Dh = D // n_heads
    qkv = linear(x, p["wqkv"], p["bqkv"])                 # fused Q/K/V projection
    qkv = qkv.reshape(B, S, 3, n_heads, Dh)               # free reshape (no copy)
    o = sdp_attention(qkv, 0, qkv, 1, qkv, 2, keep, causal=causal)
    return linear(o.reshape(B, S, D), p["wo"], p["bo"])


def cross_attention(x_q, x_kv, p, keep, n_heads):
    B, Sq, D = x_q.shape
    Sk = x_kv.shape[1]
    Dh = D // n_heads
    q = linear(x_q, p["wq"], p["bq"]).reshape(B, Sq, 1, n_heads, Dh)
    kv = linear(x_kv, p["wkv"], p["bkv"]).reshape(B, Sk, 2, n_heads, Dh)  # fused K/V
    o = sdp_attention(q, 0, kv, 0, kv, 1, keep, causal=False)
    return linear(o.reshape(B, Sq, D), p["wo"], p["bo"])


def feed_forward(x, p, act):
    h = linear(x, p["w1"], p["b1"], act=act)   # bias + activation fused in-kernel
    return linear(h, p["w2"], p["b2"])


def encoder_layer(x, p, e_keep, n_heads, eps, act):
    # post-LN as in "Attention is all you need"; dropout = identity (eval)
    a = self_attention(x, p["mha"], e_keep, n_heads, causal=False)
    x = layer_norm(a, p["ln1_g"], p["ln1_b"], eps, residual=x)
    f = feed_forward(x, p, act)
    x = layer_norm(f, p["ln2_g"], p["ln2_b"], eps, residual=x)
    return x


def decoder_layer(y, e_out, p, t_keep, e_keep, n_heads, eps, act):
    a = self_attention(y, p["self_mha"], t_keep, n_heads, causal=True)
    y = layer_norm(a, p["ln1_g"], p["ln1_b"], eps, residual=y)
    c = cross_attention(y, e_out, p["cross_mha"], e_keep, n_heads)
    y = layer_norm(c, p["ln2_g"], p["ln2_b"], eps, residual=y)
    f = feed_forward(y, p, act)
    y = layer_norm(f, p["ln3_g"], p["ln3_b"], eps, residual=y)
    return y


def sinusoidal_pe(max_len, d_model):
    pos = jnp.arange(max_len, dtype=jnp.float32)[:, None]
    i = jnp.arange(0, d_model, 2, dtype=jnp.float32)
    div = jnp.exp(-jnp.log(10000.0) * i / d_model)
    pe = jnp.zeros((max_len, d_model), jnp.float32)
    pe = pe.at[:, 0::2].set(jnp.sin(pos * div))
    pe = pe.at[:, 1::2].set(jnp.cos(pos * div))
    return pe


def transformer_forward(params, cfg, src, tgt, e_mask=None, t_mask=None):
    """e_mask: (B,1,Ss) source key-padding keep mask (1 keep / 0 pad).
    t_mask: (B,1,St) target key-padding keep mask; the causal part of the decoder
    self-attention mask (d_mask = causal & tgt padding) is generated in-kernel."""
    D = cfg["d_model"]
    H = cfg["n_heads"]
    eps = cfg["layer_norm_eps"]
    act = cfg["activation_ff"]
    B, Ss = src.shape
    St = tgt.shape[1]
    emb_scale = D ** 0.5 if cfg["scale_embeddings"] else 1.0

    e_keep = (jnp.ones((B, 1, Ss), jnp.float32) if e_mask is None
              else e_mask.reshape(B, 1, Ss).astype(jnp.float32))
    t_keep = (jnp.ones((B, 1, St), jnp.float32) if t_mask is None
              else t_mask.reshape(B, 1, St).astype(jnp.float32))

    # Embedding gather + positional encoding (JAX glue; dropout = identity in eval).
    x = jnp.take(params["embedding"], src, axis=0) * emb_scale
    x = x + params["pe"][None, :Ss, :]
    for p in params["enc_layers"]:
        x = encoder_layer(x, p, e_keep, H, eps, act)
    e_out = layer_norm(x, params["enc_norm_g"], params["enc_norm_b"], eps)

    y = jnp.take(params["embedding"], tgt, axis=0) * emb_scale
    y = y + params["pe"][None, :St, :]
    for p in params["dec_layers"]:
        y = decoder_layer(y, e_out, p, t_keep, e_keep, H, eps, act)
    d_out = layer_norm(y, params["dec_norm_g"], params["dec_norm_b"], eps)

    # linear_output (no bias); tied weights -> transposed matrix hoisted to init time.
    return linear(d_out, params["out_w"], None, out_dtype=jnp.float32)


# --------------------------------------------------------------------------
# Deterministic parameter init (init_bert_weights style), stored in bf16
# --------------------------------------------------------------------------

def init_params(key, cfg, max_len, dtype=COMPUTE_DTYPE):
    d, ff, V = cfg["d_model"], cfg["dim_ff"], cfg["vocab_size"]
    keys = iter(jax.random.split(key, 512))

    def w(shape):
        return (jax.random.normal(next(keys), shape, jnp.float32) * 0.02).astype(dtype)

    def z(n):
        return jnp.zeros((n,), dtype)

    def one(n):
        return jnp.ones((n,), dtype)

    def self_mha_p():
        return dict(wqkv=w((d, 3 * d)), bqkv=z(3 * d), wo=w((d, d)), bo=z(d))

    def cross_mha_p():
        return dict(wq=w((d, d)), bq=z(d), wkv=w((d, 2 * d)), bkv=z(2 * d),
                    wo=w((d, d)), bo=z(d))

    def enc_layer_p():
        return dict(mha=self_mha_p(),
                    w1=w((d, ff)), b1=z(ff), w2=w((ff, d)), b2=z(d),
                    ln1_g=one(d), ln1_b=z(d), ln2_g=one(d), ln2_b=z(d))

    def dec_layer_p():
        return dict(self_mha=self_mha_p(), cross_mha=cross_mha_p(),
                    w1=w((d, ff)), b1=z(ff), w2=w((ff, d)), b2=z(d),
                    ln1_g=one(d), ln1_b=z(d), ln2_g=one(d), ln2_b=z(d),
                    ln3_g=one(d), ln3_b=z(d))

    emb = jax.random.normal(next(keys), (V, d), jnp.float32) * 0.02
    emb = emb.at[cfg["pad_token_id"]].set(0.0)   # padding_idx row is zero
    emb = emb.astype(dtype)

    return dict(
        embedding=emb,
        pe=sinusoidal_pe(max_len, d).astype(dtype),
        enc_layers=[enc_layer_p() for _ in range(cfg["num_encoder_layers"])],
        dec_layers=[dec_layer_p() for _ in range(cfg["num_decoder_layers"])],
        enc_norm_g=one(d), enc_norm_b=z(d),
        dec_norm_g=one(d), dec_norm_b=z(d),
        out_w=(jnp.transpose(emb) if cfg["tie_embeddings"] else w((d, V))),
    )


# --------------------------------------------------------------------------
# Demo
# --------------------------------------------------------------------------

if __name__ == "__main__":
    cfg = dict(
        vocab_size=64, d_model=32, n_heads=4,
        num_encoder_layers=2, num_decoder_layers=2, dim_ff=64,
        dropout=0.0, dropout_mha=0.0, dropout_ff=0.0,   # eval-mode / identity
        activation_ff="relu", layer_norm_eps=1e-6,
        bos_token_id=1, eos_token_id=2, pad_token_id=0,
        scale_embeddings=True, tie_embeddings=True,
    )
    B, S = 2, 8

    key = jax.random.PRNGKey(0)
    k_param, k_src, k_tgt = jax.random.split(key, 3)
    params = init_params(k_param, cfg, max_len=S)

    src = jax.random.randint(k_src, (B, S), 3, cfg["vocab_size"], dtype=jnp.int32)
    tgt = jax.random.randint(k_tgt, (B, S), 3, cfg["vocab_size"], dtype=jnp.int32)
    src = src.at[1, -2:].set(cfg["pad_token_id"])  # some encoder padding

    # key-padding keep masks (1 = real token, 0 = pad); decoder causal mask is in-kernel.
    e_mask = (src != cfg["pad_token_id"]).astype(jnp.float32)[:, None, :]
    t_mask = (tgt != cfg["pad_token_id"]).astype(jnp.float32)[:, None, :]

    fwd = jax.jit(lambda p, s, t, em, tm_: transformer_forward(p, cfg, s, t, em, tm_))
    logits = fwd(params, src, tgt, e_mask, t_mask)
    logits = jax.block_until_ready(logits)

    assert logits.shape == (B, S, cfg["vocab_size"]), logits.shape
    assert bool(jnp.all(jnp.isfinite(logits)))

    # TODO(synk): compute_loss / generate (greedy & beam search) are host-side utilities,
    # not part of the module's forward pass.
    print("KERNEL_OK")
</pallas_src>

<mosaic_0001>
module attributes {stable_mosaic.version = 11 : i64} {
  func.func @_mha_kernel(%arg0: i32, %arg1: i32, %arg2: memref<1x1x8xf32, #tpu.memory_space<vmem>>, %arg3: memref<1x8x1x4x8xbf16, #tpu.memory_space<vmem>>, %arg4: memref<1x8x1x4x8xbf16, #tpu.memory_space<vmem>>, %arg5: memref<1x8x1x4x8xbf16, #tpu.memory_space<vmem>>, %arg6: memref<1x8x4x8xbf16, #tpu.memory_space<vmem>>) attributes {dimension_semantics = [#tpu.dimension_semantics<parallel>, #tpu.dimension_semantics<parallel>], iteration_bounds = array<i64: 2, 1>, scalar_prefetch = 0 : i64, scratch_operands = 0 : i64, tpu.core_type = #tpu.core_type<tc>, window_params = [{transform_indices = @transform_0, window_bounds = array<i64: 1, 1, 8>}, {transform_indices = @transform_1, window_bounds = array<i64: 1, 8, 1, 4, 8>}, {transform_indices = @transform_2, window_bounds = array<i64: 1, 8, 1, 4, 8>}, {transform_indices = @transform_3, window_bounds = array<i64: 1, 8, 1, 4, 8>}, {transform_indices = @transform_4, window_bounds = array<i64: 1, 8, 4, 8>}]} {
    %c0 = arith.constant 0 : index
    %c0_0 = arith.constant 0 : index
    %c0_1 = arith.constant 0 : index
    %c0_2 = arith.constant 0 : index
    %c0_3 = arith.constant 0 : index
    %0 = vector.load %arg3[%c0, %c0_0, %c0_1, %c0_2, %c0_3] : memref<1x8x1x4x8xbf16, #tpu.memory_space<vmem>>, vector<1x8x1x4x8xbf16>
    %1 = vector.shape_cast %0 : vector<1x8x1x4x8xbf16> to vector<8x4x8xbf16>
    %2 = tpu.transpose %1, [1, 0, 2] : vector<8x4x8xbf16> -> vector<4x8x8xbf16>
    %cst = arith.constant 3.535160e-01 : bf16
    %3 = vector.broadcast %cst : bf16 to vector<4x8x8xbf16>
    %4 = arith.mulf %2, %3 : vector<4x8x8xbf16>
    %c0_4 = arith.constant 0 : index
    %c0_5 = arith.constant 0 : index
    %c0_6 = arith.constant 0 : index
    %c0_7 = arith.constant 0 : index
    %c0_8 = arith.constant 0 : index
    %5 = vector.load %arg4[%c0_4, %c0_5, %c0_6, %c0_7, %c0_8] : memref<1x8x1x4x8xbf16, #tpu.memory_space<vmem>>, vector<1x8x1x4x8xbf16>
    %6 = vector.shape_cast %5 : vector<1x8x1x4x8xbf16> to vector<8x4x8xbf16>
    %7 = tpu.transpose %6, [1, 0, 2] : vector<8x4x8xbf16> -> vector<4x8x8xbf16>
    %c0_9 = arith.constant 0 : index
    %c0_10 = arith.constant 0 : index
    %c0_11 = arith.constant 0 : index
    %c0_12 = arith.constant 0 : index
    %c0_13 = arith.constant 0 : index
    %8 = vector.load %arg5[%c0_9, %c0_10, %c0_11, %c0_12, %c0_13] : memref<1x8x1x4x8xbf16, #tpu.memory_space<vmem>>, vector<1x8x1x4x8xbf16>
    %9 = vector.shape_cast %8 : vector<1x8x1x4x8xbf16> to vector<8x4x8xbf16>
    %10 = tpu.transpose %9, [1, 0, 2] : vector<8x4x8xbf16> -> vector<4x8x8xbf16>
    "tpu.trace_start"() <{level = 10 : i32, message = "hqd,hkd->hqk"}> : () -> ()
    %cst_14 = arith.constant dense<0.000000e+00> : vector<4x8x8xf32>
    %11 = tpu.matmul %4, %7, %cst_14 {dimension_numbers = #tpu.dot_dimension_numbers<[2], [2], [1], [1], [0, 0, 0, 1, 1, 1], [0], [0]>} : vector<4x8x8xbf16>, vector<4x8x8xbf16>, vector<4x8x8xf32> -> vector<4x8x8xf32>
    "tpu.trace_stop"() : () -> ()
    %c0_15 = arith.constant 0 : index
    %c0_16 = arith.constant 0 : index
    %c0_17 = arith.constant 0 : index
    %12 = vector.load %arg2[%c0_15, %c0_16, %c0_17] : memref<1x1x8xf32, #tpu.memory_space<vmem>>, vector<1x1x8xf32>
    %13 = vector.shape_cast %12 : vector<1x1x8xf32> to vector<1x8xf32>
    %cst_18 = arith.constant 0.000000e+00 : f32
    %14 = vector.broadcast %cst_18 : f32 to vector<1x8xf32>
    %15 = arith.cmpf ogt, %13, %14 : vector<1x8xf32>
    %cst_19 = arith.constant 0.000000e+00 : f32
    %cst_20 = arith.constant -1.000000e+09 : f32
    %16 = vector.broadcast %cst_19 : f32 to vector<1x8xf32>
    %17 = vector.broadcast %cst_20 : f32 to vector<1x8xf32>
    %18 = arith.select %15, %16, %17 : vector<1x8xi1>, vector<1x8xf32>
    %19 = vector.shape_cast %18 : vector<1x8xf32> to vector<1x1x8xf32>
    %20 = vector.broadcast %19 : vector<1x1x8xf32> to vector<4x8x8xf32>
    %21 = arith.addf %11, %20 : vector<4x8x8xf32>
    %c8_i32 = arith.constant 8 : i32
    %22 = arith.muli %arg1, %c8_i32 : i32
    %23 = tpu.iota {dimensions = array<i32: 0>} : vector<8x8xi32>
    %24 = vector.broadcast %22 : i32 to vector<8x8xi32>
    %25 = arith.addi %24, %23 : vector<8x8xi32>
    %26 = tpu.iota {dimensions = array<i32: 1>} : vector<8x8xi32>
    %27 = arith.cmpi sle, %26, %25 : vector<8x8xi32>
    %28 = vector.shape_cast %27 : vector<8x8xi1> to vector<1x8x8xi1>
    %cst_21 = arith.constant -1.000000e+09 : f32
    %29 = vector.shape_cast %28 : vector<1x8x8xi1> to vector<1x8x8xi1>
    %30 = vector.broadcast %29 : vector<1x8x8xi1> to vector<4x8x8xi1>
    %31 = vector.broadcast %cst_21 : f32 to vector<4x8x8xf32>
    %32 = arith.select %30, %21, %31 : vector<4x8x8xi1>, vector<4x8x8xf32>
    %cst_22 = arith.constant dense<0xFF800000> : vector<4x8xf32>
    %33 = vector.multi_reduction <maximumf>, %32, %cst_22 [2] : vector<4x8x8xf32> to vector<4x8xf32>
    %34 = vector.shape_cast %33 : vector<4x8xf32> to vector<4x8x1xf32>
    %35 = vector.broadcast %34 : vector<4x8x1xf32> to vector<4x8x8xf32>
    %36 = arith.subf %32, %35 : vector<4x8x8xf32>
    %37 = math.exp %36 : vector<4x8x8xf32>
    %cst_23 = arith.constant dense<0.000000e+00> : vector<4x8xf32>
    %38 = vector.multi_reduction <add>, %37, %cst_23 [2] : vector<4x8x8xf32> to vector<4x8xf32>
    %39 = vector.shape_cast %38 : vector<4x8xf32> to vector<4x8x1xf32>
    %40 = tpu.reciprocal %39 {approx = true} : vector<4x8x1xf32> -> vector<4x8x1xf32>
    %41 = vector.broadcast %40 : vector<4x8x1xf32> to vector<4x8x8xf32>
    %42 = arith.mulf %37, %41 : vector<4x8x8xf32>
    %43 = arith.truncf %42 : vector<4x8x8xf32> to vector<4x8x8xbf16>
    "tpu.trace_start"() <{level = 10 : i32, message = "hqk,hkd->hqd"}> : () -> ()
    %cst_24 = arith.constant dense<0.000000e+00> : vector<4x8x8xf32>
    %44 = tpu.matmul %43, %10, %cst_24 {dimension_numbers = #tpu.dot_dimension_numbers<[2], [1], [1], [2], [0, 0, 0, 1, 1, 2], [0], [0]>} : vector<4x8x8xbf16>, vector<4x8x8xbf16>, vector<4x8x8xf32> -> vector<4x8x8xf32>
    "tpu.trace_stop"() : () -> ()
    %45 = tpu.transpose %44, [1, 0, 2] : vector<4x8x8xf32> -> vector<8x4x8xf32>
    %46 = vector.shape_cast %45 : vector<8x4x8xf32> to vector<1x8x4x8xf32>
    %47 = arith.truncf %46 : vector<1x8x4x8xf32> to vector<1x8x4x8xbf16>
    %c0_25 = arith.constant 0 : index
    %c0_26 = arith.constant 0 : index
    %c0_27 = arith.constant 0 : index
    %c0_28 = arith.constant 0 : index
    %48 = vector.load %arg6[%c0_25, %c0_26, %c0_27, %c0_28] : memref<1x8x4x8xbf16, #tpu.memory_space<vmem>>, vector<1x8x4x8xbf16>
    tpu.vector_store %arg6[%c0_25, %c0_26, %c0_27, %c0_28], %47 {strides = array<i32>} : memref<1x8x4x8xbf16, #tpu.memory_space<vmem>>, vector<1x8x4x8xbf16>,
    return
  }
  func.func @transform_0(%arg0: i32, %arg1: i32) -> (i32, i32, i32) {
    %c0_i32 = arith.constant 0 : i32
    %c0_i32_0 = arith.constant 0 : i32
    %c0_i32_1 = arith.constant 0 : i32
    return %arg0, %c0_i32, %c0_i32_0 : i32, i32, i32
  }
  func.func @transform_1(%arg0: i32, %arg1: i32) -> (i32, i32, i32, i32, i32) {
    %c0_i32 = arith.constant 0 : i32
    %c0_i32_0 = arith.constant 0 : i32
    %c0_i32_1 = arith.constant 0 : i32
    %c0_i32_2 = arith.constant 0 : i32
    return %arg0, %arg1, %c0_i32, %c0_i32_0, %c0_i32_1 : i32, i32, i32, i32, i32
  }
  func.func @transform_2(%arg0: i32, %arg1: i32) -> (i32, i32, i32, i32, i32) {
    %c0_i32 = arith.constant 0 : i32
    %c1_i32 = arith.constant 1 : i32
    %c0_i32_0 = arith.constant 0 : i32
    %c0_i32_1 = arith.constant 0 : i32
    %c0_i32_2 = arith.constant 0 : i32
    return %arg0, %c0_i32, %c1_i32, %c0_i32_0, %c0_i32_1 : i32, i32, i32, i32, i32
  }
  func.func @transform_3(%arg0: i32, %arg1: i32) -> (i32, i32, i32, i32, i32) {
    %c0_i32 = arith.constant 0 : i32
    %c2_i32 = arith.constant 2 : i32
    %c0_i32_0 = arith.constant 0 : i32
    %c0_i32_1 = arith.constant 0 : i32
    %c0_i32_2 = arith.constant 0 : i32
    return %arg0, %c0_i32, %c2_i32, %c0_i32_0, %c0_i32_1 : i32, i32, i32, i32, i32
  }
  func.func @transform_4(%arg0: i32, %arg1: i32) -> (i32, i32, i32, i32) {
    %c0_i32 = arith.constant 0 : i32
    %c0_i32_0 = arith.constant 0 : i32
    %c0_i32_1 = arith.constant 0 : i32
    return %arg0, %arg1, %c0_i32, %c0_i32_0 : i32, i32, i32, i32
  }
}

module attributes {stable_mosaic.version = 11 : i64} {
  func.func @_linear_kernel(%arg0: i32, %arg1: i32, %arg2: i32, %arg3: memref<16x32xbf16, #tpu.memory_space<vmem>>, %arg4: memref<32x96xbf16, #tpu.memory_space<vmem>>, %arg5: memref<1x96xbf16, #tpu.memory_space<vmem>>, %arg6: memref<16x96xbf16, #tpu.memory_space<vmem>>, %arg7: memref<16x96xf32, #tpu.memory_space<vmem>>) attributes {dimension_semantics = [#tpu.dimension_semantics<parallel>, #tpu.dimension_semantics<parallel>, #tpu.dimension_semantics<arbitrary>], iteration_bounds = array<i64: 1, 1, 1>, scalar_prefetch = 0 : i64, scratch_operands = 1 : i64, tpu.core_type = #tpu.core_type<tc>, window_params = [{transform_indices = @transform_0, window_bounds = array<i64: 16, 32>}, {transform_indices = @transform_1, window_bounds = array<i64: 32, 96>}, {transform_indices = @transform_2, window_bounds = array<i64: 1, 96>}, {transform_indices = @transform_3, window_bounds = array<i64: 16, 96>}]} {
    %c0_i32 = arith.constant 0 : i32
    %0 = arith.cmpi eq, %arg2, %c0_i32 : i32
    %1 = arith.extui %0 : i1 to i32
    %c0_i32_0 = arith.constant 0 : i32
    %2 = arith.cmpi ne, %1, %c0_i32_0 : i32
    scf.if %2 {
      %cst_10 = arith.constant 0.000000e+00 : f32
      %12 = vector.broadcast %cst_10 : f32 to vector<16x96xf32>
      %c0_11 = arith.constant 0 : index
      %c0_12 = arith.constant 0 : index
      %13 = vector.load %arg7[%c0_11, %c0_12] : memref<16x96xf32, #tpu.memory_space<vmem>>, vector<16x96xf32>
      tpu.vector_store %arg7[%c0_11, %c0_12], %12 {strides = array<i32>} : memref<16x96xf32, #tpu.memory_space<vmem>>, vector<16x96xf32>,
    } else {
    }
    %c0 = arith.constant 0 : index
    %c0_1 = arith.constant 0 : index
    %3 = vector.load %arg7[%c0, %c0_1] : memref<16x96xf32, #tpu.memory_space<vmem>>, vector<16x96xf32>
    %c0_2 = arith.constant 0 : index
    %c0_3 = arith.constant 0 : index
    %4 = vector.load %arg3[%c0_2, %c0_3] : memref<16x32xbf16, #tpu.memory_space<vmem>>, vector<16x32xbf16>
    %c0_4 = arith.constant 0 : index
    %c0_5 = arith.constant 0 : index
    %5 = vector.load %arg4[%c0_4, %c0_5] : memref<32x96xbf16, #tpu.memory_space<vmem>>, vector<32x96xbf16>
    %cst = arith.constant dense<0.000000e+00> : vector<16x96xf32>
    %6 = tpu.matmul %4, %5, %cst {dimension_numbers = #tpu.dot_dimension_numbers<[1], [0], [0], [1], [0, 0, 1, 1], [], []>} : vector<16x32xbf16>, vector<32x96xbf16>, vector<16x96xf32> -> vector<16x96xf32>
    %7 = arith.addf %3, %6 : vector<16x96xf32>
    %c0_6 = arith.constant 0 : index
    %c0_7 = arith.constant 0 : index
    %8 = vector.load %arg7[%c0_6, %c0_7] : memref<16x96xf32, #tpu.memory_space<vmem>>, vector<16x96xf32>
    tpu.vector_store %arg7[%c0_6, %c0_7], %7 {strides = array<i32>} : memref<16x96xf32, #tpu.memory_space<vmem>>, vector<16x96xf32>,
    %c0_i32_8 = arith.constant 0 : i32
    %9 = arith.cmpi eq, %arg2, %c0_i32_8 : i32
    %10 = arith.extui %9 : i1 to i32
    %c0_i32_9 = arith.constant 0 : i32
    %11 = arith.cmpi ne, %10, %c0_i32_9 : i32
    scf.if %11 {
      %c0_10 = arith.constant 0 : index
      %c0_11 = arith.constant 0 : index
      %12 = vector.load %arg7[%c0_10, %c0_11] : memref<16x96xf32, #tpu.memory_space<vmem>>, vector<16x96xf32>
      %c0_12 = arith.constant 0 : index
      %c0_13 = arith.constant 0 : index
      %13 = vector.load %arg5[%c0_12, %c0_13] : memref<1x96xbf16, #tpu.memory_space<vmem>>, vector<1x96xbf16>
      %14 = arith.extf %13 : vector<1x96xbf16> to vector<1x96xf32>
      %15 = vector.broadcast %14 : vector<1x96xf32> to vector<16x96xf32>
      %16 = arith.addf %12, %15 : vector<16x96xf32>
      %17 = arith.truncf %16 : vector<16x96xf32> to vector<16x96xbf16>
      %c0_14 = arith.constant 0 : index
      %c0_15 = arith.constant 0 : index
      %18 = vector.load %arg6[%c0_14, %c0_15] : memref<16x96xbf16, #tpu.memory_space<vmem>>, vector<16x96xbf16>
      tpu.vector_store %arg6[%c0_14, %c0_15], %17 {strides = array<i32>} : memref<16x96xbf16, #tpu.memory_space<vmem>>, vector<16x96xbf16>,
    } else {
    }
    return
  }
  func.func @transform_0(%arg0: i32, %arg1: i32, %arg2: i32) -> (i32, i32) {
    %c0_i32 = arith.constant 0 : i32
    return %arg0, %arg2 : i32, i32
  }
  func.func @transform_1(%arg0: i32, %arg1: i32, %arg2: i32) -> (i32, i32) {
    %c0_i32 = arith.constant 0 : i32
    return %arg2, %arg1 : i32, i32
  }
  func.func @transform_2(%arg0: i32, %arg1: i32, %arg2: i32) -> (i32, i32) {
    %c0_i32 = arith.constant 0 : i32
    %c0_i32_0 = arith.constant 0 : i32
    return %c0_i32, %arg1 : i32, i32
  }
  func.func @transform_3(%arg0: i32, %arg1: i32, %arg2: i32) -> (i32, i32) {
    %c0_i32 = arith.constant 0 : i32
    return %arg0, %arg1 : i32, i32
  }
}

module attributes {stable_mosaic.version = 11 : i64} {
  func.func @_linear_kernel(%arg0: i32, %arg1: i32, %arg2: i32, %arg3: memref<16x32xbf16, #tpu.memory_space<vmem>>, %arg4: memref<32x32xbf16, #tpu.memory_space<vmem>>, %arg5: memref<1x32xbf16, #tpu.memory_space<vmem>>, %arg6: memref<16x32xbf16, #tpu.memory_space<vmem>>, %arg7: memref<16x32xf32, #tpu.memory_space<vmem>>) attributes {dimension_semantics = [#tpu.dimension_semantics<parallel>, #tpu.dimension_semantics<parallel>, #tpu.dimension_semantics<arbitrary>], iteration_bounds = array<i64: 1, 1, 1>, scalar_prefetch = 0 : i64, scratch_operands = 1 : i64, tpu.core_type = #tpu.core_type<tc>, window_params = [{transform_indices = @transform_0, window_bounds = array<i64: 16, 32>}, {transform_indices = @transform_1, window_bounds = array<i64: 32, 32>}, {transform_indices = @transform_2, window_bounds = array<i64: 1, 32>}, {transform_indices = @transform_3, window_bounds = array<i64: 16, 32>}]} {
    %c0_i32 = arith.constant 0 : i32
    %0 = arith.cmpi eq, %arg2, %c0_i32 : i32
    %1 = arith.extui %0 : i1 to i32
    %c0_i32_0 = arith.constant 0 : i32
    %2 = arith.cmpi ne, %1, %c0_i32_0 : i32
    scf.if %2 {
      %cst_10 = arith.constant 0.000000e+00 : f32
      %12 = vector.broadcast %cst_10 : f32 to vector<16x32xf32>
      %c0_11 = arith.constant 0 : index
      %c0_12 = arith.constant 0 : index
      %13 = vector.load %arg7[%c0_11, %c0_12] : memref<16x32xf32, #tpu.memory_space<vmem>>, vector<16x32xf32>
      tpu.vector_store %arg7[%c0_11, %c0_12], %12 {strides = array<i32>} : memref<16x32xf32, #tpu.memory_space<vmem>>, vector<16x32xf32>,
    } else {
    }
    %c0 = arith.constant 0 : index
    %c0_1 = arith.constant 0 : index
    %3 = vector.load %arg7[%c0, %c0_1] : memref<16x32xf32, #tpu.memory_space<vmem>>, vector<16x32xf32>
    %c0_2 = arith.constant 0 : index
    %c0_3 = arith.constant 0 : index
    %4 = vector.load %arg3[%c0_2, %c0_3] : memref<16x32xbf16, #tpu.memory_space<vmem>>, vector<16x32xbf16>
    %c0_4 = arith.constant 0 : index
    %c0_5 = arith.constant 0 : index
    %5 = vector.load %arg4[%c0_4, %c0_5] : memref<32x32xbf16, #tpu.memory_space<vmem>>, vector<32x32xbf16>
    %cst = arith.constant dense<0.000000e+00> : vector<16x32xf32>
    %6 = tpu.matmul %4, %5, %cst {dimension_numbers = #tpu.dot_dimension_numbers<[1], [0], [0], [1], [0, 0, 1, 1], [], []>} : vector<16x32xbf16>, vector<32x32xbf16>, vector<16x32xf32> -> vector<16x32xf32>
    %7 = arith.addf %3, %6 : vector<16x32xf32>
    %c0_6 = arith.constant 0 : index
    %c0_7 = arith.constant 0 : index
    %8 = vector.load %arg7[%c0_6, %c0_7] : memref<16x32xf32, #tpu.memory_space<vmem>>, vector<16x32xf32>
    tpu.vector_store %arg7[%c0_6, %c0_7], %7 {strides = array<i32>} : memref<16x32xf32, #tpu.memory_space<vmem>>, vector<16x32xf32>,
    %c0_i32_8 = arith.constant 0 : i32
    %9 = arith.cmpi eq, %arg2, %c0_i32_8 : i32
    %10 = arith.extui %9 : i1 to i32
    %c0_i32_9 = arith.constant 0 : i32
    %11 = arith.cmpi ne, %10, %c0_i32_9 : i32
    scf.if %11 {
      %c0_10 = arith.constant 0 : index
      %c0_11 = arith.constant 0 : index
      %12 = vector.load %arg7[%c0_10, %c0_11] : memref<16x32xf32, #tpu.memory_space<vmem>>, vector<16x32xf32>
      %c0_12 = arith.constant 0 : index
      %c0_13 = arith.constant 0 : index
      %13 = vector.load %arg5[%c0_12, %c0_13] : memref<1x32xbf16, #tpu.memory_space<vmem>>, vector<1x32xbf16>
      %14 = arith.extf %13 : vector<1x32xbf16> to vector<1x32xf32>
      %15 = vector.broadcast %14 : vector<1x32xf32> to vector<16x32xf32>
      %16 = arith.addf %12, %15 : vector<16x32xf32>
      %17 = arith.truncf %16 : vector<16x32xf32> to vector<16x32xbf16>
      %c0_14 = arith.constant 0 : index
      %c0_15 = arith.constant 0 : index
      %18 = vector.load %arg6[%c0_14, %c0_15] : memref<16x32xbf16, #tpu.memory_space<vmem>>, vector<16x32xbf16>
      tpu.vector_store %arg6[%c0_14, %c0_15], %17 {strides = array<i32>} : memref<16x32xbf16, #tpu.memory_space<vmem>>, vector<16x32xbf16>,
    } else {
    }
    return
  }
  func.func @transform_0(%arg0: i32, %arg1: i32, %arg2: i32) -> (i32, i32) {
    %c0_i32 = arith.constant 0 : i32
    return %arg0, %arg2 : i32, i32
  }
  func.func @transform_1(%arg0: i32, %arg1: i32, %arg2: i32) -> (i32, i32) {
    %c0_i32 = arith.constant 0 : i32
    return %arg2, %arg1 : i32, i32
  }
  func.func @transform_2(%arg0: i32, %arg1: i32, %arg2: i32) -> (i32, i32) {
    %c0_i32 = arith.constant 0 : i32
    %c0_i32_0 = arith.constant 0 : i32
    return %c0_i32, %arg1 : i32, i32
  }
  func.func @transform_3(%arg0: i32, %arg1: i32, %arg2: i32) -> (i32, i32) {
    %c0_i32 = arith.constant 0 : i32
    return %arg0, %arg1 : i32, i32
  }
}

module attributes {stable_mosaic.version = 11 : i64} {
  func.func @_add_ln_kernel(%arg0: i32, %arg1: memref<16x32xbf16, #tpu.memory_space<vmem>>, %arg2: memref<16x32xbf16, #tpu.memory_space<vmem>>, %arg3: memref<1x32xbf16, #tpu.memory_space<vmem>>, %arg4: memref<1x32xbf16, #tpu.memory_space<vmem>>, %arg5: memref<16x32xbf16, #tpu.memory_space<vmem>>) attributes {dimension_semantics = [#tpu.dimension_semantics<parallel>], iteration_bounds = array<i64: 1>, scalar_prefetch = 0 : i64, scratch_operands = 0 : i64, tpu.core_type = #tpu.core_type<tc>, window_params = [{transform_indices = @transform_0, window_bounds = array<i64: 16, 32>}, {transform_indices = @transform_1, window_bounds = array<i64: 16, 32>}, {pipeline_mode = #tpu.pipeline_mode<synchronous>, transform_indices = @transform_2, window_bounds = array<i64: 1, 32>}, {pipeline_mode = #tpu.pipeline_mode<synchronous>, transform_indices = @transform_3, window_bounds = array<i64: 1, 32>}, {transform_indices = @transform_4, window_bounds = array<i64: 16, 32>}]} {
    %c0 = arith.constant 0 : index
    %c0_0 = arith.constant 0 : index
    %0 = vector.load %arg1[%c0, %c0_0] : memref<16x32xbf16, #tpu.memory_space<vmem>>, vector<16x32xbf16>
    %1 = arith.extf %0 : vector<16x32xbf16> to vector<16x32xf32>
    %c0_1 = arith.constant 0 : index
    %c0_2 = arith.constant 0 : index
    %2 = vector.load %arg2[%c0_1, %c0_2] : memref<16x32xbf16, #tpu.memory_space<vmem>>, vector<16x32xbf16>
    %3 = arith.extf %2 : vector<16x32xbf16> to vector<16x32xf32>
    %4 = arith.addf %1, %3 : vector<16x32xf32>
    %c0_3 = arith.constant 0 : index
    %c0_4 = arith.constant 0 : index
    %5 = vector.load %arg3[%c0_3, %c0_4] : memref<1x32xbf16, #tpu.memory_space<vmem>>, vector<1x32xbf16>
    %6 = arith.extf %5 : vector<1x32xbf16> to vector<1x32xf32>
    %c0_5 = arith.constant 0 : index
    %c0_6 = arith.constant 0 : index
    %7 = vector.load %arg4[%c0_5, %c0_6] : memref<1x32xbf16, #tpu.memory_space<vmem>>, vector<1x32xbf16>
    %8 = arith.extf %7 : vector<1x32xbf16> to vector<1x32xf32>
    %cst = arith.constant dense<0.000000e+00> : vector<16xf32>
    %9 = vector.multi_reduction <add>, %4, %cst [1] : vector<16x32xf32> to vector<16xf32>
    %10 = vector.shape_cast %9 : vector<16xf32> to vector<16x1xf32>
    %cst_7 = arith.constant 3.200000e+01 : f32
    %11 = vector.broadcast %cst_7 : f32 to vector<16x1xf32>
    %12 = arith.divf %10, %11 : vector<16x1xf32>
    %13 = vector.broadcast %12 : vector<16x1xf32> to vector<16x32xf32>
    %14 = arith.subf %4, %13 : vector<16x32xf32>
    %15 = arith.mulf %14, %14 : vector<16x32xf32>
    %cst_8 = arith.constant dense<0.000000e+00> : vector<16xf32>
    %16 = vector.multi_reduction <add>, %15, %cst_8 [1] : vector<16x32xf32> to vector<16xf32>
    %17 = vector.shape_cast %16 : vector<16xf32> to vector<16x1xf32>
    %cst_9 = arith.constant 3.200000e+01 : f32
    %18 = vector.broadcast %cst_9 : f32 to vector<16x1xf32>
    %19 = arith.divf %17, %18 : vector<16x1xf32>
    %20 = vector.broadcast %12 : vector<16x1xf32> to vector<16x32xf32>
    %21 = arith.subf %4, %20 : vector<16x32xf32>
    %cst_10 = arith.constant 9.99999997E-7 : f32
    %22 = vector.broadcast %cst_10 : f32 to vector<16x1xf32>
    %23 = arith.addf %19, %22 : vector<16x1xf32>
    %24 = math.rsqrt %23 : vector<16x1xf32>
    %25 = vector.broadcast %24 : vector<16x1xf32> to vector<16x32xf32>
    %26 = arith.mulf %21, %25 : vector<16x32xf32>
    %27 = vector.broadcast %6 : vector<1x32xf32> to vector<16x32xf32>
    %28 = arith.mulf %26, %27 : vector<16x32xf32>
    %29 = vector.broadcast %8 : vector<1x32xf32> to vector<16x32xf32>
    %30 = arith.addf %28, %29 : vector<16x32xf32>
    %31 = arith.truncf %30 : vector<16x32xf32> to vector<16x32xbf16>
    %c0_11 = arith.constant 0 : index
    %c0_12 = arith.constant 0 : index
    %32 = vector.load %arg5[%c0_11, %c0_12] : memref<16x32xbf16, #tpu.memory_space<vmem>>, vector<16x32xbf16>
    tpu.vector_store %arg5[%c0_11, %c0_12], %31 {strides = array<i32>} : memref<16x32xbf16, #tpu.memory_space<vmem>>, vector<16x32xbf16>,
    return
  }
  func.func @transform_0(%arg0: i32) -> (i32, i32) {
    %c0_i32 = arith.constant 0 : i32
    %c0_i32_0 = arith.constant 0 : i32
    return %arg0, %c0_i32 : i32, i32
  }
  func.func @transform_1(%arg0: i32) -> (i32, i32) {
    %c0_i32 = arith.constant 0 : i32
    %c0_i32_0 = arith.constant 0 : i32
    return %arg0, %c0_i32 : i32, i32
  }
  func.func @transform_2(%arg0: i32) -> (i32, i32) {
    %c0_i32 = arith.constant 0 : i32
    %c0_i32_0 = arith.constant 0 : i32
    %c0_i32_1 = arith.constant 0 : i32
    return %c0_i32, %c0_i32_0 : i32, i32
  }
  func.func @transform_3(%arg0: i32) -> (i32, i32) {
    %c0_i32 = arith.constant 0 : i32
    %c0_i32_0 = arith.constant 0 : i32
    %c0_i32_1 = arith.constant 0 : i32
    return %c0_i32, %c0_i32_0 : i32, i32
  }
  func.func @transform_4(%arg0: i32) -> (i32, i32) {
    %c0_i32 = arith.constant 0 : i32
    %c0_i32_0 = arith.constant 0 : i32
    return %arg0, %c0_i32 : i32, i32
  }
}

module attributes {stable_mosaic.version = 11 : i64} {
  func.func @_mha_kernel(%arg0: i32, %arg1: i32, %arg2: memref<1x1x8xf32, #tpu.memory_space<vmem>>, %arg3: memref<1x8x1x4x8xbf16, #tpu.memory_space<vmem>>, %arg4: memref<1x8x1x4x8xbf16, #tpu.memory_space<vmem>>, %arg5: memref<1x8x1x4x8xbf16, #tpu.memory_space<vmem>>, %arg6: memref<1x8x4x8xbf16, #tpu.memory_space<vmem>>) attributes {dimension_semantics = [#tpu.dimension_semantics<parallel>, #tpu.dimension_semantics<parallel>], iteration_bounds = array<i64: 2, 1>, scalar_prefetch = 0 : i64, scratch_operands = 0 : i64, tpu.core_type = #tpu.core_type<tc>, window_params = [{transform_indices = @transform_0, window_bounds = array<i64: 1, 1, 8>}, {transform_indices = @transform_1, window_bounds = array<i64: 1, 8, 1, 4, 8>}, {transform_indices = @transform_2, window_bounds = array<i64: 1, 8, 1, 4, 8>}, {transform_indices = @transform_3, window_bounds = array<i64: 1, 8, 1, 4, 8>}, {transform_indices = @transform_4, window_bounds = array<i64: 1, 8, 4, 8>}]} {
    %c0 = arith.constant 0 : index
    %c0_0 = arith.constant 0 : index
    %c0_1 = arith.constant 0 : index
    %c0_2 = arith.constant 0 : index
    %c0_3 = arith.constant 0 : index
    %0 = vector.load %arg3[%c0, %c0_0, %c0_1, %c0_2, %c0_3] : memref<1x8x1x4x8xbf16, #tpu.memory_space<vmem>>, vector<1x8x1x4x8xbf16>
    %1 = vector.shape_cast %0 : vector<1x8x1x4x8xbf16> to vector<8x4x8xbf16>
    %2 = tpu.transpose %1, [1, 0, 2] : vector<8x4x8xbf16> -> vector<4x8x8xbf16>
    %cst = arith.constant 3.535160e-01 : bf16
    %3 = vector.broadcast %cst : bf16 to vector<4x8x8xbf16>
    %4 = arith.mulf %2, %3 : vector<4x8x8xbf16>
    %c0_4 = arith.constant 0 : index
    %c0_5 = arith.constant 0 : index
    %c0_6 = arith.constant 0 : index
    %c0_7 = arith.constant 0 : index
    %c0_8 = arith.constant 0 : index
    %5 = vector.load %arg4[%c0_4, %c0_5, %c0_6, %c0_7, %c0_8] : memref<1x8x1x4x8xbf16, #tpu.memory_space<vmem>>, vector<1x8x1x4x8xbf16>
    %6 = vector.shape_cast %5 : vector<1x8x1x4x8xbf16> to vector<8x4x8xbf16>
    %7 = tpu.transpose %6, [1, 0, 2] : vector<8x4x8xbf16> -> vector<4x8x8xbf16>
    %c0_9 = arith.constant 0 : index
    %c0_10 = arith.constant 0 : index
    %c0_11 = arith.constant 0 : index
    %c0_12 = arith.constant 0 : index
    %c0_13 = arith.constant 0 : index
    %8 = vector.load %arg5[%c0_9, %c0_10, %c0_11, %c0_12, %c0_13] : memref<1x8x1x4x8xbf16, #tpu.memory_space<vmem>>, vector<1x8x1x4x8xbf16>
    %9 = vector.shape_cast %8 : vector<1x8x1x4x8xbf16> to vector<8x4x8xbf16>
    %10 = tpu.transpose %9, [1, 0, 2] : vector<8x4x8xbf16> -> vector<4x8x8xbf16>
    "tpu.trace_start"() <{level = 10 : i32, message = "hqd,hkd->hqk"}> : () -> ()
    %cst_14 = arith.constant dense<0.000000e+00> : vector<4x8x8xf32>
    %11 = tpu.matmul %4, %7, %cst_14 {dimension_numbers = #tpu.dot_dimension_numbers<[2], [2], [1], [1], [0, 0, 0, 1, 1, 1], [0], [0]>} : vector<4x8x8xbf16>, vector<4x8x8xbf16>, vector<4x8x8xf32> -> vector<4x8x8xf32>
    "tpu.trace_stop"() : () -> ()
    %c0_15 = arith.constant 0 : index
    %c0_16 = arith.constant 0 : index
    %c0_17 = arith.constant 0 : index
    %12 = vector.load %arg2[%c0_15, %c0_16, %c0_17] : memref<1x1x8xf32, #tpu.memory_space<vmem>>, vector<1x1x8xf32>
    %13 = vector.shape_cast %12 : vector<1x1x8xf32> to vector<1x8xf32>
    %cst_18 = arith.constant 0.000000e+00 : f32
    %14 = vector.broadcast %cst_18 : f32 to vector<1x8xf32>
    %15 = arith.cmpf ogt, %13, %14 : vector<1x8xf32>
    %cst_19 = arith.constant 0.000000e+00 : f32
    %cst_20 = arith.constant -1.000000e+09 : f32
    %16 = vector.broadcast %cst_19 : f32 to vector<1x8xf32>
    %17 = vector.broadcast %cst_20 : f32 to vector<1x8xf32>
    %18 = arith.select %15, %16, %17 : vector<1x8xi1>, vector<1x8xf32>
    %19 = vector.shape_cast %18 : vector<1x8xf32> to vector<1x1x8xf32>
    %20 = vector.broadcast %19 : vector<1x1x8xf32> to vector<4x8x8xf32>
    %21 = arith.addf %11, %20 : vector<4x8x8xf32>
    %cst_21 = arith.constant dense<0xFF800000> : vector<4x8xf32>
    %22 = vector.multi_reduction <maximumf>, %21, %cst_21 [2] : vector<4x8x8xf32> to vector<4x8xf32>
    %23 = vector.shape_cast %22 : vector<4x8xf32> to vector<4x8x1xf32>
    %24 = vector.broadcast %23 : vector<4x8x1xf32> to vector<4x8x8xf32>
    %25 = arith.subf %21, %24 : vector<4x8x8xf32>
    %26 = math.exp %25 : vector<4x8x8xf32>
    %cst_22 = arith.constant dense<0.000000e+00> : vector<4x8xf32>
    %27 = vector.multi_reduction <add>, %26, %cst_22 [2] : vector<4x8x8xf32> to vector<4x8xf32>
    %28 = vector.shape_cast %27 : vector<4x8xf32> to vector<4x8x1xf32>
    %29 = tpu.reciprocal %28 {approx = true} : vector<4x8x1xf32> -> vector<4x8x1xf32>
    %30 = vector.broadcast %29 : vector<4x8x1xf32> to vector<4x8x8xf32>
    %31 = arith.mulf %26, %30 : vector<4x8x8xf32>
    %32 = arith.truncf %31 : vector<4x8x8xf32> to vector<4x8x8xbf16>
    "tpu.trace_start"() <{level = 10 : i32, message = "hqk,hkd->hqd"}> : () -> ()
    %cst_23 = arith.constant dense<0.000000e+00> : vector<4x8x8xf32>
    %33 = tpu.matmul %32, %10, %cst_23 {dimension_numbers = #tpu.dot_dimension_numbers<[2], [1], [1], [2], [0, 0, 0, 1, 1, 2], [0], [0]>} : vector<4x8x8xbf16>, vector<4x8x8xbf16>, vector<4x8x8xf32> -> vector<4x8x8xf32>
    "tpu.trace_stop"() : () -> ()
    %34 = tpu.transpose %33, [1, 0, 2] : vector<4x8x8xf32> -> vector<8x4x8xf32>
    %35 = vector.shape_cast %34 : vector<8x4x8xf32> to vector<1x8x4x8xf32>
    %36 = arith.truncf %35 : vector<1x8x4x8xf32> to vector<1x8x4x8xbf16>
    %c0_24 = arith.constant 0 : index
    %c0_25 = arith.constant 0 : index
    %c0_26 = arith.constant 0 : index
    %c0_27 = arith.constant 0 : index
    %37 = vector.load %arg6[%c0_24, %c0_25, %c0_26, %c0_27] : memref<1x8x4x8xbf16, #tpu.memory_space<vmem>>, vector<1x8x4x8xbf16>
    tpu.vector_store %arg6[%c0_24, %c0_25, %c0_26, %c0_27], %36 {strides = array<i32>} : memref<1x8x4x8xbf16, #tpu.memory_space<vmem>>, vector<1x8x4x8xbf16>,
    return
  }
  func.func @transform_0(%arg0: i32, %arg1: i32) -> (i32, i32, i32) {
    %c0_i32 = arith.constant 0 : i32
    %c0_i32_0 = arith.constant 0 : i32
    %c0_i32_1 = arith.constant 0 : i32
    return %arg0, %c0_i32, %c0_i32_0 : i32, i32, i32
  }
  func.func @transform_1(%arg0: i32, %arg1: i32) -> (i32, i32, i32, i32, i32) {
    %c0_i32 = arith.constant 0 : i32
    %c0_i32_0 = arith.constant 0 : i32
    %c0_i32_1 = arith.constant 0 : i32
    %c0_i32_2 = arith.constant 0 : i32
    return %arg0, %arg1, %c0_i32, %c0_i32_0, %c0_i32_1 : i32, i32, i32, i32, i32
  }
  func.func @transform_2(%arg0: i32, %arg1: i32) -> (i32, i32, i32, i32, i32) {
    %c0_i32 = arith.constant 0 : i32
    %c1_i32 = arith.constant 1 : i32
    %c0_i32_0 = arith.constant 0 : i32
    %c0_i32_1 = arith.constant 0 : i32
    %c0_i32_2 = arith.constant 0 : i32
    return %arg0, %c0_i32, %c1_i32, %c0_i32_0, %c0_i32_1 : i32, i32, i32, i32, i32
  }
  func.func @transform_3(%arg0: i32, %arg1: i32) -> (i32, i32, i32, i32, i32) {
    %c0_i32 = arith.constant 0 : i32
    %c2_i32 = arith.constant 2 : i32
    %c0_i32_0 = arith.constant 0 : i32
    %c0_i32_1 = arith.constant 0 : i32
    %c0_i32_2 = arith.constant 0 : i32
    return %arg0, %c0_i32, %c2_i32, %c0_i32_0, %c0_i32_1 : i32, i32, i32, i32, i32
  }
  func.func @transform_4(%arg0: i32, %arg1: i32) -> (i32, i32, i32, i32) {
    %c0_i32 = arith.constant 0 : i32
    %c0_i32_0 = arith.constant 0 : i32
    %c0_i32_1 = arith.constant 0 : i32
    return %arg0, %arg1, %c0_i32, %c0_i32_0 : i32, i32, i32, i32
  }
}

module attributes {stable_mosaic.version = 11 : i64} {
  func.func @_linear_kernel(%arg0: i32, %arg1: i32, %arg2: i32, %arg3: memref<16x32xbf16, #tpu.memory_space<vmem>>, %arg4: memref<32x64xbf16, #tpu.memory_space<vmem>>, %arg5: memref<1x64xbf16, #tpu.memory_space<vmem>>, %arg6: memref<16x64xbf16, #tpu.memory_space<vmem>>, %arg7: memref<16x64xf32, #tpu.memory_space<vmem>>) attributes {dimension_semantics = [#tpu.dimension_semantics<parallel>, #tpu.dimension_semantics<parallel>, #tpu.dimension_semantics<arbitrary>], iteration_bounds = array<i64: 1, 1, 1>, scalar_prefetch = 0 : i64, scratch_operands = 1 : i64, tpu.core_type = #tpu.core_type<tc>, window_params = [{transform_indices = @transform_0, window_bounds = array<i64: 16, 32>}, {transform_indices = @transform_1, window_bounds = array<i64: 32, 64>}, {transform_indices = @transform_2, window_bounds = array<i64: 1, 64>}, {transform_indices = @transform_3, window_bounds = array<i64: 16, 64>}]} {
    %c0_i32 = arith.constant 0 : i32
    %0 = arith.cmpi eq, %arg2, %c0_i32 : i32
    %1 = arith.extui %0 : i1 to i32
    %c0_i32_0 = arith.constant 0 : i32
    %2 = arith.cmpi ne, %1, %c0_i32_0 : i32
    scf.if %2 {
      %cst_10 = arith.constant 0.000000e+00 : f32
      %12 = vector.broadcast %cst_10 : f32 to vector<16x64xf32>
      %c0_11 = arith.constant 0 : index
      %c0_12 = arith.constant 0 : index
      %13 = vector.load %arg7[%c0_11, %c0_12] : memref<16x64xf32, #tpu.memory_space<vmem>>, vector<16x64xf32>
      tpu.vector_store %arg7[%c0_11, %c0_12], %12 {strides = array<i32>} : memref<16x64xf32, #tpu.memory_space<vmem>>, vector<16x64xf32>,
    } else {
    }
    %c0 = arith.constant 0 : index
    %c0_1 = arith.constant 0 : index
    %3 = vector.load %arg7[%c0, %c0_1] : memref<16x64xf32, #tpu.memory_space<vmem>>, vector<16x64xf32>
    %c0_2 = arith.constant 0 : index
    %c0_3 = arith.constant 0 : index
    %4 = vector.load %arg3[%c0_2, %c0_3] : memref<16x32xbf16, #tpu.memory_space<vmem>>, vector<16x32xbf16>
    %c0_4 = arith.constant 0 : index
    %c0_5 = arith.constant 0 : index
    %5 = vector.load %arg4[%c0_4, %c0_5] : memref<32x64xbf16, #tpu.memory_space<vmem>>, vector<32x64xbf16>
    %cst = arith.constant dense<0.000000e+00> : vector<16x64xf32>
    %6 = tpu.matmul %4, %5, %cst {dimension_numbers = #tpu.dot_dimension_numbers<[1], [0], [0], [1], [0, 0, 1, 1], [], []>} : vector<16x32xbf16>, vector<32x64xbf16>, vector<16x64xf32> -> vector<16x64xf32>
    %7 = arith.addf %3, %6 : vector<16x64xf32>
    %c0_6 = arith.constant 0 : index
    %c0_7 = arith.constant 0 : index
    %8 = vector.load %arg7[%c0_6, %c0_7] : memref<16x64xf32, #tpu.memory_space<vmem>>, vector<16x64xf32>
    tpu.vector_store %arg7[%c0_6, %c0_7], %7 {strides = array<i32>} : memref<16x64xf32, #tpu.memory_space<vmem>>, vector<16x64xf32>,
    %c0_i32_8 = arith.constant 0 : i32
    %9 = arith.cmpi eq, %arg2, %c0_i32_8 : i32
    %10 = arith.extui %9 : i1 to i32
    %c0_i32_9 = arith.constant 0 : i32
    %11 = arith.cmpi ne, %10, %c0_i32_9 : i32
    scf.if %11 {
      %c0_10 = arith.constant 0 : index
      %c0_11 = arith.constant 0 : index
      %12 = vector.load %arg7[%c0_10, %c0_11] : memref<16x64xf32, #tpu.memory_space<vmem>>, vector<16x64xf32>
      %c0_12 = arith.constant 0 : index
      %c0_13 = arith.constant 0 : index
      %13 = vector.load %arg5[%c0_12, %c0_13] : memref<1x64xbf16, #tpu.memory_space<vmem>>, vector<1x64xbf16>
      %14 = arith.extf %13 : vector<1x64xbf16> to vector<1x64xf32>
      %15 = vector.broadcast %14 : vector<1x64xf32> to vector<16x64xf32>
      %16 = arith.addf %12, %15 : vector<16x64xf32>
      %cst_14 = arith.constant 0.000000e+00 : f32
      %17 = vector.broadcast %cst_14 : f32 to vector<16x64xf32>
      %18 = arith.maximumf %16, %17 : vector<16x64xf32>
      %19 = arith.truncf %18 : vector<16x64xf32> to vector<16x64xbf16>
      %c0_15 = arith.constant 0 : index
      %c0_16 = arith.constant 0 : index
      %20 = vector.load %arg6[%c0_15, %c0_16] : memref<16x64xbf16, #tpu.memory_space<vmem>>, vector<16x64xbf16>
      tpu.vector_store %arg6[%c0_15, %c0_16], %19 {strides = array<i32>} : memref<16x64xbf16, #tpu.memory_space<vmem>>, vector<16x64xbf16>,
    } else {
    }
    return
  }
  func.func @transform_0(%arg0: i32, %arg1: i32, %arg2: i32) -> (i32, i32) {
    %c0_i32 = arith.constant 0 : i32
    return %arg0, %arg2 : i32, i32
  }
  func.func @transform_1(%arg0: i32, %arg1: i32, %arg2: i32) -> (i32, i32) {
    %c0_i32 = arith.constant 0 : i32
    return %arg2, %arg1 : i32, i32
  }
  func.func @transform_2(%arg0: i32, %arg1: i32, %arg2: i32) -> (i32, i32) {
    %c0_i32 = arith.constant 0 : i32
    %c0_i32_0 = arith.constant 0 : i32
    return %c0_i32, %arg1 : i32, i32
  }
  func.func @transform_3(%arg0: i32, %arg1: i32, %arg2: i32) -> (i32, i32) {
    %c0_i32 = arith.constant 0 : i32
    return %arg0, %arg1 : i32, i32
  }
}

module attributes {stable_mosaic.version = 11 : i64} {
  func.func @_ln_kernel(%arg0: i32, %arg1: memref<16x32xbf16, #tpu.memory_space<vmem>>, %arg2: memref<1x32xbf16, #tpu.memory_space<vmem>>, %arg3: memref<1x32xbf16, #tpu.memory_space<vmem>>, %arg4: memref<16x32xbf16, #tpu.memory_space<vmem>>) attributes {dimension_semantics = [#tpu.dimension_semantics<parallel>], iteration_bounds = array<i64: 1>, scalar_prefetch = 0 : i64, scratch_operands = 0 : i64, tpu.core_type = #tpu.core_type<tc>, window_params = [{transform_indices = @transform_0, window_bounds = array<i64: 16, 32>}, {pipeline_mode = #tpu.pipeline_mode<synchronous>, transform_indices = @transform_1, window_bounds = array<i64: 1, 32>}, {pipeline_mode = #tpu.pipeline_mode<synchronous>, transform_indices = @transform_2, window_bounds = array<i64: 1, 32>}, {transform_indices = @transform_3, window_bounds = array<i64: 16, 32>}]} {
    %c0 = arith.constant 0 : index
    %c0_0 = arith.constant 0 : index
    %0 = vector.load %arg1[%c0, %c0_0] : memref<16x32xbf16, #tpu.memory_space<vmem>>, vector<16x32xbf16>
    %1 = arith.extf %0 : vector<16x32xbf16> to vector<16x32xf32>
    %c0_1 = arith.constant 0 : index
    %c0_2 = arith.constant 0 : index
    %2 = vector.load %arg2[%c0_1, %c0_2] : memref<1x32xbf16, #tpu.memory_space<vmem>>, vector<1x32xbf16>
    %3 = arith.extf %2 : vector<1x32xbf16> to vector<1x32xf32>
    %c0_3 = arith.constant 0 : index
    %c0_4 = arith.constant 0 : index
    %4 = vector.load %arg3[%c0_3, %c0_4] : memref<1x32xbf16, #tpu.memory_space<vmem>>, vector<1x32xbf16>
    %5 = arith.extf %4 : vector<1x32xbf16> to vector<1x32xf32>
    %cst = arith.constant dense<0.000000e+00> : vector<16xf32>
    %6 = vector.multi_reduction <add>, %1, %cst [1] : vector<16x32xf32> to vector<16xf32>
    %7 = vector.shape_cast %6 : vector<16xf32> to vector<16x1xf32>
    %cst_5 = arith.constant 3.200000e+01 : f32
    %8 = vector.broadcast %cst_5 : f32 to vector<16x1xf32>
    %9 = arith.divf %7, %8 : vector<16x1xf32>
    %10 = vector.broadcast %9 : vector<16x1xf32> to vector<16x32xf32>
    %11 = arith.subf %1, %10 : vector<16x32xf32>
    %12 = arith.mulf %11, %11 : vector<16x32xf32>
    %cst_6 = arith.constant dense<0.000000e+00> : vector<16xf32>
    %13 = vector.multi_reduction <add>, %12, %cst_6 [1] : vector<16x32xf32> to vector<16xf32>
    %14 = vector.shape_cast %13 : vector<16xf32> to vector<16x1xf32>
    %cst_7 = arith.constant 3.200000e+01 : f32
    %15 = vector.broadcast %cst_7 : f32 to vector<16x1xf32>
    %16 = arith.divf %14, %15 : vector<16x1xf32>
    %17 = vector.broadcast %9 : vector<16x1xf32> to vector<16x32xf32>
    %18 = arith.subf %1, %17 : vector<16x32xf32>
    %cst_8 = arith.constant 9.99999997E-7 : f32
    %19 = vector.broadcast %cst_8 : f32 to vector<16x1xf32>
    %20 = arith.addf %16, %19 : vector<16x1xf32>
    %21 = math.rsqrt %20 : vector<16x1xf32>
    %22 = vector.broadcast %21 : vector<16x1xf32> to vector<16x32xf32>
    %23 = arith.mulf %18, %22 : vector<16x32xf32>
    %24 = vector.broadcast %3 : vector<1x32xf32> to vector<16x32xf32>
    %25 = arith.mulf %23, %24 : vector<16x32xf32>
    %26 = vector.broadcast %5 : vector<1x32xf32> to vector<16x32xf32>
    %27 = arith.addf %25, %26 : vector<16x32xf32>
    %28 = arith.truncf %27 : vector<16x32xf32> to vector<16x32xbf16>
    %c0_9 = arith.constant 0 : index
    %c0_10 = arith.constant 0 : index
    %29 = vector.load %arg4[%c0_9, %c0_10] : memref<16x32xbf16, #tpu.memory_space<vmem>>, vector<16x32xbf16>
    tpu.vector_store %arg4[%c0_9, %c0_10], %28 {strides = array<i32>} : memref<16x32xbf16, #tpu.memory_space<vmem>>, vector<16x32xbf16>,
    return
  }
  func.func @transform_0(%arg0: i32) -> (i32, i32) {
    %c0_i32 = arith.constant 0 : i32
    %c0_i32_0 = arith.constant 0 : i32
    return %arg0, %c0_i32 : i32, i32
  }
  func.func @transform_1(%arg0: i32) -> (i32, i32) {
    %c0_i32 = arith.constant 0 : i32
    %c0_i32_0 = arith.constant 0 : i32
    %c0_i32_1 = arith.constant 0 : i32
    return %c0_i32, %c0_i32_0 : i32, i32
  }
  func.func @transform_2(%arg0: i32) -> (i32, i32) {
    %c0_i32 = arith.constant 0 : i32
    %c0_i32_0 = arith.constant 0 : i32
    %c0_i32_1 = arith.constant 0 : i32
    return %c0_i32, %c0_i32_0 : i32, i32
  }
  func.func @transform_3(%arg0: i32) -> (i32, i32) {
    %c0_i32 = arith.constant 0 : i32
    %c0_i32_0 = arith.constant 0 : i32
    return %arg0, %c0_i32 : i32, i32
  }
}

module attributes {stable_mosaic.version = 11 : i64} {
  func.func @_linear_kernel(%arg0: i32, %arg1: i32, %arg2: i32, %arg3: memref<16x64xbf16, #tpu.memory_space<vmem>>, %arg4: memref<64x32xbf16, #tpu.memory_space<vmem>>, %arg5: memref<1x32xbf16, #tpu.memory_space<vmem>>, %arg6: memref<16x32xbf16, #tpu.memory_space<vmem>>, %arg7: memref<16x32xf32, #tpu.memory_space<vmem>>) attributes {dimension_semantics = [#tpu.dimension_semantics<parallel>, #tpu.dimension_semantics<parallel>, #tpu.dimension_semantics<arbitrary>], iteration_bounds = array<i64: 1, 1, 1>, scalar_prefetch = 0 : i64, scratch_operands = 1 : i64, tpu.core_type = #tpu.core_type<tc>, window_params = [{transform_indices = @transform_0, window_bounds = array<i64: 16, 64>}, {transform_indices = @transform_1, window_bounds = array<i64: 64, 32>}, {transform_indices = @transform_2, window_bounds = array<i64: 1, 32>}, {transform_indices = @transform_3, window_bounds = array<i64: 16, 32>}]} {
    %c0_i32 = arith.constant 0 : i32
    %0 = arith.cmpi eq, %arg2, %c0_i32 : i32
    %1 = arith.extui %0 : i1 to i32
    %c0_i32_0 = arith.constant 0 : i32
    %2 = arith.cmpi ne, %1, %c0_i32_0 : i32
    scf.if %2 {
      %cst_10 = arith.constant 0.000000e+00 : f32
      %12 = vector.broadcast %cst_10 : f32 to vector<16x32xf32>
      %c0_11 = arith.constant 0 : index
      %c0_12 = arith.constant 0 : index
      %13 = vector.load %arg7[%c0_11, %c0_12] : memref<16x32xf32, #tpu.memory_space<vmem>>, vector<16x32xf32>
      tpu.vector_store %arg7[%c0_11, %c0_12], %12 {strides = array<i32>} : memref<16x32xf32, #tpu.memory_space<vmem>>, vector<16x32xf32>,
    } else {
    }
    %c0 = arith.constant 0 : index
    %c0_1 = arith.constant 0 : index
    %3 = vector.load %arg7[%c0, %c0_1] : memref<16x32xf32, #tpu.memory_space<vmem>>, vector<16x32xf32>
    %c0_2 = arith.constant 0 : index
    %c0_3 = arith.constant 0 : index
    %4 = vector.load %arg3[%c0_2, %c0_3] : memref<16x64xbf16, #tpu.memory_space<vmem>>, vector<16x64xbf16>
    %c0_4 = arith.constant 0 : index
    %c0_5 = arith.constant 0 : index
    %5 = vector.load %arg4[%c0_4, %c0_5] : memref<64x32xbf16, #tpu.memory_space<vmem>>, vector<64x32xbf16>
    %cst = arith.constant dense<0.000000e+00> : vector<16x32xf32>
    %6 = tpu.matmul %4, %5, %cst {dimension_numbers = #tpu.dot_dimension_numbers<[1], [0], [0], [1], [0, 0, 1, 1], [], []>} : vector<16x64xbf16>, vector<64x32xbf16>, vector<16x32xf32> -> vector<16x32xf32>
    %7 = arith.addf %3, %6 : vector<16x32xf32>
    %c0_6 = arith.constant 0 : index
    %c0_7 = arith.constant 0 : index
    %8 = vector.load %arg7[%c0_6, %c0_7] : memref<16x32xf32, #tpu.memory_space<vmem>>, vector<16x32xf32>
    tpu.vector_store %arg7[%c0_6, %c0_7], %7 {strides = array<i32>} : memref<16x32xf32, #tpu.memory_space<vmem>>, vector<16x32xf32>,
    %c0_i32_8 = arith.constant 0 : i32
    %9 = arith.cmpi eq, %arg2, %c0_i32_8 : i32
    %10 = arith.extui %9 : i1 to i32
    %c0_i32_9 = arith.constant 0 : i32
    %11 = arith.cmpi ne, %10, %c0_i32_9 : i32
    scf.if %11 {
      %c0_10 = arith.constant 0 : index
      %c0_11 = arith.constant 0 : index
      %12 = vector.load %arg7[%c0_10, %c0_11] : memref<16x32xf32, #tpu.memory_space<vmem>>, vector<16x32xf32>
      %c0_12 = arith.constant 0 : index
      %c0_13 = arith.constant 0 : index
      %13 = vector.load %arg5[%c0_12, %c0_13] : memref<1x32xbf16, #tpu.memory_space<vmem>>, vector<1x32xbf16>
      %14 = arith.extf %13 : vector<1x32xbf16> to vector<1x32xf32>
      %15 = vector.broadcast %14 : vector<1x32xf32> to vector<16x32xf32>
      %16 = arith.addf %12, %15 : vector<16x32xf32>
      %17 = arith.truncf %16 : vector<16x32xf32> to vector<16x32xbf16>
      %c0_14 = arith.constant 0 : index
      %c0_15 = arith.constant 0 : index
      %18 = vector.load %arg6[%c0_14, %c0_15] : memref<16x32xbf16, #tpu.memory_space<vmem>>, vector<16x32xbf16>
      tpu.vector_store %arg6[%c0_14, %c0_15], %17 {strides = array<i32>} : memref<16x32xbf16, #tpu.memory_space<vmem>>, vector<16x32xbf16>,
    } else {
    }
    return
  }
  func.func @transform_0(%arg0: i32, %arg1: i32, %arg2: i32) -> (i32, i32) {
    %c0_i32 = arith.constant 0 : i32
    return %arg0, %arg2 : i32, i32
  }
  func.func @transform_1(%arg0: i32, %arg1: i32, %arg2: i32) -> (i32, i32) {
    %c0_i32 = arith.constant 0 : i32
    return %arg2, %arg1 : i32, i32
  }
  func.func @transform_2(%arg0: i32, %arg1: i32, %arg2: i32) -> (i32, i32) {
    %c0_i32 = arith.constant 0 : i32
    %c0_i32_0 = arith.constant 0 : i32
    return %c0_i32, %arg1 : i32, i32
  }
  func.func @transform_3(%arg0: i32, %arg1: i32, %arg2: i32) -> (i32, i32) {
    %c0_i32 = arith.constant 0 : i32
    return %arg0, %arg1 : i32, i32
  }
}

module attributes {stable_mosaic.version = 11 : i64} {
  func.func @_linear_kernel(%arg0: i32, %arg1: i32, %arg2: i32, %arg3: memref<16x32xbf16, #tpu.memory_space<vmem>>, %arg4: memref<32x64xbf16, #tpu.memory_space<vmem>>, %arg5: memref<1x64xbf16, #tpu.memory_space<vmem>>, %arg6: memref<16x64xbf16, #tpu.memory_space<vmem>>, %arg7: memref<16x64xf32, #tpu.memory_space<vmem>>) attributes {dimension_semantics = [#tpu.dimension_semantics<parallel>, #tpu.dimension_semantics<parallel>, #tpu.dimension_semantics<arbitrary>], iteration_bounds = array<i64: 1, 1, 1>, scalar_prefetch = 0 : i64, scratch_operands = 1 : i64, tpu.core_type = #tpu.core_type<tc>, window_params = [{transform_indices = @transform_0, window_bounds = array<i64: 16, 32>}, {transform_indices = @transform_1, window_bounds = array<i64: 32, 64>}, {transform_indices = @transform_2, window_bounds = array<i64: 1, 64>}, {transform_indices = @transform_3, window_bounds = array<i64: 16, 64>}]} {
    %c0_i32 = arith.constant 0 : i32
    %0 = arith.cmpi eq, %arg2, %c0_i32 : i32
    %1 = arith.extui %0 : i1 to i32
    %c0_i32_0 = arith.constant 0 : i32
    %2 = arith.cmpi ne, %1, %c0_i32_0 : i32
    scf.if %2 {
      %cst_10 = arith.constant 0.000000e+00 : f32
      %12 = vector.broadcast %cst_10 : f32 to vector<16x64xf32>
      %c0_11 = arith.constant 0 : index
      %c0_12 = arith.constant 0 : index
      %13 = vector.load %arg7[%c0_11, %c0_12] : memref<16x64xf32, #tpu.memory_space<vmem>>, vector<16x64xf32>
      tpu.vector_store %arg7[%c0_11, %c0_12], %12 {strides = array<i32>} : memref<16x64xf32, #tpu.memory_space<vmem>>, vector<16x64xf32>,
    } else {
    }
    %c0 = arith.constant 0 : index
    %c0_1 = arith.constant 0 : index
    %3 = vector.load %arg7[%c0, %c0_1] : memref<16x64xf32, #tpu.memory_space<vmem>>, vector<16x64xf32>
    %c0_2 = arith.constant 0 : index
    %c0_3 = arith.constant 0 : index
    %4 = vector.load %arg3[%c0_2, %c0_3] : memref<16x32xbf16, #tpu.memory_space<vmem>>, vector<16x32xbf16>
    %c0_4 = arith.constant 0 : index
    %c0_5 = arith.constant 0 : index
    %5 = vector.load %arg4[%c0_4, %c0_5] : memref<32x64xbf16, #tpu.memory_space<vmem>>, vector<32x64xbf16>
    %cst = arith.constant dense<0.000000e+00> : vector<16x64xf32>
    %6 = tpu.matmul %4, %5, %cst {dimension_numbers = #tpu.dot_dimension_numbers<[1], [0], [0], [1], [0, 0, 1, 1], [], []>} : vector<16x32xbf16>, vector<32x64xbf16>, vector<16x64xf32> -> vector<16x64xf32>
    %7 = arith.addf %3, %6 : vector<16x64xf32>
    %c0_6 = arith.constant 0 : index
    %c0_7 = arith.constant 0 : index
    %8 = vector.load %arg7[%c0_6, %c0_7] : memref<16x64xf32, #tpu.memory_space<vmem>>, vector<16x64xf32>
    tpu.vector_store %arg7[%c0_6, %c0_7], %7 {strides = array<i32>} : memref<16x64xf32, #tpu.memory_space<vmem>>, vector<16x64xf32>,
    %c0_i32_8 = arith.constant 0 : i32
    %9 = arith.cmpi eq, %arg2, %c0_i32_8 : i32
    %10 = arith.extui %9 : i1 to i32
    %c0_i32_9 = arith.constant 0 : i32
    %11 = arith.cmpi ne, %10, %c0_i32_9 : i32
    scf.if %11 {
      %c0_10 = arith.constant 0 : index
      %c0_11 = arith.constant 0 : index
      %12 = vector.load %arg7[%c0_10, %c0_11] : memref<16x64xf32, #tpu.memory_space<vmem>>, vector<16x64xf32>
      %c0_12 = arith.constant 0 : index
      %c0_13 = arith.constant 0 : index
      %13 = vector.load %arg5[%c0_12, %c0_13] : memref<1x64xbf16, #tpu.memory_space<vmem>>, vector<1x64xbf16>
      %14 = arith.extf %13 : vector<1x64xbf16> to vector<1x64xf32>
      %15 = vector.broadcast %14 : vector<1x64xf32> to vector<16x64xf32>
      %16 = arith.addf %12, %15 : vector<16x64xf32>
      %17 = arith.truncf %16 : vector<16x64xf32> to vector<16x64xbf16>
      %c0_14 = arith.constant 0 : index
      %c0_15 = arith.constant 0 : index
      %18 = vector.load %arg6[%c0_14, %c0_15] : memref<16x64xbf16, #tpu.memory_space<vmem>>, vector<16x64xbf16>
      tpu.vector_store %arg6[%c0_14, %c0_15], %17 {strides = array<i32>} : memref<16x64xbf16, #tpu.memory_space<vmem>>, vector<16x64xbf16>,
    } else {
    }
    return
  }
  func.func @transform_0(%arg0: i32, %arg1: i32, %arg2: i32) -> (i32, i32) {
    %c0_i32 = arith.constant 0 : i32
    return %arg0, %arg2 : i32, i32
  }
  func.func @transform_1(%arg0: i32, %arg1: i32, %arg2: i32) -> (i32, i32) {
    %c0_i32 = arith.constant 0 : i32
    return %arg2, %arg1 : i32, i32
  }
  func.func @transform_2(%arg0: i32, %arg1: i32, %arg2: i32) -> (i32, i32) {
    %c0_i32 = arith.constant 0 : i32
    %c0_i32_0 = arith.constant 0 : i32
    return %c0_i32, %arg1 : i32, i32
  }
  func.func @transform_3(%arg0: i32, %arg1: i32, %arg2: i32) -> (i32, i32) {
    %c0_i32 = arith.constant 0 : i32
    return %arg0, %arg1 : i32, i32
  }
}

module attributes {stable_mosaic.version = 11 : i64} {
  func.func @_mha_kernel(%arg0: i32, %arg1: i32, %arg2: memref<1x1x8xf32, #tpu.memory_space<vmem>>, %arg3: memref<1x8x1x4x8xbf16, #tpu.memory_space<vmem>>, %arg4: memref<1x8x1x4x8xbf16, #tpu.memory_space<vmem>>, %arg5: memref<1x8x1x4x8xbf16, #tpu.memory_space<vmem>>, %arg6: memref<1x8x4x8xbf16, #tpu.memory_space<vmem>>) attributes {dimension_semantics = [#tpu.dimension_semantics<parallel>, #tpu.dimension_semantics<parallel>], iteration_bounds = array<i64: 2, 1>, scalar_prefetch = 0 : i64, scratch_operands = 0 : i64, tpu.core_type = #tpu.core_type<tc>, window_params = [{transform_indices = @transform_0, window_bounds = array<i64: 1, 1, 8>}, {transform_indices = @transform_1, window_bounds = array<i64: 1, 8, 1, 4, 8>}, {transform_indices = @transform_2, window_bounds = array<i64: 1, 8, 1, 4, 8>}, {transform_indices = @transform_3, window_bounds = array<i64: 1, 8, 1, 4, 8>}, {transform_indices = @transform_4, window_bounds = array<i64: 1, 8, 4, 8>}]} {
    %c0 = arith.constant 0 : index
    %c0_0 = arith.constant 0 : index
    %c0_1 = arith.constant 0 : index
    %c0_2 = arith.constant 0 : index
    %c0_3 = arith.constant 0 : index
    %0 = vector.load %arg3[%c0, %c0_0, %c0_1, %c0_2, %c0_3] : memref<1x8x1x4x8xbf16, #tpu.memory_space<vmem>>, vector<1x8x1x4x8xbf16>
    %1 = vector.shape_cast %0 : vector<1x8x1x4x8xbf16> to vector<8x4x8xbf16>
    %2 = tpu.transpose %1, [1, 0, 2] : vector<8x4x8xbf16> -> vector<4x8x8xbf16>
    %cst = arith.constant 3.535160e-01 : bf16
    %3 = vector.broadcast %cst : bf16 to vector<4x8x8xbf16>
    %4 = arith.mulf %2, %3 : vector<4x8x8xbf16>
    %c0_4 = arith.constant 0 : index
    %c0_5 = arith.constant 0 : index
    %c0_6 = arith.constant 0 : index
    %c0_7 = arith.constant 0 : index
    %c0_8 = arith.constant 0 : index
    %5 = vector.load %arg4[%c0_4, %c0_5, %c0_6, %c0_7, %c0_8] : memref<1x8x1x4x8xbf16, #tpu.memory_space<vmem>>, vector<1x8x1x4x8xbf16>
    %6 = vector.shape_cast %5 : vector<1x8x1x4x8xbf16> to vector<8x4x8xbf16>
    %7 = tpu.transpose %6, [1, 0, 2] : vector<8x4x8xbf16> -> vector<4x8x8xbf16>
    %c0_9 = arith.constant 0 : index
    %c0_10 = arith.constant 0 : index
    %c0_11 = arith.constant 0 : index
    %c0_12 = arith.constant 0 : index
    %c0_13 = arith.constant 0 : index
    %8 = vector.load %arg5[%c0_9, %c0_10, %c0_11, %c0_12, %c0_13] : memref<1x8x1x4x8xbf16, #tpu.memory_space<vmem>>, vector<1x8x1x4x8xbf16>
    %9 = vector.shape_cast %8 : vector<1x8x1x4x8xbf16> to vector<8x4x8xbf16>
    %10 = tpu.transpose %9, [1, 0, 2] : vector<8x4x8xbf16> -> vector<4x8x8xbf16>
    "tpu.trace_start"() <{level = 10 : i32, message = "hqd,hkd->hqk"}> : () -> ()
    %cst_14 = arith.constant dense<0.000000e+00> : vector<4x8x8xf32>
    %11 = tpu.matmul %4, %7, %cst_14 {dimension_numbers = #tpu.dot_dimension_numbers<[2], [2], [1], [1], [0, 0, 0, 1, 1, 1], [0], [0]>} : vector<4x8x8xbf16>, vector<4x8x8xbf16>, vector<4x8x8xf32> -> vector<4x8x8xf32>
    "tpu.trace_stop"() : () -> ()
    %c0_15 = arith.constant 0 : index
    %c0_16 = arith.constant 0 : index
    %c0_17 = arith.constant 0 : index
    %12 = vector.load %arg2[%c0_15, %c0_16, %c0_17] : memref<1x1x8xf32, #tpu.memory_space<vmem>>, vector<1x1x8xf32>
    %13 = vector.shape_cast %12 : vector<1x1x8xf32> to vector<1x8xf32>
    %cst_18 = arith.constant 0.000000e+00 : f32
    %14 = vector.broadcast %cst_18 : f32 to vector<1x8xf32>
    %15 = arith.cmpf ogt, %13, %14 : vector<1x8xf32>
    %cst_19 = arith.constant 0.000000e+00 : f32
    %cst_20 = arith.constant -1.000000e+09 : f32
    %16 = vector.broadcast %cst_19 : f32 to vector<1x8xf32>
    %17 = vector.broadcast %cst_20 : f32 to vector<1x8xf32>
    %18 = arith.select %15, %16, %17 : vector<1x8xi1>, vector<1x8xf32>
    %19 = vector.shape_cast %18 : vector<1x8xf32> to vector<1x1x8xf32>
    %20 = vector.broadcast %19 : vector<1x1x8xf32> to vector<4x8x8xf32>
    %21 = arith.addf %11, %20 : vector<4x8x8xf32>
    %cst_21 = arith.constant dense<0xFF800000> : vector<4x8xf32>
    %22 = vector.multi_reduction <maximumf>, %21, %cst_21 [2] : vector<4x8x8xf32> to vector<4x8xf32>
    %23 = vector.shape_cast %22 : vector<4x8xf32> to vector<4x8x1xf32>
    %24 = vector.broadcast %23 : vector<4x8x1xf32> to vector<4x8x8xf32>
    %25 = arith.subf %21, %24 : vector<4x8x8xf32>
    %26 = math.exp %25 : vector<4x8x8xf32>
    %cst_22 = arith.constant dense<0.000000e+00> : vector<4x8xf32>
    %27 = vector.multi_reduction <add>, %26, %cst_22 [2] : vector<4x8x8xf32> to vector<4x8xf32>
    %28 = vector.shape_cast %27 : vector<4x8xf32> to vector<4x8x1xf32>
    %29 = tpu.reciprocal %28 {approx = true} : vector<4x8x1xf32> -> vector<4x8x1xf32>
    %30 = vector.broadcast %29 : vector<4x8x1xf32> to vector<4x8x8xf32>
    %31 = arith.mulf %26, %30 : vector<4x8x8xf32>
    %32 = arith.truncf %31 : vector<4x8x8xf32> to vector<4x8x8xbf16>
    "tpu.trace_start"() <{level = 10 : i32, message = "hqk,hkd->hqd"}> : () -> ()
    %cst_23 = arith.constant dense<0.000000e+00> : vector<4x8x8xf32>
    %33 = tpu.matmul %32, %10, %cst_23 {dimension_numbers = #tpu.dot_dimension_numbers<[2], [1], [1], [2], [0, 0, 0, 1, 1, 2], [0], [0]>} : vector<4x8x8xbf16>, vector<4x8x8xbf16>, vector<4x8x8xf32> -> vector<4x8x8xf32>
    "tpu.trace_stop"() : () -> ()
    %34 = tpu.transpose %33, [1, 0, 2] : vector<4x8x8xf32> -> vector<8x4x8xf32>
    %35 = vector.shape_cast %34 : vector<8x4x8xf32> to vector<1x8x4x8xf32>
    %36 = arith.truncf %35 : vector<1x8x4x8xf32> to vector<1x8x4x8xbf16>
    %c0_24 = arith.constant 0 : index
    %c0_25 = arith.constant 0 : index
    %c0_26 = arith.constant 0 : index
    %c0_27 = arith.constant 0 : index
    %37 = vector.load %arg6[%c0_24, %c0_25, %c0_26, %c0_27] : memref<1x8x4x8xbf16, #tpu.memory_space<vmem>>, vector<1x8x4x8xbf16>
    tpu.vector_store %arg6[%c0_24, %c0_25, %c0_26, %c0_27], %36 {strides = array<i32>} : memref<1x8x4x8xbf16, #tpu.memory_space<vmem>>, vector<1x8x4x8xbf16>,
    return
  }
  func.func @transform_0(%arg0: i32, %arg1: i32) -> (i32, i32, i32) {
    %c0_i32 = arith.constant 0 : i32
    %c0_i32_0 = arith.constant 0 : i32
    %c0_i32_1 = arith.constant 0 : i32
    return %arg0, %c0_i32, %c0_i32_0 : i32, i32, i32
  }
  func.func @transform_1(%arg0: i32, %arg1: i32) -> (i32, i32, i32, i32, i32) {
    %c0_i32 = arith.constant 0 : i32
    %c0_i32_0 = arith.constant 0 : i32
    %c0_i32_1 = arith.constant 0 : i32
    %c0_i32_2 = arith.constant 0 : i32
    return %arg0, %arg1, %c0_i32, %c0_i32_0, %c0_i32_1 : i32, i32, i32, i32, i32
  }
  func.func @transform_2(%arg0: i32, %arg1: i32) -> (i32, i32, i32, i32, i32) {
    %c0_i32 = arith.constant 0 : i32
    %c0_i32_0 = arith.constant 0 : i32
    %c0_i32_1 = arith.constant 0 : i32
    %c0_i32_2 = arith.constant 0 : i32
    %c0_i32_3 = arith.constant 0 : i32
    return %arg0, %c0_i32, %c0_i32_0, %c0_i32_1, %c0_i32_2 : i32, i32, i32, i32, i32
  }
  func.func @transform_3(%arg0: i32, %arg1: i32) -> (i32, i32, i32, i32, i32) {
    %c0_i32 = arith.constant 0 : i32
    %c1_i32 = arith.constant 1 : i32
    %c0_i32_0 = arith.constant 0 : i32
    %c0_i32_1 = arith.constant 0 : i32
    %c0_i32_2 = arith.constant 0 : i32
    return %arg0, %c0_i32, %c1_i32, %c0_i32_0, %c0_i32_1 : i32, i32, i32, i32, i32
  }
  func.func @transform_4(%arg0: i32, %arg1: i32) -> (i32, i32, i32, i32) {
    %c0_i32 = arith.constant 0 : i32
    %c0_i32_0 = arith.constant 0 : i32
    %c0_i32_1 = arith.constant 0 : i32
    return %arg0, %arg1, %c0_i32, %c0_i32_0 : i32, i32, i32, i32
  }
}

module attributes {stable_mosaic.version = 11 : i64} {
  func.func @_linear_kernel(%arg0: i32, %arg1: i32, %arg2: i32, %arg3: memref<16x32xbf16, #tpu.memory_space<vmem>>, %arg4: memref<32x64xbf16, #tpu.memory_space<vmem>>, %arg5: memref<1x64xbf16, #tpu.memory_space<vmem>>, %arg6: memref<16x64xf32, #tpu.memory_space<vmem>>, %arg7: memref<16x64xf32, #tpu.memory_space<vmem>>) attributes {dimension_semantics = [#tpu.dimension_semantics<parallel>, #tpu.dimension_semantics<parallel>, #tpu.dimension_semantics<arbitrary>], iteration_bounds = array<i64: 1, 1, 1>, scalar_prefetch = 0 : i64, scratch_operands = 1 : i64, tpu.core_type = #tpu.core_type<tc>, window_params = [{transform_indices = @transform_0, window_bounds = array<i64: 16, 32>}, {transform_indices = @transform_1, window_bounds = array<i64: 32, 64>}, {transform_indices = @transform_2, window_bounds = array<i64: 1, 64>}, {transform_indices = @transform_3, window_bounds = array<i64: 16, 64>}]} {
    %c0_i32 = arith.constant 0 : i32
    %0 = arith.cmpi eq, %arg2, %c0_i32 : i32
    %1 = arith.extui %0 : i1 to i32
    %c0_i32_0 = arith.constant 0 : i32
    %2 = arith.cmpi ne, %1, %c0_i32_0 : i32
    scf.if %2 {
      %cst_10 = arith.constant 0.000000e+00 : f32
      %12 = vector.broadcast %cst_10 : f32 to vector<16x64xf32>
      %c0_11 = arith.constant 0 : index
      %c0_12 = arith.constant 0 : index
      %13 = vector.load %arg7[%c0_11, %c0_12] : memref<16x64xf32, #tpu.memory_space<vmem>>, vector<16x64xf32>
      tpu.vector_store %arg7[%c0_11, %c0_12], %12 {strides = array<i32>} : memref<16x64xf32, #tpu.memory_space<vmem>>, vector<16x64xf32>,
    } else {
    }
    %c0 = arith.constant 0 : index
    %c0_1 = arith.constant 0 : index
    %3 = vector.load %arg7[%c0, %c0_1] : memref<16x64xf32, #tpu.memory_space<vmem>>, vector<16x64xf32>
    %c0_2 = arith.constant 0 : index
    %c0_3 = arith.constant 0 : index
    %4 = vector.load %arg3[%c0_2, %c0_3] : memref<16x32xbf16, #tpu.memory_space<vmem>>, vector<16x32xbf16>
    %c0_4 = arith.constant 0 : index
    %c0_5 = arith.constant 0 : index
    %5 = vector.load %arg4[%c0_4, %c0_5] : memref<32x64xbf16, #tpu.memory_space<vmem>>, vector<32x64xbf16>
    %cst = arith.constant dense<0.000000e+00> : vector<16x64xf32>
    %6 = tpu.matmul %4, %5, %cst {dimension_numbers = #tpu.dot_dimension_numbers<[1], [0], [0], [1], [0, 0, 1, 1], [], []>} : vector<16x32xbf16>, vector<32x64xbf16>, vector<16x64xf32> -> vector<16x64xf32>
    %7 = arith.addf %3, %6 : vector<16x64xf32>
    %c0_6 = arith.constant 0 : index
    %c0_7 = arith.constant 0 : index
    %8 = vector.load %arg7[%c0_6, %c0_7] : memref<16x64xf32, #tpu.memory_space<vmem>>, vector<16x64xf32>
    tpu.vector_store %arg7[%c0_6, %c0_7], %7 {strides = array<i32>} : memref<16x64xf32, #tpu.memory_space<vmem>>, vector<16x64xf32>,
    %c0_i32_8 = arith.constant 0 : i32
    %9 = arith.cmpi eq, %arg2, %c0_i32_8 : i32
    %10 = arith.extui %9 : i1 to i32
    %c0_i32_9 = arith.constant 0 : i32
    %11 = arith.cmpi ne, %10, %c0_i32_9 : i32
    scf.if %11 {
      %c0_10 = arith.constant 0 : index
      %c0_11 = arith.constant 0 : index
      %12 = vector.load %arg7[%c0_10, %c0_11] : memref<16x64xf32, #tpu.memory_space<vmem>>, vector<16x64xf32>
      %c0_12 = arith.constant 0 : index
      %c0_13 = arith.constant 0 : index
      %13 = vector.load %arg5[%c0_12, %c0_13] : memref<1x64xbf16, #tpu.memory_space<vmem>>, vector<1x64xbf16>
      %14 = arith.extf %13 : vector<1x64xbf16> to vector<1x64xf32>
      %15 = vector.broadcast %14 : vector<1x64xf32> to vector<16x64xf32>
      %16 = arith.addf %12, %15 : vector<16x64xf32>
      %c0_14 = arith.constant 0 : index
      %c0_15 = arith.constant 0 : index
      %17 = vector.load %arg6[%c0_14, %c0_15] : memref<16x64xf32, #tpu.memory_space<vmem>>, vector<16x64xf32>
      tpu.vector_store %arg6[%c0_14, %c0_15], %16 {strides = array<i32>} : memref<16x64xf32, #tpu.memory_space<vmem>>, vector<16x64xf32>,
    } else {
    }
    return
  }
  func.func @transform_0(%arg0: i32, %arg1: i32, %arg2: i32) -> (i32, i32) {
    %c0_i32 = arith.constant 0 : i32
    return %arg0, %arg2 : i32, i32
  }
  func.func @transform_1(%arg0: i32, %arg1: i32, %arg2: i32) -> (i32, i32) {
    %c0_i32 = arith.constant 0 : i32
    return %arg2, %arg1 : i32, i32
  }
  func.func @transform_2(%arg0: i32, %arg1: i32, %arg2: i32) -> (i32, i32) {
    %c0_i32 = arith.constant 0 : i32
    %c0_i32_0 = arith.constant 0 : i32
    return %c0_i32, %arg1 : i32, i32
  }
  func.func @transform_3(%arg0: i32, %arg1: i32, %arg2: i32) -> (i32, i32) {
    %c0_i32 = arith.constant 0 : i32
    return %arg0, %arg1 : i32, i32
  }
}

</mosaic_0001>

<bundles_post_ra>
// kernel: _lambda_.56
= control target key start
LH: loop header
LB: loop body
LE: loop exit
PB: predicated region body
PF: predicated region fallthrough
CT: control target
= control target key end

     0   :  { %vm19_vm0 = vcmask 785408   ;;  %v106_v1 = vmov 0.0   ;;  %vm47_vm1 = vcmask 261120   ;;  %vm82_vm2 = vcmask 781312   ;;  %s149_s1 = inlined_call_operand.vmem [shape: bf16[32,96], index: 1, kind: input, shape index: {}]   ;;  %s150_s0 = inlined_call_operand.vmem [shape: bf16[16,32], index: 0, kind: input, shape index: {}]   ;;  %s151_s2 = inlined_call_operand.vmem [shape: bf16[1,96], index: 2, kind: input, shape index: {}]   ;;  %s152_s3 = inlined_call_operand.vmem [shape: bf16[16,96], index: 3, kind: output, shape index: {}]  }
   0x1   :  { %v104_v0 = vld [vmem:[%s149_s1 + $0x8] sm:$0xff]  ;;  %20 = vst.msk [vmem:[#allocation2] sm:$0xff] %vm19_vm0, %v106_v1  ;;  %v103_v2 = vld [vmem:[%s149_s1] sm:$0xff] }
   0x2   :  { %21 = vst.msk [vmem:[#allocation2 + $0x8] sm:$0xff] %vm19_vm0, %v106_v1  ;;  %57 = vmatpush.bf16.msra.mxu0 %v104_v0  ;;  %v102_v3 = vld [vmem:[%s150_s0] sm:$0xff] }
   0x3   :  { %v75_v6 = vld [vmem:[%s151_s2] sm:$0x1] }
   0x4   :  { %v76_v8 = vunpack.c.l.bf16 %v75_v6 }
   0x6   :  { %58 = vmatpush.bf16.msra.mxu0 %v103_v2  ;;  %v77_v10 = vperm.slane %v76_v8, 0 }
   0x8   :  { %v22_v4 = vld [vmem:[#allocation2] sm:$0xff] }
   0x9   :  { %101 = vmatmul.msk.bf16.vlgmr.msra.gmra.mxu0 %vm47_vm1, %v102_v3  ;;  %v23_v9 = vld [vmem:[#allocation2 + $0x8] sm:$0xff] }
  0x86   :  { %v60_v5 = vpop.f32.mrf.mxu0 }
  0x87   :  { %v65_v7 = vadd.f32 %v60_v5, %v22_v4 }
  0x89   :  { %68 = vst.msk [vmem:[#allocation2] sm:$0xff] %vm19_vm0, %v65_v7 }
  0x8e   :  { %v62_v11 = vpop.f32.mrf.mxu0 }
  0x8f   :  { %v66_v12 = vadd.f32 %v62_v11, %v23_v9 }
  0x90   :  { %v73_v13 = vld [vmem:[#allocation2] sm:$0xff] }
  0x91   :  { %v78_v14 = vadd.f32 %v77_v10, %v73_v13  ;;  %69 = vst.msk [vmem:[#allocation2 + $0x8] sm:$0xff] %vm19_vm0, %v66_v12 }
  0x93   :  { %v80_v15 = vpack.c.bf16 %v78_v14, %v78_v14 }
  0x95   :  { %83 = vst.msk [vmem:[%s152_s3] sm:$0xf] %vm82_vm2, %v80_v15 }
  0x98   :  { %v74_v16 = vld [vmem:[#allocation2 + $0x8] sm:$0xff] }
  0x99   :  { %v79_v17 = vadd.f32 %v77_v10, %v74_v16 }
  0x9b   :  { %v81_v18 = vpack.c.bf16 %v79_v17, %v79_v17 }
  0x9d   :  { %84 = vst.msk [vmem:[%s152_s3 + $0x4] sm:$0xf] %vm82_vm2, %v81_v18 }

// kernel: _lambda_.58
= control target key start
LH: loop header
LB: loop body
LE: loop exit
PB: predicated region body
PF: predicated region fallthrough
CT: control target
= control target key end

     0   :  { %vm19_vm0 = vcmask 261120   ;;  %v105_v1 = vmov 0.0   ;;  %vm81_vm1 = vcmask 257024   ;;  %s149_s1 = inlined_call_operand.vmem [shape: bf16[32,32], index: 1, kind: input, shape index: {}]   ;;  %s150_s0 = inlined_call_operand.vmem [shape: bf16[16,32], index: 0, kind: input, shape index: {}]   ;;  %s151_s2 = inlined_call_operand.vmem [shape: bf16[1,32], index: 2, kind: input, shape index: {}]   ;;  %s152_s3 = inlined_call_operand.vmem [shape: bf16[16,32], index: 3, kind: output, shape index: {}]  }
   0x1   :  { %v103_v0 = vld [vmem:[%s149_s1 + $0x8] sm:$0xff]  ;;  %20 = vst.msk [vmem:[#allocation2] sm:$0xff] %vm19_vm0, %v105_v1  ;;  %v102_v2 = vld [vmem:[%s149_s1] sm:$0xff] }
   0x2   :  { %21 = vst.msk [vmem:[#allocation2 + $0x8] sm:$0xff] %vm19_vm0, %v105_v1  ;;  %57 = vmatpush.bf16.msra.mxu0 %v103_v0  ;;  %v101_v3 = vld [vmem:[%s150_s0] sm:$0xff] }
   0x3   :  { %v74_v6 = vld [vmem:[%s151_s2] sm:$0x1] }
   0x4   :  { %v75_v8 = vunpack.c.l.bf16 %v74_v6 }
   0x6   :  { %58 = vmatpush.bf16.msra.mxu0 %v102_v2  ;;  %v76_v10 = vperm.slane %v75_v8, 0 }
   0x8   :  { %v22_v4 = vld [vmem:[#allocation2] sm:$0xff] }
   0x9   :  { %100 = vmatmul.msk.bf16.vlgmr.msra.gmra.mxu0 %vm19_vm0, %v101_v3  ;;  %v23_v9 = vld [vmem:[#allocation2 + $0x8] sm:$0xff] }
  0x86   :  { %v60_v5 = vpop.f32.mrf.mxu0 }
  0x87   :  { %v65_v7 = vadd.f32 %v60_v5, %v22_v4 }
  0x89   :  { %67 = vst.msk [vmem:[#allocation2] sm:$0xff] %vm19_vm0, %v65_v7 }
  0x8e   :  { %v62_v11 = vpop.f32.mrf.mxu0 }
  0x8f   :  { %v66_v12 = vadd.f32 %v62_v11, %v23_v9 }
  0x90   :  { %v72_v13 = vld [vmem:[#allocation2] sm:$0xff] }
  0x91   :  { %v77_v14 = vadd.f32 %v76_v10, %v72_v13  ;;  %68 = vst.msk [vmem:[#allocation2 + $0x8] sm:$0xff] %vm19_vm0, %v66_v12 }
  0x93   :  { %v79_v15 = vpack.c.bf16 %v77_v14, %v77_v14 }
  0x95   :  { %82 = vst.msk [vmem:[%s152_s3] sm:$0xf] %vm81_vm1, %v79_v15 }
  0x98   :  { %v73_v16 = vld [vmem:[#allocation2 + $0x8] sm:$0xff] }
  0x99   :  { %v78_v17 = vadd.f32 %v76_v10, %v73_v16 }
  0x9b   :  { %v80_v18 = vpack.c.bf16 %v78_v17, %v78_v17 }
  0x9d   :  { %83 = vst.msk [vmem:[%s152_s3 + $0x4] sm:$0xf] %vm81_vm1, %v80_v18 }

// kernel: _lambda_.57
= control target key start
LH: loop header
LB: loop body
LE: loop exit
PB: predicated region body
PF: predicated region fallthrough
CT: control target
= control target key end

     0   :  { %s1398_s15 = smov 0   ;;  %s1400_s16 = smov 0   ;;  %s1636_s0 = inlined_call_operand.vmem [shape: f32[2,1,8], index: 0, kind: input, shape index: {}]   ;;  %s1637_s1 = inlined_call_operand.vmem [shape: bf16[2,8,3,4,8], index: 1, kind: input, shape index: {}, may-alias: {1,2,3}]   ;;  %s1638_s2 = inlined_call_operand.vmem [shape: bf16[2,8,3,4,8], index: 2, kind: input, shape index: {}, may-alias: {1,2,3}]   ;;  %s1639_s3 = inlined_call_operand.vmem [shape: bf16[2,8,3,4,8], index: 3, kind: input, shape index: {}, may-alias: {1,2,3}]   ;;  %s1640_s4 = inlined_call_operand.vmem [shape: bf16[2,8,4,8], index: 4, kind: output, shape index: {}]  }
   0x1   :  { %s1402_s17 = smov 0   ;;  %s1404_s18 = smov 0  }
   0x2   :  { %s1406_s19 = smov 0  }
   0x3 LB: > { %s26_s20 = sadd.s32 1, %s1364_s18  ;;  %p68_p1 = scmp.ne.s32.totalorder %s1356_s16, %s1352_s15  ;;  %s1368_s19 = sphi %s1406_s19, %s14_s19   ;;  %s1364_s18 = sphi %s1404_s18, %s1645_s18   ;;  %s1360_s17 = sphi %s1402_s17, %s1644_s17   ;;  %s1356_s16 = sphi %s1400_s16, %s1643_s16   ;;  %s1352_s15 = sphi %s1398_s15, %s1642_s15  }
   0x4   : > { %p28_p0 = scmp.ge.s32.totalorder %s26_s20, 2  ;;  %p69_p2 = scmp.eq.s32.totalorder %s1368_s19, 0 }
   0x5   : > { %s61_s23 = sadd.s32 1, %s1356_s16  ;;  %p1230_p5 = scmp.ge.s32.totalorder %s1368_s19, 2 }
   0x6   : > { %s1647_s20 = smov (%p28_p0, %s26_s20), 0  ;;  %p1429_p3 = por %p69_p2, %p68_p1 }
   0x7   : > { %s56_s22 = ssub.s32 %s1364_s18, %s1647_s20  ;;  %174 = sbr.rel (%p1230_p5) target bundleno = 51 (0x33), region = 16 }
   0x8   : > { %p59_p4 = scmp.eq.s32.totalorder %s56_s22, 0 }
   0xa   : > { %s1437_s24 = scalar_select %p59_p4, %s1356_s16, %s61_s23  }
   0xc   : > { %183 = sbr.rel (!%p1429_p3) target bundleno = 25 (0x19), region = 24  ;;  %s185_s25 = sand.u32 (%p1429_p3), 1, %s1356_s16  }
   0xd   : > { %s1270_s26 = smul.u32 (%p1429_p3), 48, %s1364_s18  ;;  %s1231_s27 = sshll.u32 (%p1429_p3), %s185_s25, 4 }
   0xe   : > { %s187_s5 = scalar_lea.vmem (%p1429_p3), [#allocation2], %s1231_s27 }
   0xf   : > { %s193_s30 = scalar_lea.vmem (%p1429_p3), %s1637_s1, %s1270_s26 }
  0x10   : > { %v210_v0 = vld [vmem:[%s193_s30] sm:$0x3] (%p1429_p3)  ;;  %v212_v1 = vld [vmem:[%s193_s30 + $0x6] sm:$0x3] (%p1429_p3)  ;;  %v214_v2 = vld [vmem:[%s193_s30 + $0xc] sm:$0x3] (%p1429_p3) }
  0x11   : > { %211 = vst [vmem:[%s187_s5] sm:$0x3] %v210_v0  ;;  %v216_v3 = vld [vmem:[%s193_s30 + $0x12] sm:$0x3]  ;;  %v218_v4 = vld [vmem:[%s193_s30 + $0x18] sm:$0x3] }
  0x12   : > { %213 = vst [vmem:[%s187_s5 + $0x2] sm:$0x3] %v212_v1  ;;  %v220_v5 = vld [vmem:[%s193_s30 + $0x1e] sm:$0x3]  ;;  %v222_v6 = vld [vmem:[%s193_s30 + $0x24] sm:$0x3] }
  0x13   : > { %215 = vst [vmem:[%s187_s5 + $0x4] sm:$0x3] %v214_v2  ;;  %v224_v7 = vld [vmem:[%s193_s30 + $0x2a] sm:$0x3] }
  0x14   : > { %217 = vst [vmem:[%s187_s5 + $0x6] sm:$0x3] %v216_v3 }
  0x15   : > { %219 = vst [vmem:[%s187_s5 + $0x8] sm:$0x3] %v218_v4 }
  0x16   : > { %221 = vst [vmem:[%s187_s5 + $0xa] sm:$0x3] %v220_v5 }
  0x17   : > { %223 = vst [vmem:[%s187_s5 + $0xc] sm:$0x3] %v222_v6 }
  0x18   : > { %225 = vst [vmem:[%s187_s5 + $0xe] sm:$0x3] %v224_v7 }
  0x19 PF: > { %265 = sbr.rel (!%p1429_p3) target bundleno = 38 (0x26), region = 65  ;;  %s267_s6 = sand.u32 (%p1429_p3), 1, %s1356_s16  }
  0x1a   : > { %s1234_s7 = smul.u32 (%p1429_p3), 48, %s1364_s18  ;;  %s1233_s8 = sshll.u32 (%p1429_p3), %s267_s6, 4 }
  0x1b   : > { %s269_s12 = scalar_lea.vmem (%p1429_p3), [#allocation3], %s1233_s8 }
  0x1c   : > { %s1130_s11 = scalar_lea.vmem (%p1429_p3), %s1638_s2, %s1234_s7 }
  0x1d   : > { %v1235_v8 = vld [vmem:[%s1130_s11 + $0x2] sm:$0x3] (%p1429_p3)  ;;  %v1236_v9 = vld [vmem:[%s1130_s11 + $0x8] sm:$0x3] (%p1429_p3)  ;;  %v1237_v10 = vld [vmem:[%s1130_s11 + $0xe] sm:$0x3] (%p1429_p3) }
  0x1e   : > { %291 = vst [vmem:[%s269_s12] sm:$0x3] %v1235_v8  ;;  %v1238_v11 = vld [vmem:[%s1130_s11 + $0x14] sm:$0x3]  ;;  %v1239_v12 = vld [vmem:[%s1130_s11 + $0x1a] sm:$0x3] }
  0x1f   : > { %293 = vst [vmem:[%s269_s12 + $0x2] sm:$0x3] %v1236_v9  ;;  %v1240_v13 = vld [vmem:[%s1130_s11 + $0x20] sm:$0x3]  ;;  %v1241_v14 = vld [vmem:[%s1130_s11 + $0x26] sm:$0x3] }
  0x20   : > { %295 = vst [vmem:[%s269_s12 + $0x4] sm:$0x3] %v1237_v10  ;;  %v1242_v15 = vld [vmem:[%s1130_s11 + $0x2c] sm:$0x3] }
  0x21   : > { %297 = vst [vmem:[%s269_s12 + $0x6] sm:$0x3] %v1238_v11 }
  0x22   : > { %299 = vst [vmem:[%s269_s12 + $0x8] sm:$0x3] %v1239_v12 }
  0x23   : > { %301 = vst [vmem:[%s269_s12 + $0xa] sm:$0x3] %v1240_v13 }
  0x24   : > { %303 = vst [vmem:[%s269_s12 + $0xc] sm:$0x3] %v1241_v14 }
  0x25   : > { %305 = vst [vmem:[%s269_s12 + $0xe] sm:$0x3] %v1242_v15 }
  0x26 PF: > { %345 = sbr.rel (!%p1429_p3) target bundleno = 51 (0x33), region = 106  ;;  %s347_s13 = sand.u32 (%p1429_p3), 1, %s1356_s16  }
  0x27   : > { %s1244_s14 = smul.u32 (%p1429_p3), 48, %s1364_s18  ;;  %s1243_s22 = sshll.u32 (%p1429_p3), %s347_s13, 4 }
  0x28   : > { %s349_s27 = scalar_lea.vmem (%p1429_p3), [#allocation4], %s1243_s22 }
  0x29   : > { %s1136_s26 = scalar_lea.vmem (%p1429_p3), %s1639_s3, %s1244_s14 }
  0x2a   : > { %v1245_v16 = vld [vmem:[%s1136_s26 + $0x4] sm:$0x3] (%p1429_p3)  ;;  %v1246_v17 = vld [vmem:[%s1136_s26 + $0xa] sm:$0x3] (%p1429_p3)  ;;  %v1247_v18 = vld [vmem:[%s1136_s26 + $0x10] sm:$0x3] (%p1429_p3) }
  0x2b   : > { %371 = vst [vmem:[%s349_s27] sm:$0x3] %v1245_v16  ;;  %v1248_v19 = vld [vmem:[%s1136_s26 + $0x16] sm:$0x3]  ;;  %v1249_v20 = vld [vmem:[%s1136_s26 + $0x1c] sm:$0x3] }
  0x2c   : > { %373 = vst [vmem:[%s349_s27 + $0x2] sm:$0x3] %v1246_v17  ;;  %v1250_v21 = vld [vmem:[%s1136_s26 + $0x22] sm:$0x3]  ;;  %v1251_v22 = vld [vmem:[%s1136_s26 + $0x28] sm:$0x3] }
  0x2d   : > { %375 = vst [vmem:[%s349_s27 + $0x4] sm:$0x3] %v1247_v18  ;;  %v1252_v23 = vld [vmem:[%s1136_s26 + $0x2e] sm:$0x3] }
  0x2e   : > { %377 = vst [vmem:[%s349_s27 + $0x6] sm:$0x3] %v1248_v19 }
  0x2f   : > { %379 = vst [vmem:[%s349_s27 + $0x8] sm:$0x3] %v1249_v20 }
  0x30   : > { %381 = vst [vmem:[%s349_s27 + $0xa] sm:$0x3] %v1250_v21 }
  0x31   : > { %383 = vst [vmem:[%s349_s27 + $0xc] sm:$0x3] %v1251_v22 }
  0x32   : > { %385 = vst [vmem:[%s349_s27 + $0xe] sm:$0x3] %v1252_v23 }
  0x33 PF: > { %p1253_p6 = scmp.ge.s32.totalorder %s1368_s19, 1  ;;  %p424_p7 = scmp.lt.s32.totalorder %s1368_s19, 3 }
  0x35   : > { %p425_p8 = pnand %p1253_p6, %p424_p7 }
  0x36   : > { %s431_s21 = sand.u32 (!%p425_p8), 1, %s1352_s15   ;;  %p485_p9 = scmp.lt.s32.totalorder (!%p425_p8), %s1360_s17, 1 }
  0x37   : > { %428 = sbr.rel (%p425_p8) target bundleno = 670 (0x29e), region = 147  ;;  %s1464_s28 = sshll.u32 (!%p425_p8), %s431_s21, 4 }
  0x38   : > { %s433_s29 = scalar_lea.vmem (!%p425_p8), [#allocation2], %s1464_s28  ;;  %s440_s15 = scalar_lea.vmem (!%p425_p8), [#allocation3], %s1464_s28 }
  0x39   : > { %s447_s30 = scalar_lea.vmem (!%p425_p8), [#allocation4], %s1464_s28 }
  0x3c   : > { %v1370_v24 = vmov 1934713408   ;;  %vm509_vm0 = vcmask 1047556   ;;  %v500_v26 = vld [vmem:[%s433_s29] sm:$0x3]  ;;  %vm764_vm1 = vcmask 64512  }
  0x3d   : > { %v512_v25 = vunpack.c.l.s4 %v1370_v24  ;;  %v501_v27 = vld [vmem:[%s433_s29 + $0x2] sm:$0x3]  ;;  %v502_v28 = vld [vmem:[%s433_s29 + $0x4] sm:$0x3]  ;;  %v503_v29 = vld [vmem:[%s433_s29 + $0x6] sm:$0x3] }
  0x3e   : > { %v504_v30 = vld [vmem:[%s433_s29 + $0x8] sm:$0x3]  ;;  %v505_v31 = vld [vmem:[%s433_s29 + $0xa] sm:$0x3]  ;;  %v506_v33 = vld [vmem:[%s433_s29 + $0xc] sm:$0x3] }
  0x3f   : > { %v1467_v32 = vunpack.c.0.s8 %v512_v25  ;;  %v507_v34 = vld [vmem:[%s433_s29 + $0xe] sm:$0x3]  ;;  %v508_v35 = vrot.slane %v502_v28, 4  ;;  %v517_v36 = vrot.slane %v503_v29, 4  ;;  %v525_v37 = vrot.slane %v506_v33, 4  ;;  %s1649_s17 = smov (!%p485_p9, %s1360_s17), 1 }
  0x40   : > { %v533_v38 = vrot.slane %v507_v34, 4  ;;  %v626_v47 = vld [vmem:[%s440_s15 + $0x4] sm:$0x3]  ;;  %v627_v48 = vld [vmem:[%s440_s15 + $0x6] sm:$0x3]  ;;  %s487_s7 = scalar_lea.vmem %s1636_s0, %s1649_s17  ;;  %vm926_vm4 = vcmask 1043456  }
  0x41   : > { %v510_v39 = vsel %vm509_vm0, %v508_v35, %v500_v26  ;;  %v518_v40 = vsel %vm509_vm0, %v517_v36, %v501_v27  ;;  %v526_v43 = vsel %vm509_vm0, %v525_v37, %v504_v30  ;;  %v630_v52 = vld [vmem:[%s440_s15 + $0xc] sm:$0x3]  ;;  %v631_v56 = vld [vmem:[%s440_s15 + $0xe] sm:$0x3]  ;;  %v632_v59 = vrot.slane %v626_v47, 4  ;;  %s1269_s8 = sshll.u32 %s1649_s17, 4 }
  0x42   : > { %v514_v41 = vperm.slane %v510_v39, %v1467_v32  ;;  %v522_v42 = vperm.slane %v518_v40, %v1467_v32  ;;  %v534_v44 = vsel %vm509_vm0, %v533_v38, %v505_v31  ;;  %v530_v45 = vperm.slane %v526_v43, %v1467_v32  ;;  %v624_v63 = vld [vmem:[%s440_s15] sm:$0x3]  ;;  %v625_v0 = vld [vmem:[%s440_s15 + $0x2] sm:$0x3]  ;;  %v628_v4 = vld [vmem:[%s440_s15 + $0x8] sm:$0x3]  ;;  %s1593_s11 = scalar_lea.vmem %s1640_s4, %s1269_s8 }
  0x43   : > { %v538_v46 = vperm.slane %v534_v44, %v1467_v32  ;;  %v640_v60 = vrot.slane %v627_v48, 4  ;;  %v648_v1 = vrot.slane %v630_v52, 4  ;;  %v629_v5 = vld [vmem:[%s440_s15 + $0xa] sm:$0x3]  ;;  %v656_v6 = vrot.slane %v631_v56, 4 }
  0x44   : > { %v543_v49 = vpack.i.b16 %v522_v42, %v514_v41  ;;  %v545_v50 = vshrl.u32 %v514_v41, 16  ;;  %v546_v51 = vshrl.u32 %v522_v42, 16  ;;  %v561_v54 = vshrl.u32 %v530_v45, 16 }
  0x45   : > { %v559_v53 = vpack.i.b16 %v538_v46, %v530_v45  ;;  %v562_v55 = vshrl.u32 %v538_v46, 16  ;;  %v633_v10 = vsel %vm509_vm0, %v632_v59, %v624_v63  ;;  %v641_v11 = vsel %vm509_vm0, %v640_v60, %v625_v0 }
  0x46   : > { %v547_v57 = vpack.i.b16 %v546_v51, %v545_v50  ;;  %v573_v58 = vunpack.c.l.bf16 %v543_v49  ;;  %v649_v13 = vsel %vm509_vm0, %v648_v1, %v628_v4  ;;  %v657_v14 = vsel %vm509_vm0, %v656_v6, %v629_v5  ;;  %v690_v5 = vld [vmem:[%s447_s30 + $0x4] sm:$0x3] }
  0x47   : > { %v563_v61 = vpack.i.b16 %v562_v55, %v561_v54  ;;  %v574_v62 = vunpack.c.l.bf16 %v559_v53  ;;  %v515_v15 = vrot.slane %v514_v41, 4  ;;  %v637_v16 = vperm.slane %v633_v10, %v1467_v32  ;;  %v695_v10 = vld [vmem:[%s447_s30 + $0xe] sm:$0x3] }
  0x48   : > { %v575_v2 = vunpack.c.l.bf16 %v547_v57  ;;  %v581_v3 = vmul.f32 0.35351563, %v573_v58  ;;  %v645_v17 = vperm.slane %v641_v11, %v1467_v32  ;;  %v653_v18 = vperm.slane %v649_v13, %v1467_v32 }
  0x49   : > { %v576_v7 = vunpack.c.l.bf16 %v563_v61  ;;  %v582_v8 = vmul.f32 0.35351563, %v574_v62  ;;  %v661_v19 = vperm.slane %v657_v14, %v1467_v32  ;;  %v516_v20 = vsel %vm509_vm0, 0, %v515_v15 }
  0x4a   : > { %v583_v9 = vmul.f32 0.35351563, %v575_v2  ;;  %597 = vst [vmem:[#allocation1] ss:$2 sm:$0xff] %v581_v3  ;;  %v523_v21 = vrot.slane %v522_v42, 4  ;;  %v531_v22 = vrot.slane %v530_v45, 4  ;;  %v539_v24 = vrot.slane %v538_v46, 4 }
  0x4b   : > { %v584_v12 = vmul.f32 0.35351563, %v576_v7  ;;  %599 = vst [vmem:[#allocation1 + $0x1] ss:$2 sm:$0xff] %v582_v8  ;;  %v666_v25 = vpack.i.b16 %v645_v17, %v637_v16  ;;  %v678_v29 = vpack.i.b16 %v661_v19, %v653_v18  ;;  %v553_v31 = vshrl.u32 %v516_v20, 16  ;;  %v691_v8 = vld [vmem:[%s447_s30 + $0x6] sm:$0x3] }
  0x4c   : > { %602 = vst [vmem:[#allocation1 + $0x10] ss:$2 sm:$0xff] %v583_v9  ;;  %v524_v23 = vsel %vm509_vm0, 0, %v523_v21  ;;  %v532_v26 = vsel %vm509_vm0, 0, %v531_v22  ;;  %v540_v30 = vsel %vm509_vm0, 0, %v539_v24  ;;  %v667_v41 = vshrl.u32 %v637_v16, 16 }
  0x4d   : > { %604 = vst [vmem:[#allocation1 + $0x11] ss:$2 sm:$0xff] %v584_v12  ;;  %v551_v27 = vpack.i.b16 %v524_v23, %v516_v20  ;;  %v567_v33 = vpack.i.b16 %v540_v30, %v532_v26  ;;  %v554_v36 = vshrl.u32 %v524_v23, 16  ;;  %v569_v37 = vshrl.u32 %v532_v26, 16  ;;  %v694_v9 = vld [vmem:[%s447_s30 + $0xc] sm:$0x3] }
  0x4e   : > { %v570_v38 = vshrl.u32 %v540_v30, 16  ;;  %v668_v42 = vshrl.u32 %v645_v17, 16  ;;  %v679_v45 = vshrl.u32 %v653_v18, 16  ;;  %v680_v46 = vshrl.u32 %v661_v19, 16  ;;  %v692_v21 = vld [vmem:[%s447_s30 + $0x8] sm:$0x3] }
  0x4f   : > { %v577_v34 = vunpack.c.l.bf16 %v551_v27  ;;  %v578_v39 = vunpack.c.l.bf16 %v567_v33  ;;  %v555_v43 = vpack.i.b16 %v554_v36, %v553_v31  ;;  %v638_v52 = vrot.slane %v637_v16, 4  ;;  %v688_v16 = vld [vmem:[%s447_s30] sm:$0x3]  ;;  %v693_v22 = vld [vmem:[%s447_s30 + $0xa] sm:$0x3] }
  0x50   : > { %v571_v44 = vpack.i.b16 %v570_v38, %v569_v37  ;;  %v669_v49 = vpack.i.b16 %v668_v42, %v667_v41  ;;  %v681_v51 = vpack.i.b16 %v680_v46, %v679_v45  ;;  %v646_v53 = vrot.slane %v645_v17, 4  ;;  %v689_v17 = vld [vmem:[%s447_s30 + $0x2] sm:$0x3] }
  0x51   : > { %v585_v40 = vmul.f32 0.35351563, %v577_v34  ;;  %v586_v47 = vmul.f32 0.35351563, %v578_v39  ;;  %v579_v48 = vunpack.c.l.bf16 %v555_v43  ;;  %v654_v55 = vrot.slane %v653_v18, 4  ;;  %v752_v43 = vld [vmem:[%s487_s7] sm:$0x1] }
  0x52   : > { %v600_v28 = vld.sshfl [vmem:[#allocation1] sm:$0xff pattern:$0x75316420]  ;;  %v580_v50 = vunpack.c.l.bf16 %v571_v44  ;;  %v662_v56 = vrot.slane %v661_v19, 4  ;;  %v639_v60 = vsel %vm509_vm0, 0, %v638_v52  ;;  %v647_v61 = vsel %vm509_vm0, 0, %v646_v53 }
  0x53   : > { %607 = vst [vmem:[#allocation1 + $0x20] ss:$2 sm:$0xff] %v585_v40  ;;  %v587_v57 = vmul.f32 0.35351563, %v579_v48  ;;  %v655_v62 = vsel %vm509_vm0, 0, %v654_v55  ;;  %v620_v0 = vpack.c.bf16 %v600_v28, %v600_v28  ;;  %v672_v1 = vpack.i.b16 %v647_v61, %v639_v60 }
  0x54   : > { %v1490_v35 = vld.sshfl [vmem:[#allocation1 + $0x10] sm:$0xff pattern:$0x75316420]  ;;  %609 = vst [vmem:[#allocation1 + $0x21] ss:$2 sm:$0xff] %v586_v47  ;;  %v588_v59 = vmul.f32 0.35351563, %v580_v50  ;;  %v856_v44 = vlaneseq }
  0x55   : > { %759 = vst [vmem:[#allocation1] ss:$4 sm:$0xff] %v666_v25  ;;  %v663_v63 = vsel %vm509_vm0, 0, %v662_v56  ;;  %v673_v4 = vshrl.u32 %v639_v60, 16  ;;  %v674_v7 = vshrl.u32 %v647_v61, 16  ;;  %v685_v11 = vshrl.u32 %v655_v62, 16 }
  0x56   : > { %762 = vst [vmem:[#allocation1 + $0x1] ss:$4 sm:$0xff] %v678_v29  ;;  %v684_v2 = vpack.i.b16 %v663_v63, %v655_v62  ;;  %v686_v12 = vshrl.u32 %v663_v63, 16  ;;  %v696_v13 = vrot.slane %v690_v5, 4  ;;  %v704_v14 = vrot.slane %v691_v8, 4 }
  0x57   : > { %612 = vst [vmem:[#allocation1 + $0x30] ss:$2 sm:$0xff] %v587_v57  ;;  %v621_v15 = vpack.c.bf16 %v1490_v35, %v1490_v35  ;;  %v712_v18 = vrot.slane %v694_v9, 4  ;;  %v720_v19 = vrot.slane %v695_v10, 4  ;;  %v675_v20 = vpack.i.b16 %v674_v7, %v673_v4 }
  0x58   : > { %614 = vst [vmem:[#allocation1 + $0x31] ss:$2 sm:$0xff] %v588_v59  ;;  %v687_v23 = vpack.i.b16 %v686_v12, %v685_v11  ;;  %v697_v24 = vsel %vm509_vm0, %v696_v13, %v688_v16  ;;  %v705_v25 = vsel %vm509_vm0, %v704_v14, %v689_v17  ;;  %vm753_vm2 = vcmp.gt.f32.partialorder %v752_v43, 0.0 }
  0x59   : > { %v713_v27 = vsel %vm509_vm0, %v712_v18, %v692_v21  ;;  %v721_v28 = vsel %vm509_vm0, %v720_v19, %v693_v22  ;;  %v1509_v31 = vperm.slane %v697_v24, %v1467_v32  ;;  %v1512_v33 = vperm.slane %v705_v25, %v1467_v32 }
  0x5a   : > { %v1515_v34 = vperm.slane %v713_v27, %v1467_v32  ;;  %v1518_v35 = vperm.slane %v721_v28, %v1467_v32  ;;  %v1371_v45 = vmov -1e+09   ;;  %v857_v47 = vshrl.u32 %v856_v44, 7 }
  0x5b   : > { %v610_v30 = vld.sshfl [vmem:[#allocation1 + $0x20] sm:$0xff pattern:$0x75316420]  ;;  %v730_v37 = vpack.i.b16 %v1512_v33, %v1509_v31  ;;  %v754_v46 = vsel %vm753_vm2, 0.0, %v1371_v45  ;;  %v861_v48 = vand.u32 127, %v856_v44  ;;  %v732_v27 = vshrl.u32 %v1512_v33, 16 }
  0x5c   : > { %v622_v36 = vpack.c.bf16 %v610_v30, %v610_v30  ;;  %v742_v38 = vpack.i.b16 %v1518_v35, %v1515_v34  ;;  %v743_v28 = vshrl.u32 %v1515_v34, 16  ;;  %vm1079_vm5 = vcmask 58368  }
  0x5d   : > { %v763_v54 = vld.sshfl [vmem:[#allocation1] sm:$0xff pattern:$0x73625140]  ;;  %vm862_vm3 = vcmp.le.s32.totalorder %v861_v48, %v857_v47 }
  0x5e   : > { %v768_v58 = vsel %vm764_vm1, %v763_v54, 0  ;;  %784 = vst [vmem:[#allocation1] ss:$4 sm:$0xff] %v669_v49  ;;  %v756_v49 = vperm.slane %v754_v46, 0 }
  0x5f   : > { %777 = vmatpush.bf16.xpose.msra.mxu0 %v768_v58  ;;  %787 = vst [vmem:[#allocation1 + $0x1] ss:$4 sm:$0xff] %v681_v51  ;;  %v615_v41 = vld.sshfl [vmem:[#allocation1 + $0x30] sm:$0xff pattern:$0x75316420] }
  0x60   : > { %v623_v42 = vpack.c.bf16 %v615_v41, %v615_v41  ;;  %v718_v41 = vrot.slane %v1515_v34, 4 }
  0x62   : > { %v719_v45 = vsel %vm509_vm0, 0, %v718_v41 }
  0x63   : > { %v749_v34 = vshrl.u32 %v719_v45, 16 }
  0x66   : > { %1259 = vmatmul.msk.bf16.vlgmr.msra.gmra.mxu0 %vm764_vm1, %v620_v0  ;;  %v788_v3 = vld.sshfl [vmem:[#allocation1] sm:$0xff pattern:$0x73625140] }
  0x67   : > { %v792_v6 = vsel %vm764_vm1, %v788_v3, 0  ;;  %808 = vst [vmem:[#allocation1] ss:$4 sm:$0xff] %v672_v1 }
  0x68   : > { %801 = vmatpush.bf16.xpose.msra.mxu1 %v792_v6  ;;  %811 = vst [vmem:[#allocation1 + $0x1] ss:$4 sm:$0xff] %v684_v2 }
  0x6f   : > { %1260 = vmatmul.msk.bf16.vlgmr.msra.gmra.mxu1 %vm764_vm1, %v621_v15  ;;  %v812_v26 = vld.sshfl [vmem:[#allocation1] sm:$0xff pattern:$0x73625140] }
  0x70   : > { %v816_v29 = vsel %vm764_vm1, %v812_v26, 0  ;;  %832 = vst [vmem:[#allocation1] ss:$4 sm:$0xff] %v675_v20  ;;  %v731_v26 = vshrl.u32 %v1509_v31, 16 }
  0x71   : > { %825 = vmatpush.bf16.xpose.msra.mxu2 %v816_v29  ;;  %835 = vst [vmem:[#allocation1 + $0x1] ss:$4 sm:$0xff] %v687_v23  ;;  %v744_v29 = vshrl.u32 %v1518_v35, 16 }
  0x72   : > { %v733_v30 = vpack.i.b16 %v732_v27, %v731_v26 }
  0x78   : > { %1261 = vmatmul.msk.bf16.vlgmr.msra.gmra.mxu2 %vm764_vm1, %v622_v36  ;;  %v836_v39 = vld.sshfl [vmem:[#allocation1] sm:$0xff pattern:$0x73625140]  ;;  %v745_v36 = vpack.i.b16 %v744_v29, %v743_v28 }
  0x79   : > { %v840_v40 = vsel %vm764_vm1, %v836_v39, 0  ;;  %918 = vst [vmem:[#allocation1] ss:$4 sm:$0xff] %v730_v37  ;;  %v702_v39 = vrot.slane %v1509_v31, 4 }
  0x7a   : > { %849 = vmatpush.bf16.xpose.msra.mxu3 %v840_v40  ;;  %921 = vst [vmem:[#allocation1 + $0x1] ss:$4 sm:$0xff] %v742_v38  ;;  %v710_v40 = vrot.slane %v1512_v33, 4 }
  0x7b   : > { %v703_v43 = vsel %vm509_vm0, 0, %v702_v39 }
  0x7c   : > { %v711_v44 = vsel %vm509_vm0, 0, %v710_v40  ;;  %v737_v31 = vshrl.u32 %v703_v43, 16 }
  0x7d   : > { %v736_v47 = vpack.i.b16 %v711_v44, %v703_v43  ;;  %v738_v33 = vshrl.u32 %v711_v44, 16 }
  0x81   : > { %1262 = vmatmul.msk.bf16.vlgmr.msra.gmra.mxu3 %vm764_vm1, %v623_v42  ;;  %v922_v37 = vld.sshfl [vmem:[#allocation1] sm:$0xff pattern:$0x73625140]  ;;  %v726_v42 = vrot.slane %v1518_v35, 4 }
  0x82   : > { %v927_v38 = vsel %vm926_vm4, %v922_v37, 0  ;;  %943 = vst [vmem:[#allocation1] ss:$4 sm:$0xff] %v733_v30 }
  0x83   : > { %936 = vmatpush.bf16.msrb.mxu0 %v927_v38  ;;  %946 = vst [vmem:[#allocation1 + $0x1] ss:$4 sm:$0xff] %v745_v36  ;;  %v727_v46 = vsel %vm509_vm0, 0, %v726_v42 }
  0x84   : > { %v748_v48 = vpack.i.b16 %v727_v46, %v719_v45  ;;  %v750_v35 = vshrl.u32 %v727_v46, 16 }
  0xe3   : > { %v779_v50 = vpop.f32.mrf.mxu0 }
  0xe4   : > { %v780_v51 = vadd.f32 %v779_v50, %v756_v49 }
  0xe6   : > { %v865_v52 = vsel %vm862_vm3, %v780_v51, -1e+09  ;;  %v739_v51 = vpack.i.b16 %v738_v33, %v737_v31 }
  0xe7   : > { %v869_v53 = vsel %vm764_vm1, %v865_v52, -inf }
  0xe8   : > { %870 = vmax.xlane.f32.xlu1 %v869_v53 }
  0xeb   : > { %v781_v54 = vpop.f32.mrf.mxu0 }
  0xec   : > { %v803_v55 = vpop.f32.mrf.mxu1 }
  0xed   : > { %v804_v56 = vadd.f32 %v803_v55, %v756_v49 }
  0xef   : > { %v866_v57 = vsel %vm862_vm3, %v804_v56, -1e+09 }
  0xf0   : > { %v872_v58 = vsel %vm764_vm1, %v866_v57, -inf }
  0xf1   : > { %873 = vmax.xlane.f32.xlu1 %v872_v58 }
  0xf4   : > { %v805_v59 = vpop.f32.mrf.mxu1 }
  0xfb   : > { %v827_v60 = vpop.f32.mrf.mxu2 }
  0xfc   : > { %v828_v61 = vadd.f32 %v827_v60, %v756_v49 }
  0xfe   : > { %v867_v62 = vsel %vm862_vm3, %v828_v61, -1e+09 }
  0xff   : > { %v875_v63 = vsel %vm764_vm1, %v867_v62, -inf }
 0x100   : > { %876 = vmax.xlane.f32.xlu0 %v875_v63 }
 0x103   : > { %v829_v0 = vpop.f32.mrf.mxu2 }
 0x104   : > { %v851_v1 = vpop.f32.mrf.mxu3 }
 0x105   : > { %v852_v2 = vadd.f32 %v851_v1, %v756_v49  ;;  %v947_v49 = vld.sshfl [vmem:[#allocation1] sm:$0xff pattern:$0x73625140] }
 0x106   : > { %v951_v50 = vsel %vm926_vm4, %v947_v49, 0  ;;  %967 = vst [vmem:[#allocation1] ss:$4 sm:$0xff] %v736_v47 }
 0x107   : > { %v868_v3 = vsel %vm862_vm3, %v852_v2, -1e+09  ;;  %960 = vmatpush.bf16.msrb.mxu1 %v951_v50  ;;  %970 = vst [vmem:[#allocation1 + $0x1] ss:$4 sm:$0xff] %v748_v48 }
 0x108   : > { %v878_v4 = vsel %vm764_vm1, %v868_v3, -inf }
 0x109   : > { %879 = vmax.xlane.f32.xlu0 %v878_v4 }
 0x10c   : > { %v853_v5 = vpop.f32.mrf.mxu3 }
 0x10e   : > { %v971_v54 = vld.sshfl [vmem:[#allocation1] sm:$0xff pattern:$0x73625140] }
 0x10f   : > { %v975_v55 = vsel %vm926_vm4, %v971_v54, 0  ;;  %991 = vst [vmem:[#allocation1] ss:$4 sm:$0xff] %v739_v51 }
 0x110   : > { %984 = vmatpush.bf16.msrb.mxu2 %v975_v55 }
 0x15b   : > { %v871_v6 = vpop.xlane.xlu1 %870 }
 0x15c   : > { %v881_v7 = vsub.f32 %v865_v52, %v871_v6  ;;  %v751_v52 = vpack.i.b16 %v750_v35, %v749_v34 }
 0x15e   : > { %v885_v8 = vmul.f32 1.442695, %v881_v7  ;;  %994 = vst [vmem:[#allocation1 + $0x1] ss:$4 sm:$0xff] %v751_v52 }
 0x160   : > { %1314 = vpow2.f32 %v885_v8 }
 0x164   : > { %v874_v9 = vpop.xlane.xlu1 %873 }
 0x165   : > { %v882_v10 = vsub.f32 %v866_v57, %v874_v9  ;;  %v995_v59 = vld.sshfl [vmem:[#allocation1] sm:$0xff pattern:$0x73625140] }
 0x166   : > { %v1543_v11 = vpop.eup %1314  ;;  %v999_v61 = vsel %vm926_vm4, %v995_v59, 0 }
 0x167   : > { %v887_v12 = vmul.f32 1.442695, %v882_v10  ;;  %v893_v13 = vsel %vm764_vm1, %v1543_v11, 0.0  ;;  %1008 = vmatpush.bf16.msrb.mxu3 %v999_v61 }
 0x168   : > { %894 = vadd.xlane.f32.xlu0 %v893_v13  ;;  %v1372_v13 = vmov 1983009808  }
 0x169   : > { %1316 = vpow2.f32 %v887_v12 }
 0x16f   : > { %v1547_v14 = vpop.eup %1316 }
 0x170   : > { %v896_v15 = vsel %vm764_vm1, %v1547_v14, 0.0 }
 0x171   : > { %897 = vadd.xlane.f32.xlu1 %v896_v15 }
 0x173   : > { %v877_v16 = vpop.xlane.xlu0 %876 }
 0x174   : > { %v883_v17 = vsub.f32 %v867_v62, %v877_v16 }
 0x176   : > { %v889_v18 = vmul.f32 1.442695, %v883_v17 }
 0x178   : > { %1318 = vpow2.f32 %v889_v18 }
 0x17c   : > { %v880_v19 = vpop.xlane.xlu0 %879 }
 0x17d   : > { %v884_v20 = vsub.f32 %v868_v3, %v880_v19 }
 0x17e   : > { %v1551_v21 = vpop.eup %1318 }
 0x17f   : > { %v891_v22 = vmul.f32 1.442695, %v884_v20  ;;  %v899_v23 = vsel %vm764_vm1, %v1551_v21, 0.0 }
 0x180   : > { %900 = vadd.xlane.f32.xlu2 %v899_v23 }
 0x181   : > { %1320 = vpow2.f32 %v891_v22 }
 0x187   : > { %v1555_v24 = vpop.eup %1320 }
 0x188   : > { %v902_v25 = vsel %vm764_vm1, %v1555_v24, 0.0 }
 0x189   : > { %903 = vadd.xlane.f32.xlu2 %v902_v25 }
 0x1db   : > { %v895_v53 = vpop.xlane.xlu0 %894 }
 0x1dc   : > { %1322 = vrcp.f32 %v895_v53 }
 0x1e2   : > { %v1323_v56 = vpop.eup %1322 }
 0x1e3   : > { %v909_v57 = vmul.f32 %v1323_v56, %v1543_v11 }
 0x1e4   : > { %v898_v58 = vpop.xlane.xlu1 %897 }
 0x1e5   : > { %v913_v60 = vpack.c.bf16 %v909_v57, %v909_v57  ;;  %1324 = vrcp.f32 %v898_v58 }
 0x1e7   : > { %1263 = vmatmul.msk.bf16.vlgmr.msrb.gmra.mxu0 %vm764_vm1, %v913_v60 }
 0x1eb   : > { %v1325_v62 = vpop.eup %1324 }
 0x1ec   : > { %v910_v63 = vmul.f32 %v1325_v62, %v1547_v14  ;;  %v1020_v14 = vunpack.c.l.s4 %v1372_v13 }
 0x1ee   : > { %v914_v0 = vpack.c.bf16 %v910_v63, %v910_v63  ;;  %v1021_v18 = vunpack.c.0.s8 %v1020_v14 }
 0x1f0   : > { %1264 = vmatmul.msk.bf16.vlgmr.msrb.gmra.mxu1 %vm764_vm1, %v914_v0 }
 0x1f3   : > { %v901_v1 = vpop.xlane.xlu2 %900 }
 0x1f4   : > { %1326 = vrcp.f32 %v901_v1 }
 0x1fa   : > { %v1327_v2 = vpop.eup %1326 }
 0x1fb   : > { %v911_v3 = vmul.f32 %v1327_v2, %v1551_v21 }
 0x1fc   : > { %v904_v4 = vpop.xlane.xlu2 %903 }
 0x1fd   : > { %1328 = vrcp.f32 %v904_v4  ;;  %v915_v5 = vpack.c.bf16 %v911_v3, %v911_v3 }
 0x1ff   : > { %1265 = vmatmul.msk.bf16.vlgmr.msrb.gmra.mxu2 %vm764_vm1, %v915_v5 }
 0x203   : > { %v1329_v6 = vpop.eup %1328 }
 0x204   : > { %v912_v7 = vmul.f32 %v1329_v6, %v1555_v24 }
 0x206   : > { %v916_v8 = vpack.c.bf16 %v912_v7, %v912_v7 }
 0x208   : > { %1266 = vmatmul.msk.bf16.vlgmr.msrb.gmra.mxu3 %vm764_vm1, %v916_v8 }
 0x264   : > { %v938_v9 = vpop.f32.mrf.mxu0 }
 0x265   : > { %v1017_v16 = vrot.slane %v938_v9, 4 }
 0x26c   : > { %v940_v10 = vpop.f32.mrf.mxu0 }
 0x26d   : > { %v962_v11 = vpop.f32.mrf.mxu1 }
 0x26e   : > { %v1029_v22 = vrot.slane %v962_v11, 4 }
 0x275   : > { %v964_v12 = vpop.f32.mrf.mxu1 }
 0x282   : > { %v986_v15 = vpop.f32.mrf.mxu2 }
 0x283   : > { %v1014_v17 = vrot.slane %v986_v15, 4  ;;  %v1018_v19 = vsel %vm509_vm0, %v986_v15, %v1017_v16 }
 0x284   : > { %v1026_v21 = vperm.slane %v1018_v19, %v1021_v18 }
 0x285   : > { %v1016_v20 = vsel %vm509_vm0, %v1014_v17, %v938_v9 }
 0x286   : > { %v1022_v24 = vperm.slane %v1016_v20, %v1021_v18  ;;  %v1053_v28 = vrot.slane %v1026_v21, 4 }
 0x288   : > { %v1041_v36 = vrot.slane %v1022_v24, 4 }
 0x28a   : > { %v988_v23 = vpop.f32.mrf.mxu2 }
 0x28b   : > { %v1010_v25 = vpop.f32.mrf.mxu3 }
 0x28c   : > { %v1027_v26 = vrot.slane %v1010_v25, 4  ;;  %v1030_v27 = vsel %vm509_vm0, %v1010_v25, %v1029_v22 }
 0x28d   : > { %v1038_v29 = vperm.slane %v1030_v27, %v1021_v18 }
 0x28e   : > { %v1028_v30 = vsel %vm509_vm0, %v1027_v26, %v962_v11 }
 0x28f   : > { %v1034_v37 = vperm.slane %v1028_v30, %v1021_v18  ;;  %v1051_v38 = vrot.slane %v1038_v29, 4  ;;  %v1054_v39 = vsel %vm509_vm0, %v1038_v29, %v1053_v28 }
 0x290   : > { %v1062_v40 = vperm.slane %v1054_v39, %v1467_v32 }
 0x291   : > { %v1039_v41 = vrot.slane %v1034_v37, 4  ;;  %v1042_v42 = vsel %vm509_vm0, %v1034_v37, %v1041_v36  ;;  %v1052_v43 = vsel %vm509_vm0, %v1051_v38, %v1026_v21 }
 0x292   : > { %v1050_v44 = vperm.slane %v1042_v42, %v1467_v32  ;;  %v1058_v45 = vperm.slane %v1052_v43, %v1467_v32  ;;  %v1069_v46 = vrot.slane %v1062_v40, 4  ;;  %v1077_v47 = vpack.c.bf16 %v1062_v40, %v1062_v40 }
 0x293   : > { %v1040_v48 = vsel %vm509_vm0, %v1039_v41, %v1022_v24  ;;  %v1012_v49 = vpop.f32.mrf.mxu3 }
 0x294   : > { %v1046_v50 = vperm.slane %v1040_v48, %v1467_v32  ;;  %v1065_v31 = vrot.slane %v1050_v44, 4  ;;  %v1067_v33 = vrot.slane %v1058_v45, 4  ;;  %1086 = vst.msk [vmem:[%s1593_s11 + $0xc] sm:$0x3] %vm1079_vm5, %v1077_v47  ;;  %v1070_v34 = vsel %vm509_vm0, 0.0, %v1069_v46 }
 0x295   : > { %v1073_v35 = vpack.c.bf16 %v1050_v44, %v1050_v44  ;;  %v1075_v51 = vpack.c.bf16 %v1058_v45, %v1058_v45  ;;  %v1078_v59 = vpack.c.bf16 %v1070_v34, %v1070_v34 }
 0x296   : > { %v1063_v52 = vrot.slane %v1046_v50, 4  ;;  %v1066_v53 = vsel %vm509_vm0, 0.0, %v1065_v31  ;;  %v1068_v54 = vsel %vm509_vm0, 0.0, %v1067_v33  ;;  %v1071_v55 = vpack.c.bf16 %v1046_v50, %v1046_v50 }
 0x297   : > { %v1074_v32 = vpack.c.bf16 %v1066_v53, %v1066_v53  ;;  %1082 = vst.msk [vmem:[%s1593_s11 + $0x4] sm:$0x3] %vm1079_vm5, %v1073_v35  ;;  %v1076_v57 = vpack.c.bf16 %v1068_v54, %v1068_v54 }
 0x298   : > { %v1064_v56 = vsel %vm509_vm0, 0.0, %v1063_v52  ;;  %1080 = vst.msk [vmem:[%s1593_s11] sm:$0x3] %vm1079_vm5, %v1071_v55 }
 0x299   : > { %v1072_v58 = vpack.c.bf16 %v1064_v56, %v1064_v56  ;;  %1083 = vst.msk [vmem:[%s1593_s11 + $0x6] sm:$0x3] %vm1079_vm5, %v1074_v32 }
 0x29a   : > { %1084 = vst.msk [vmem:[%s1593_s11 + $0x8] sm:$0x3] %vm1079_vm5, %v1075_v51 }
 0x29b   : > { %1081 = vst.msk [vmem:[%s1593_s11 + $0x2] sm:$0x3] %vm1079_vm5, %v1072_v58 }
 0x29c   : > { %1085 = vst.msk [vmem:[%s1593_s11 + $0xa] sm:$0x3] %vm1079_vm5, %v1076_v57 }
 0x29d   : > { %1087 = vst.msk [vmem:[%s1593_s11 + $0xe] sm:$0x3] %vm1079_vm5, %v1078_v59 }
 0x29e PF: > { %s14_s19 = sadd.s32 1, %s1368_s19   ;;  %s1642_s15 = smov %s1356_s16 }
 0x29f   : > { %p11_p10 = scmp.ge.s32.totalorder %s14_s19, 4   ;;  %s1643_s16 = smov %s1437_s24 }
 0x2a0   : > { %s1644_s17 = smov %s1364_s18  ;;  %s1645_s18 = smov %s1647_s20 }
 0x2a1   :  { %13 = sbr.rel (!%p11_p10) target bundleno = 3 (0x3), region = 228 }

// kernel: _lambda_.59
= control target key start
LH: loop header
LB: loop body
LE: loop exit
PB: predicated region body
PF: predicated region fallthrough
CT: control target
= control target key end

     0   :  { %vm31_vm0 = vcmask 261120   ;;  %v113_v10 = vmov 32.0   ;;  %vm91_vm6 = vcmask 257024   ;;  %s161_s0 = inlined_call_operand.vmem [shape: bf16[16,32], index: 0, kind: input, shape index: {}]   ;;  %s162_s1 = inlined_call_operand.vmem [shape: bf16[16,32], index: 1, kind: input, shape index: {}]   ;;  %s163_s2 = inlined_call_operand.vmem [shape: bf16[1,32], index: 2, kind: input, shape index: {}]   ;;  %s164_s3 = inlined_call_operand.vmem [shape: bf16[1,32], index: 3, kind: input, shape index: {}]   ;;  %s165_s4 = inlined_call_operand.vmem [shape: bf16[16,32], index: 4, kind: output, shape index: {}]  }
   0x1   :  { %v99_v0 = vld [vmem:[%s161_s0] sm:$0xff]   ;;  %107 = vrcp.f32 %v113_v10 }
   0x2   :  { %v103_v1 = vld [vmem:[%s162_s1] sm:$0xff]   ;;  %v100_v2 = vunpack.c.l.bf16 %v99_v0  ;;  %v101_v5 = vunpack.c.h.bf16 %v99_v0 }
   0x3   :  { %v104_v3 = vunpack.c.l.bf16 %v103_v1  ;;  %v105_v6 = vunpack.c.h.bf16 %v103_v1  ;;  %v27_v35 = vld [vmem:[%s163_s2] sm:$0x1] }
   0x4   :  { %v29_v37 = vld [vmem:[%s164_s3] sm:$0x1]  ;;  %v28_v39 = vunpack.c.l.bf16 %v27_v35 }
   0x5   :  { %v25_v4 = vadd.f32 %v104_v3, %v100_v2  ;;  %v26_v8 = vadd.f32 %v105_v6, %v101_v5  ;;  %v30_v42 = vunpack.c.l.bf16 %v29_v37 }
   0x6   :  { %v83_v45 = vperm.slane %v28_v39, 0 }
   0x7   :  { %v32_v7 = vsel %vm31_vm0, %v25_v4, 0.0  ;;  %v35_v9 = vsel %vm31_vm0, %v26_v8, 0.0  ;;  %v108_v11 = vpop.eup %107  ;;  %v86_v48 = vperm.slane %v30_v42, 0 }
   0x8   :  { %33 = vadd.xlane.f32.xlu0 %v32_v7  ;;  %v39_v12 = vmul.f32 32.0, %v108_v11  ;;  %vm43_vm1 = vweird.f32 %v108_v11 }
   0xa   :  { %v40_v13 = vsub.f32 1.0, %v39_v12 }
   0xc   :  { %v41_v14 = vmul.f32 %v108_v11, %v40_v13 }
   0xe   :  { %v42_v15 = vadd.f32 %v108_v11, %v41_v14 }
  0x10   :  { %36 = vadd.xlane.f32.xlu0 %v35_v9  ;;  %v44_v16 = vsel %vm43_vm1, %v108_v11, %v42_v15 }
  0x7b   :  { %v34_v17 = vpop.xlane.xlu0 %33 }
  0x7c   :  { %v45_v18 = vmul.f32 %v44_v16, %v34_v17 }
  0x7e   :  { %v47_v19 = vsub.f32 %v25_v4, %v45_v18 }
  0x80   :  { %v49_v20 = vmul.f32 %v47_v19, %v47_v19 }
  0x82   :  { %v51_v21 = vsel %vm31_vm0, %v49_v20, 0.0 }
  0x83   :  { %52 = vadd.xlane.f32.xlu1 %v51_v21  ;;  %v37_v22 = vpop.xlane.xlu0 %36 }
  0x84   :  { %v46_v23 = vmul.f32 %v44_v16, %v37_v22 }
  0x86   :  { %v48_v24 = vsub.f32 %v26_v8, %v46_v23 }
  0x88   :  { %v50_v25 = vmul.f32 %v48_v24, %v48_v24 }
  0x8a   :  { %v54_v26 = vsel %vm31_vm0, %v50_v25, 0.0 }
  0x8b   :  { %55 = vadd.xlane.f32.xlu1 %v54_v26 }
  0xf6   :  { %v53_v27 = vpop.xlane.xlu1 %52 }
  0xf7   :  { %v57_v28 = vmul.f32 %v53_v27, %v44_v16 }
  0xf9   :  { %v59_v29 = vadd.f32 1e-06, %v57_v28 }
  0xfb   :  { %109 = vrsqrt.f32 %v59_v29  ;;  %vm67_vm3 = vweird.f32 %v59_v29 }
  0xfe   :  { %v56_v30 = vpop.xlane.xlu1 %55 }
  0xff   :  { %v58_v31 = vmul.f32 %v56_v30, %v44_v16 }
 0x101   :  { %v110_v32 = vpop.eup %109  ;;  %v60_v33 = vadd.f32 1e-06, %v58_v31 }
 0x102   :  { %v62_v34 = vmul.f32 %v110_v32, %v59_v29  ;;  %vm68_vm2 = vweird.f32 %v110_v32 }
 0x103   :  { %111 = vrsqrt.f32 %v60_v33  ;;  %vm69_vm4 = vmor %vm67_vm3, %vm68_vm2  ;;  %vm77_vm7 = vweird.f32 %v60_v33 }
 0x104   :  { %v63_v36 = vmul.f32 %v110_v32, %v62_v34 }
 0x106   :  { %v64_v38 = vmul.f32 0.5, %v63_v36 }
 0x108   :  { %v65_v40 = vsub.f32 1.5, %v64_v38 }
 0x109   :  { %v112_v41 = vpop.eup %111 }
 0x10a   :  { %v66_v43 = vmul.f32 %v110_v32, %v65_v40  ;;  %v72_v44 = vmul.f32 %v112_v41, %v60_v33  ;;  %vm78_vm5 = vweird.f32 %v112_v41 }
 0x10b   :  { %vm79_vm8 = vmor %vm77_vm7, %vm78_vm5 }
 0x10c   :  { %v70_v46 = vsel %vm69_vm4, %v110_v32, %v66_v43  ;;  %v73_v47 = vmul.f32 %v112_v41, %v72_v44 }
 0x10d   :  { %v81_v49 = vmul.f32 %v70_v46, %v47_v19 }
 0x10e   :  { %v74_v50 = vmul.f32 0.5, %v73_v47 }
 0x10f   :  { %v84_v51 = vmul.f32 %v83_v45, %v81_v49 }
 0x110   :  { %v75_v52 = vsub.f32 1.5, %v74_v50 }
 0x111   :  { %v87_v53 = vadd.f32 %v86_v48, %v84_v51 }
 0x112   :  { %v76_v54 = vmul.f32 %v112_v41, %v75_v52 }
 0x113   :  { %v89_v55 = vpack.c.bf16 %v87_v53, %v87_v53 }
 0x114   :  { %v80_v56 = vsel %vm79_vm8, %v112_v41, %v76_v54 }
 0x115   :  { %92 = vst.msk [vmem:[%s165_s4] sm:$0xf] %vm91_vm6, %v89_v55  ;;  %v82_v57 = vmul.f32 %v80_v56, %v48_v24 }
 0x117   :  { %v85_v58 = vmul.f32 %v83_v45, %v82_v57 }
 0x119   :  { %v88_v59 = vadd.f32 %v86_v48, %v85_v58 }
 0x11b   :  { %v90_v60 = vpack.c.bf16 %v88_v59, %v88_v59 }
 0x11d   :  { %93 = vst.msk [vmem:[%s165_s4 + $0x4] sm:$0xf] %vm91_vm6, %v90_v60 }

// kernel: _lambda_.55
= control target key start
LH: loop header
LB: loop body
LE: loop exit
PB: predicated region body
PF: predicated region fallthrough
CT: control target
= control target key end

     0   :  { %vm22_vm0 = vcmask 261120   ;;  %v100_v5 = vmov 32.0   ;;  %vm82_vm6 = vcmask 257024   ;;  %s140_s0 = inlined_call_operand.vmem [shape: bf16[16,32], index: 0, kind: input, shape index: {}]   ;;  %s141_s1 = inlined_call_operand.vmem [shape: bf16[1,32], index: 1, kind: input, shape index: {}]   ;;  %s142_s2 = inlined_call_operand.vmem [shape: bf16[1,32], index: 2, kind: input, shape index: {}]   ;;  %s143_s3 = inlined_call_operand.vmem [shape: bf16[16,32], index: 3, kind: output, shape index: {}]  }
   0x1   :  { %v90_v0 = vld [vmem:[%s140_s0] sm:$0xff]   ;;  %94 = vrcp.f32 %v100_v5 }
   0x2   :  { %v91_v1 = vunpack.c.l.bf16 %v90_v0  ;;  %v92_v3 = vunpack.c.h.bf16 %v90_v0  ;;  %v18_v30 = vld [vmem:[%s141_s1] sm:$0x1] }
   0x3   :  { %v20_v32 = vld [vmem:[%s142_s2] sm:$0x1]  ;;  %v19_v34 = vunpack.c.l.bf16 %v18_v30 }
   0x4   :  { %v23_v2 = vsel %vm22_vm0, %v91_v1, 0.0  ;;  %v26_v4 = vsel %vm22_vm0, %v92_v3, 0.0  ;;  %v21_v37 = vunpack.c.l.bf16 %v20_v32 }
   0x5   :  { %24 = vadd.xlane.f32.xlu0 %v23_v2  ;;  %v74_v40 = vperm.slane %v19_v34, 0 }
   0x6   :  { %v77_v43 = vperm.slane %v21_v37, 0 }
   0x7   :  { %v95_v6 = vpop.eup %94 }
   0x8   :  { %v30_v7 = vmul.f32 32.0, %v95_v6  ;;  %vm34_vm1 = vweird.f32 %v95_v6 }
   0xa   :  { %v31_v8 = vsub.f32 1.0, %v30_v7 }
   0xc   :  { %v32_v9 = vmul.f32 %v95_v6, %v31_v8 }
   0xd   :  { %27 = vadd.xlane.f32.xlu0 %v26_v4 }
   0xe   :  { %v33_v10 = vadd.f32 %v95_v6, %v32_v9 }
  0x10   :  { %v35_v11 = vsel %vm34_vm1, %v95_v6, %v33_v10 }
  0x78   :  { %v25_v12 = vpop.xlane.xlu0 %24 }
  0x79   :  { %v36_v13 = vmul.f32 %v35_v11, %v25_v12 }
  0x7b   :  { %v38_v14 = vsub.f32 %v91_v1, %v36_v13 }
  0x7d   :  { %v40_v15 = vmul.f32 %v38_v14, %v38_v14 }
  0x7f   :  { %v42_v16 = vsel %vm22_vm0, %v40_v15, 0.0 }
  0x80   :  { %43 = vadd.xlane.f32.xlu1 %v42_v16  ;;  %v28_v17 = vpop.xlane.xlu0 %27 }
  0x81   :  { %v37_v18 = vmul.f32 %v35_v11, %v28_v17 }
  0x83   :  { %v39_v19 = vsub.f32 %v92_v3, %v37_v18 }
  0x85   :  { %v41_v20 = vmul.f32 %v39_v19, %v39_v19 }
  0x87   :  { %v45_v21 = vsel %vm22_vm0, %v41_v20, 0.0 }
  0x88   :  { %46 = vadd.xlane.f32.xlu1 %v45_v21 }
  0xf3   :  { %v44_v22 = vpop.xlane.xlu1 %43 }
  0xf4   :  { %v48_v23 = vmul.f32 %v44_v22, %v35_v11 }
  0xf6   :  { %v50_v24 = vadd.f32 1e-06, %v48_v23 }
  0xf8   :  { %96 = vrsqrt.f32 %v50_v24  ;;  %vm58_vm3 = vweird.f32 %v50_v24 }
  0xfb   :  { %v47_v25 = vpop.xlane.xlu1 %46 }
  0xfc   :  { %v49_v26 = vmul.f32 %v47_v25, %v35_v11 }
  0xfe   :  { %v97_v27 = vpop.eup %96  ;;  %v51_v28 = vadd.f32 1e-06, %v49_v26 }
  0xff   :  { %v53_v29 = vmul.f32 %v97_v27, %v50_v24  ;;  %vm59_vm2 = vweird.f32 %v97_v27 }
 0x100   :  { %98 = vrsqrt.f32 %v51_v28  ;;  %vm60_vm4 = vmor %vm58_vm3, %vm59_vm2  ;;  %vm68_vm7 = vweird.f32 %v51_v28 }
 0x101   :  { %v54_v31 = vmul.f32 %v97_v27, %v53_v29 }
 0x103   :  { %v55_v33 = vmul.f32 0.5, %v54_v31 }
 0x105   :  { %v56_v35 = vsub.f32 1.5, %v55_v33 }
 0x106   :  { %v99_v36 = vpop.eup %98 }
 0x107   :  { %v57_v38 = vmul.f32 %v97_v27, %v56_v35  ;;  %v63_v39 = vmul.f32 %v99_v36, %v51_v28  ;;  %vm69_vm5 = vweird.f32 %v99_v36 }
 0x108   :  { %vm70_vm8 = vmor %vm68_vm7, %vm69_vm5 }
 0x109   :  { %v61_v41 = vsel %vm60_vm4, %v97_v27, %v57_v38  ;;  %v64_v42 = vmul.f32 %v99_v36, %v63_v39 }
 0x10a   :  { %v72_v44 = vmul.f32 %v61_v41, %v38_v14 }
 0x10b   :  { %v65_v45 = vmul.f32 0.5, %v64_v42 }
 0x10c   :  { %v75_v46 = vmul.f32 %v74_v40, %v72_v44 }
 0x10d   :  { %v66_v47 = vsub.f32 1.5, %v65_v45 }
 0x10e   :  { %v78_v48 = vadd.f32 %v77_v43, %v75_v46 }
 0x10f   :  { %v67_v49 = vmul.f32 %v99_v36, %v66_v47 }
 0x110   :  { %v80_v50 = vpack.c.bf16 %v78_v48, %v78_v48 }
 0x111   :  { %v71_v51 = vsel %vm70_vm8, %v99_v36, %v67_v49 }
 0x112   :  { %83 = vst.msk [vmem:[%s143_s3] sm:$0xf] %vm82_vm6, %v80_v50  ;;  %v73_v52 = vmul.f32 %v71_v51, %v39_v19 }
 0x114   :  { %v76_v53 = vmul.f32 %v74_v40, %v73_v52 }
 0x116   :  { %v79_v54 = vadd.f32 %v77_v43, %v76_v53 }
 0x118   :  { %v81_v55 = vpack.c.bf16 %v79_v54, %v79_v54 }
 0x11a   :  { %84 = vst.msk [vmem:[%s143_s3 + $0x4] sm:$0xf] %vm82_vm6, %v81_v55 }

// kernel: _lambda_.42
= control target key start
LH: loop header
LB: loop body
LE: loop exit
PB: predicated region body
PF: predicated region fallthrough
CT: control target
= control target key end

     0   :  { %s1384_s15 = smov 0   ;;  %s1386_s16 = smov 0   ;;  %s1618_s0 = inlined_call_operand.vmem [shape: f32[2,1,8], index: 0, kind: input, shape index: {}]   ;;  %s1619_s1 = inlined_call_operand.vmem [shape: bf16[2,8,3,4,8], index: 1, kind: input, shape index: {}, may-alias: {1,2,3}]   ;;  %s1620_s2 = inlined_call_operand.vmem [shape: bf16[2,8,3,4,8], index: 2, kind: input, shape index: {}, may-alias: {1,2,3}]   ;;  %s1621_s3 = inlined_call_operand.vmem [shape: bf16[2,8,3,4,8], index: 3, kind: input, shape index: {}, may-alias: {1,2,3}]   ;;  %s1622_s4 = inlined_call_operand.vmem [shape: bf16[2,8,4,8], index: 4, kind: output, shape index: {}]  }
   0x1   :  { %s1388_s17 = smov 0   ;;  %s1390_s18 = smov 0  }
   0x2   :  { %s1392_s19 = smov 0  }
   0x3 LB: > { %s26_s20 = sadd.s32 1, %s1350_s18  ;;  %p68_p1 = scmp.ne.s32.totalorder %s1342_s16, %s1338_s15  ;;  %s1354_s19 = sphi %s1392_s19, %s14_s19   ;;  %s1350_s18 = sphi %s1390_s18, %s1627_s18   ;;  %s1346_s17 = sphi %s1388_s17, %s1626_s17   ;;  %s1342_s16 = sphi %s1386_s16, %s1625_s16   ;;  %s1338_s15 = sphi %s1384_s15, %s1624_s15  }
   0x4   : > { %p28_p0 = scmp.ge.s32.totalorder %s26_s20, 2  ;;  %p69_p2 = scmp.eq.s32.totalorder %s1354_s19, 0 }
   0x5   : > { %s61_s23 = sadd.s32 1, %s1342_s16  ;;  %p1216_p5 = scmp.ge.s32.totalorder %s1354_s19, 2 }
   0x6   : > { %s1629_s20 = smov (%p28_p0, %s26_s20), 0  ;;  %p1415_p3 = por %p69_p2, %p68_p1 }
   0x7   : > { %s56_s22 = ssub.s32 %s1350_s18, %s1629_s20  ;;  %174 = sbr.rel (%p1216_p5) target bundleno = 51 (0x33), region = 16 }
   0x8   : > { %p59_p4 = scmp.eq.s32.totalorder %s56_s22, 0 }
   0xa   : > { %s1423_s24 = scalar_select %p59_p4, %s1342_s16, %s61_s23  }
   0xc   : > { %183 = sbr.rel (!%p1415_p3) target bundleno = 25 (0x19), region = 24  ;;  %s185_s25 = sand.u32 (%p1415_p3), 1, %s1342_s16  }
   0xd   : > { %s1256_s26 = smul.u32 (%p1415_p3), 48, %s1350_s18  ;;  %s1217_s27 = sshll.u32 (%p1415_p3), %s185_s25, 4 }
   0xe   : > { %s187_s5 = scalar_lea.vmem (%p1415_p3), [#allocation2], %s1217_s27 }
   0xf   : > { %s193_s30 = scalar_lea.vmem (%p1415_p3), %s1619_s1, %s1256_s26 }
  0x10   : > { %v210_v0 = vld [vmem:[%s193_s30] sm:$0x3] (%p1415_p3)  ;;  %v212_v1 = vld [vmem:[%s193_s30 + $0x6] sm:$0x3] (%p1415_p3)  ;;  %v214_v2 = vld [vmem:[%s193_s30 + $0xc] sm:$0x3] (%p1415_p3) }
  0x11   : > { %211 = vst [vmem:[%s187_s5] sm:$0x3] %v210_v0  ;;  %v216_v3 = vld [vmem:[%s193_s30 + $0x12] sm:$0x3]  ;;  %v218_v4 = vld [vmem:[%s193_s30 + $0x18] sm:$0x3] }
  0x12   : > { %213 = vst [vmem:[%s187_s5 + $0x2] sm:$0x3] %v212_v1  ;;  %v220_v5 = vld [vmem:[%s193_s30 + $0x1e] sm:$0x3]  ;;  %v222_v6 = vld [vmem:[%s193_s30 + $0x24] sm:$0x3] }
  0x13   : > { %215 = vst [vmem:[%s187_s5 + $0x4] sm:$0x3] %v214_v2  ;;  %v224_v7 = vld [vmem:[%s193_s30 + $0x2a] sm:$0x3] }
  0x14   : > { %217 = vst [vmem:[%s187_s5 + $0x6] sm:$0x3] %v216_v3 }
  0x15   : > { %219 = vst [vmem:[%s187_s5 + $0x8] sm:$0x3] %v218_v4 }
  0x16   : > { %221 = vst [vmem:[%s187_s5 + $0xa] sm:$0x3] %v220_v5 }
  0x17   : > { %223 = vst [vmem:[%s187_s5 + $0xc] sm:$0x3] %v222_v6 }
  0x18   : > { %225 = vst [vmem:[%s187_s5 + $0xe] sm:$0x3] %v224_v7 }
  0x19 PF: > { %265 = sbr.rel (!%p1415_p3) target bundleno = 38 (0x26), region = 65  ;;  %s267_s6 = sand.u32 (%p1415_p3), 1, %s1342_s16  }
  0x1a   : > { %s1220_s7 = smul.u32 (%p1415_p3), 48, %s1350_s18  ;;  %s1219_s8 = sshll.u32 (%p1415_p3), %s267_s6, 4 }
  0x1b   : > { %s269_s12 = scalar_lea.vmem (%p1415_p3), [#allocation3], %s1219_s8 }
  0x1c   : > { %s1116_s11 = scalar_lea.vmem (%p1415_p3), %s1620_s2, %s1220_s7 }
  0x1d   : > { %v1221_v8 = vld [vmem:[%s1116_s11 + $0x2] sm:$0x3] (%p1415_p3)  ;;  %v1222_v9 = vld [vmem:[%s1116_s11 + $0x8] sm:$0x3] (%p1415_p3)  ;;  %v1223_v10 = vld [vmem:[%s1116_s11 + $0xe] sm:$0x3] (%p1415_p3) }
  0x1e   : > { %291 = vst [vmem:[%s269_s12] sm:$0x3] %v1221_v8  ;;  %v1224_v11 = vld [vmem:[%s1116_s11 + $0x14] sm:$0x3]  ;;  %v1225_v12 = vld [vmem:[%s1116_s11 + $0x1a] sm:$0x3] }
  0x1f   : > { %293 = vst [vmem:[%s269_s12 + $0x2] sm:$0x3] %v1222_v9  ;;  %v1226_v13 = vld [vmem:[%s1116_s11 + $0x20] sm:$0x3]  ;;  %v1227_v14 = vld [vmem:[%s1116_s11 + $0x26] sm:$0x3] }
  0x20   : > { %295 = vst [vmem:[%s269_s12 + $0x4] sm:$0x3] %v1223_v10  ;;  %v1228_v15 = vld [vmem:[%s1116_s11 + $0x2c] sm:$0x3] }
  0x21   : > { %297 = vst [vmem:[%s269_s12 + $0x6] sm:$0x3] %v1224_v11 }
  0x22   : > { %299 = vst [vmem:[%s269_s12 + $0x8] sm:$0x3] %v1225_v12 }
  0x23   : > { %301 = vst [vmem:[%s269_s12 + $0xa] sm:$0x3] %v1226_v13 }
  0x24   : > { %303 = vst [vmem:[%s269_s12 + $0xc] sm:$0x3] %v1227_v14 }
  0x25   : > { %305 = vst [vmem:[%s269_s12 + $0xe] sm:$0x3] %v1228_v15 }
  0x26 PF: > { %345 = sbr.rel (!%p1415_p3) target bundleno = 51 (0x33), region = 106  ;;  %s347_s13 = sand.u32 (%p1415_p3), 1, %s1342_s16  }
  0x27   : > { %s1230_s14 = smul.u32 (%p1415_p3), 48, %s1350_s18  ;;  %s1229_s22 = sshll.u32 (%p1415_p3), %s347_s13, 4 }
  0x28   : > { %s349_s27 = scalar_lea.vmem (%p1415_p3), [#allocation4], %s1229_s22 }
  0x29   : > { %s1122_s26 = scalar_lea.vmem (%p1415_p3), %s1621_s3, %s1230_s14 }
  0x2a   : > { %v1231_v16 = vld [vmem:[%s1122_s26 + $0x4] sm:$0x3] (%p1415_p3)  ;;  %v1232_v17 = vld [vmem:[%s1122_s26 + $0xa] sm:$0x3] (%p1415_p3)  ;;  %v1233_v18 = vld [vmem:[%s1122_s26 + $0x10] sm:$0x3] (%p1415_p3) }
  0x2b   : > { %371 = vst [vmem:[%s349_s27] sm:$0x3] %v1231_v16  ;;  %v1234_v19 = vld [vmem:[%s1122_s26 + $0x16] sm:$0x3]  ;;  %v1235_v20 = vld [vmem:[%s1122_s26 + $0x1c] sm:$0x3] }
  0x2c   : > { %373 = vst [vmem:[%s349_s27 + $0x2] sm:$0x3] %v1232_v17  ;;  %v1236_v21 = vld [vmem:[%s1122_s26 + $0x22] sm:$0x3]  ;;  %v1237_v22 = vld [vmem:[%s1122_s26 + $0x28] sm:$0x3] }
  0x2d   : > { %375 = vst [vmem:[%s349_s27 + $0x4] sm:$0x3] %v1233_v18  ;;  %v1238_v23 = vld [vmem:[%s1122_s26 + $0x2e] sm:$0x3] }
  0x2e   : > { %377 = vst [vmem:[%s349_s27 + $0x6] sm:$0x3] %v1234_v19 }
  0x2f   : > { %379 = vst [vmem:[%s349_s27 + $0x8] sm:$0x3] %v1235_v20 }
  0x30   : > { %381 = vst [vmem:[%s349_s27 + $0xa] sm:$0x3] %v1236_v21 }
  0x31   : > { %383 = vst [vmem:[%s349_s27 + $0xc] sm:$0x3] %v1237_v22 }
  0x32   : > { %385 = vst [vmem:[%s349_s27 + $0xe] sm:$0x3] %v1238_v23 }
  0x33 PF: > { %p1239_p6 = scmp.ge.s32.totalorder %s1354_s19, 1  ;;  %p424_p7 = scmp.lt.s32.totalorder %s1354_s19, 3 }
  0x35   : > { %p425_p8 = pnand %p1239_p6, %p424_p7 }
  0x36   : > { %s431_s21 = sand.u32 (!%p425_p8), 1, %s1338_s15   ;;  %p485_p9 = scmp.lt.s32.totalorder (!%p425_p8), %s1346_s17, 1 }
  0x37   : > { %428 = sbr.rel (%p425_p8) target bundleno = 669 (0x29d), region = 147  ;;  %s1450_s28 = sshll.u32 (!%p425_p8), %s431_s21, 4 }
  0x38   : > { %s433_s29 = scalar_lea.vmem (!%p425_p8), [#allocation2], %s1450_s28  ;;  %s440_s15 = scalar_lea.vmem (!%p425_p8), [#allocation3], %s1450_s28 }
  0x39   : > { %s447_s30 = scalar_lea.vmem (!%p425_p8), [#allocation4], %s1450_s28 }
  0x3c   : > { %v1356_v24 = vmov 1934713408   ;;  %vm509_vm0 = vcmask 1047556   ;;  %v500_v26 = vld [vmem:[%s433_s29] sm:$0x3]  ;;  %vm764_vm1 = vcmask 64512  }
  0x3d   : > { %v512_v25 = vunpack.c.l.s4 %v1356_v24  ;;  %v501_v27 = vld [vmem:[%s433_s29 + $0x2] sm:$0x3]  ;;  %v502_v28 = vld [vmem:[%s433_s29 + $0x4] sm:$0x3]  ;;  %v503_v29 = vld [vmem:[%s433_s29 + $0x6] sm:$0x3] }
  0x3e   : > { %v504_v30 = vld [vmem:[%s433_s29 + $0x8] sm:$0x3]  ;;  %v505_v31 = vld [vmem:[%s433_s29 + $0xa] sm:$0x3]  ;;  %v506_v33 = vld [vmem:[%s433_s29 + $0xc] sm:$0x3] }
  0x3f   : > { %v1453_v32 = vunpack.c.0.s8 %v512_v25  ;;  %v507_v34 = vld [vmem:[%s433_s29 + $0xe] sm:$0x3]  ;;  %v508_v35 = vrot.slane %v502_v28, 4  ;;  %v517_v36 = vrot.slane %v503_v29, 4  ;;  %v525_v37 = vrot.slane %v506_v33, 4  ;;  %s1631_s17 = smov (!%p485_p9, %s1346_s17), 1 }
  0x40   : > { %v533_v38 = vrot.slane %v507_v34, 4  ;;  %v626_v47 = vld [vmem:[%s440_s15 + $0x4] sm:$0x3]  ;;  %v627_v48 = vld [vmem:[%s440_s15 + $0x6] sm:$0x3]  ;;  %s487_s7 = scalar_lea.vmem %s1618_s0, %s1631_s17  ;;  %vm912_vm3 = vcmask 1043456  }
  0x41   : > { %v510_v39 = vsel %vm509_vm0, %v508_v35, %v500_v26  ;;  %v518_v40 = vsel %vm509_vm0, %v517_v36, %v501_v27  ;;  %v526_v43 = vsel %vm509_vm0, %v525_v37, %v504_v30  ;;  %v630_v52 = vld [vmem:[%s440_s15 + $0xc] sm:$0x3]  ;;  %v631_v56 = vld [vmem:[%s440_s15 + $0xe] sm:$0x3]  ;;  %v632_v59 = vrot.slane %v626_v47, 4  ;;  %s1255_s8 = sshll.u32 %s1631_s17, 4 }
  0x42   : > { %v514_v41 = vperm.slane %v510_v39, %v1453_v32  ;;  %v522_v42 = vperm.slane %v518_v40, %v1453_v32  ;;  %v534_v44 = vsel %vm509_vm0, %v533_v38, %v505_v31  ;;  %v530_v45 = vperm.slane %v526_v43, %v1453_v32  ;;  %v624_v63 = vld [vmem:[%s440_s15] sm:$0x3]  ;;  %v625_v0 = vld [vmem:[%s440_s15 + $0x2] sm:$0x3]  ;;  %v628_v4 = vld [vmem:[%s440_s15 + $0x8] sm:$0x3]  ;;  %s1575_s11 = scalar_lea.vmem %s1622_s4, %s1255_s8 }
  0x43   : > { %v538_v46 = vperm.slane %v534_v44, %v1453_v32  ;;  %v640_v60 = vrot.slane %v627_v48, 4  ;;  %v648_v1 = vrot.slane %v630_v52, 4  ;;  %v629_v5 = vld [vmem:[%s440_s15 + $0xa] sm:$0x3]  ;;  %v656_v6 = vrot.slane %v631_v56, 4 }
  0x44   : > { %v543_v49 = vpack.i.b16 %v522_v42, %v514_v41  ;;  %v545_v50 = vshrl.u32 %v514_v41, 16  ;;  %v546_v51 = vshrl.u32 %v522_v42, 16  ;;  %v561_v54 = vshrl.u32 %v530_v45, 16 }
  0x45   : > { %v559_v53 = vpack.i.b16 %v538_v46, %v530_v45  ;;  %v562_v55 = vshrl.u32 %v538_v46, 16  ;;  %v633_v10 = vsel %vm509_vm0, %v632_v59, %v624_v63  ;;  %v641_v11 = vsel %vm509_vm0, %v640_v60, %v625_v0 }
  0x46   : > { %v547_v57 = vpack.i.b16 %v546_v51, %v545_v50  ;;  %v573_v58 = vunpack.c.l.bf16 %v543_v49  ;;  %v649_v13 = vsel %vm509_vm0, %v648_v1, %v628_v4  ;;  %v657_v14 = vsel %vm509_vm0, %v656_v6, %v629_v5  ;;  %v690_v5 = vld [vmem:[%s447_s30 + $0x4] sm:$0x3] }
  0x47   : > { %v563_v61 = vpack.i.b16 %v562_v55, %v561_v54  ;;  %v574_v62 = vunpack.c.l.bf16 %v559_v53  ;;  %v515_v15 = vrot.slane %v514_v41, 4  ;;  %v637_v16 = vperm.slane %v633_v10, %v1453_v32  ;;  %v695_v10 = vld [vmem:[%s447_s30 + $0xe] sm:$0x3] }
  0x48   : > { %v575_v2 = vunpack.c.l.bf16 %v547_v57  ;;  %v581_v3 = vmul.f32 0.35351563, %v573_v58  ;;  %v645_v17 = vperm.slane %v641_v11, %v1453_v32  ;;  %v653_v18 = vperm.slane %v649_v13, %v1453_v32 }
  0x49   : > { %v576_v7 = vunpack.c.l.bf16 %v563_v61  ;;  %v582_v8 = vmul.f32 0.35351563, %v574_v62  ;;  %v661_v19 = vperm.slane %v657_v14, %v1453_v32  ;;  %v516_v20 = vsel %vm509_vm0, 0, %v515_v15 }
  0x4a   : > { %v583_v9 = vmul.f32 0.35351563, %v575_v2  ;;  %597 = vst [vmem:[#allocation1] ss:$2 sm:$0xff] %v581_v3  ;;  %v523_v21 = vrot.slane %v522_v42, 4  ;;  %v531_v22 = vrot.slane %v530_v45, 4  ;;  %v539_v24 = vrot.slane %v538_v46, 4 }
  0x4b   : > { %v584_v12 = vmul.f32 0.35351563, %v576_v7  ;;  %599 = vst [vmem:[#allocation1 + $0x1] ss:$2 sm:$0xff] %v582_v8  ;;  %v666_v25 = vpack.i.b16 %v645_v17, %v637_v16  ;;  %v678_v29 = vpack.i.b16 %v661_v19, %v653_v18  ;;  %v553_v31 = vshrl.u32 %v516_v20, 16  ;;  %v691_v8 = vld [vmem:[%s447_s30 + $0x6] sm:$0x3] }
  0x4c   : > { %602 = vst [vmem:[#allocation1 + $0x10] ss:$2 sm:$0xff] %v583_v9  ;;  %v524_v23 = vsel %vm509_vm0, 0, %v523_v21  ;;  %v532_v26 = vsel %vm509_vm0, 0, %v531_v22  ;;  %v540_v30 = vsel %vm509_vm0, 0, %v539_v24  ;;  %v667_v41 = vshrl.u32 %v637_v16, 16 }
  0x4d   : > { %604 = vst [vmem:[#allocation1 + $0x11] ss:$2 sm:$0xff] %v584_v12  ;;  %v551_v27 = vpack.i.b16 %v524_v23, %v516_v20  ;;  %v567_v33 = vpack.i.b16 %v540_v30, %v532_v26  ;;  %v554_v36 = vshrl.u32 %v524_v23, 16  ;;  %v569_v37 = vshrl.u32 %v532_v26, 16  ;;  %v694_v9 = vld [vmem:[%s447_s30 + $0xc] sm:$0x3] }
  0x4e   : > { %v570_v38 = vshrl.u32 %v540_v30, 16  ;;  %v668_v42 = vshrl.u32 %v645_v17, 16  ;;  %v679_v45 = vshrl.u32 %v653_v18, 16  ;;  %v680_v46 = vshrl.u32 %v661_v19, 16  ;;  %v692_v21 = vld [vmem:[%s447_s30 + $0x8] sm:$0x3] }
  0x4f   : > { %v577_v34 = vunpack.c.l.bf16 %v551_v27  ;;  %v578_v39 = vunpack.c.l.bf16 %v567_v33  ;;  %v555_v43 = vpack.i.b16 %v554_v36, %v553_v31  ;;  %v638_v52 = vrot.slane %v637_v16, 4  ;;  %v688_v16 = vld [vmem:[%s447_s30] sm:$0x3]  ;;  %v693_v22 = vld [vmem:[%s447_s30 + $0xa] sm:$0x3] }
  0x50   : > { %v571_v44 = vpack.i.b16 %v570_v38, %v569_v37  ;;  %v669_v49 = vpack.i.b16 %v668_v42, %v667_v41  ;;  %v681_v51 = vpack.i.b16 %v680_v46, %v679_v45  ;;  %v646_v53 = vrot.slane %v645_v17, 4  ;;  %v689_v17 = vld [vmem:[%s447_s30 + $0x2] sm:$0x3] }
  0x51   : > { %v585_v40 = vmul.f32 0.35351563, %v577_v34  ;;  %v586_v47 = vmul.f32 0.35351563, %v578_v39  ;;  %v579_v48 = vunpack.c.l.bf16 %v555_v43  ;;  %v654_v55 = vrot.slane %v653_v18, 4  ;;  %v752_v43 = vld [vmem:[%s487_s7] sm:$0x1] }
  0x52   : > { %v600_v28 = vld.sshfl [vmem:[#allocation1] sm:$0xff pattern:$0x75316420]  ;;  %v580_v50 = vunpack.c.l.bf16 %v571_v44  ;;  %v662_v56 = vrot.slane %v661_v19, 4  ;;  %v639_v60 = vsel %vm509_vm0, 0, %v638_v52  ;;  %v647_v61 = vsel %vm509_vm0, 0, %v646_v53 }
  0x53   : > { %607 = vst [vmem:[#allocation1 + $0x20] ss:$2 sm:$0xff] %v585_v40  ;;  %v587_v57 = vmul.f32 0.35351563, %v579_v48  ;;  %v655_v62 = vsel %vm509_vm0, 0, %v654_v55  ;;  %v620_v0 = vpack.c.bf16 %v600_v28, %v600_v28  ;;  %v672_v1 = vpack.i.b16 %v647_v61, %v639_v60 }
  0x54   : > { %v1476_v35 = vld.sshfl [vmem:[#allocation1 + $0x10] sm:$0xff pattern:$0x75316420]  ;;  %609 = vst [vmem:[#allocation1 + $0x21] ss:$2 sm:$0xff] %v586_v47  ;;  %v588_v59 = vmul.f32 0.35351563, %v580_v50 }
  0x55   : > { %759 = vst [vmem:[#allocation1] ss:$4 sm:$0xff] %v666_v25  ;;  %v663_v63 = vsel %vm509_vm0, 0, %v662_v56  ;;  %v673_v4 = vshrl.u32 %v639_v60, 16  ;;  %v674_v7 = vshrl.u32 %v647_v61, 16  ;;  %v685_v11 = vshrl.u32 %v655_v62, 16 }
  0x56   : > { %762 = vst [vmem:[#allocation1 + $0x1] ss:$4 sm:$0xff] %v678_v29  ;;  %v684_v2 = vpack.i.b16 %v663_v63, %v655_v62  ;;  %v686_v12 = vshrl.u32 %v663_v63, 16  ;;  %v696_v13 = vrot.slane %v690_v5, 4  ;;  %v704_v14 = vrot.slane %v691_v8, 4 }
  0x57   : > { %612 = vst [vmem:[#allocation1 + $0x30] ss:$2 sm:$0xff] %v587_v57  ;;  %v621_v15 = vpack.c.bf16 %v1476_v35, %v1476_v35  ;;  %v712_v18 = vrot.slane %v694_v9, 4  ;;  %v720_v19 = vrot.slane %v695_v10, 4  ;;  %v675_v20 = vpack.i.b16 %v674_v7, %v673_v4 }
  0x58   : > { %614 = vst [vmem:[#allocation1 + $0x31] ss:$2 sm:$0xff] %v588_v59  ;;  %v687_v23 = vpack.i.b16 %v686_v12, %v685_v11  ;;  %v697_v24 = vsel %vm509_vm0, %v696_v13, %v688_v16  ;;  %v705_v25 = vsel %vm509_vm0, %v704_v14, %v689_v17  ;;  %vm753_vm2 = vcmp.gt.f32.partialorder %v752_v43, 0.0 }
  0x59   : > { %v713_v27 = vsel %vm509_vm0, %v712_v18, %v692_v21  ;;  %v721_v28 = vsel %vm509_vm0, %v720_v19, %v693_v22  ;;  %v1495_v31 = vperm.slane %v697_v24, %v1453_v32  ;;  %v1498_v33 = vperm.slane %v705_v25, %v1453_v32 }
  0x5a   : > { %v1501_v34 = vperm.slane %v713_v27, %v1453_v32  ;;  %v1504_v35 = vperm.slane %v721_v28, %v1453_v32  ;;  %v1357_v44 = vmov -1e+09   ;;  %vm1065_vm4 = vcmask 58368  }
  0x5b   : > { %v610_v30 = vld.sshfl [vmem:[#allocation1 + $0x20] sm:$0xff pattern:$0x75316420]  ;;  %v730_v37 = vpack.i.b16 %v1498_v33, %v1495_v31  ;;  %v754_v45 = vsel %vm753_vm2, 0.0, %v1357_v44  ;;  %v731_v19 = vshrl.u32 %v1495_v31, 16  ;;  %v702_v27 = vrot.slane %v1495_v31, 4 }
  0x5c   : > { %v622_v36 = vpack.c.bf16 %v610_v30, %v610_v30  ;;  %v742_v38 = vpack.i.b16 %v1504_v35, %v1501_v34  ;;  %v756_v46 = vperm.slane %v754_v45, 0  ;;  %v743_v21 = vshrl.u32 %v1501_v34, 16 }
  0x5d   : > { %v763_v54 = vld.sshfl [vmem:[#allocation1] sm:$0xff pattern:$0x73625140]  ;;  %v744_v22 = vshrl.u32 %v1504_v35, 16  ;;  %v710_v28 = vrot.slane %v1498_v33, 4  ;;  %v726_v30 = vrot.slane %v1504_v35, 4 }
  0x5e   : > { %v768_v58 = vsel %vm764_vm1, %v763_v54, 0  ;;  %784 = vst [vmem:[#allocation1] ss:$4 sm:$0xff] %v669_v49 }
  0x5f   : > { %777 = vmatpush.bf16.xpose.msra.mxu0 %v768_v58  ;;  %787 = vst [vmem:[#allocation1 + $0x1] ss:$4 sm:$0xff] %v681_v51  ;;  %v615_v41 = vld.sshfl [vmem:[#allocation1 + $0x30] sm:$0xff pattern:$0x75316420]  ;;  %v745_v24 = vpack.i.b16 %v744_v22, %v743_v21 }
  0x60   : > { %v623_v42 = vpack.c.bf16 %v615_v41, %v615_v41 }
  0x66   : > { %1245 = vmatmul.msk.bf16.vlgmr.msra.gmra.mxu0 %vm764_vm1, %v620_v0  ;;  %v788_v3 = vld.sshfl [vmem:[#allocation1] sm:$0xff pattern:$0x73625140] }
  0x67   : > { %v792_v6 = vsel %vm764_vm1, %v788_v3, 0  ;;  %808 = vst [vmem:[#allocation1] ss:$4 sm:$0xff] %v672_v1 }
  0x68   : > { %801 = vmatpush.bf16.xpose.msra.mxu1 %v792_v6  ;;  %811 = vst [vmem:[#allocation1 + $0x1] ss:$4 sm:$0xff] %v684_v2 }
  0x6f   : > { %1246 = vmatmul.msk.bf16.vlgmr.msra.gmra.mxu1 %vm764_vm1, %v621_v15  ;;  %v812_v26 = vld.sshfl [vmem:[#allocation1] sm:$0xff pattern:$0x73625140] }
  0x70   : > { %v816_v29 = vsel %vm764_vm1, %v812_v26, 0  ;;  %832 = vst [vmem:[#allocation1] ss:$4 sm:$0xff] %v675_v20  ;;  %v732_v20 = vshrl.u32 %v1498_v33, 16 }
  0x71   : > { %825 = vmatpush.bf16.xpose.msra.mxu2 %v816_v29  ;;  %835 = vst [vmem:[#allocation1 + $0x1] ss:$4 sm:$0xff] %v687_v23  ;;  %v718_v29 = vrot.slane %v1501_v34, 4 }
  0x72   : > { %v733_v23 = vpack.i.b16 %v732_v20, %v731_v19 }
  0x78   : > { %1247 = vmatmul.msk.bf16.vlgmr.msra.gmra.mxu2 %vm764_vm1, %v622_v36  ;;  %v836_v39 = vld.sshfl [vmem:[#allocation1] sm:$0xff pattern:$0x73625140]  ;;  %v703_v36 = vsel %vm509_vm0, 0, %v702_v27 }
  0x79   : > { %v840_v40 = vsel %vm764_vm1, %v836_v39, 0  ;;  %904 = vst [vmem:[#allocation1] ss:$4 sm:$0xff] %v730_v37  ;;  %v711_v37 = vsel %vm509_vm0, 0, %v710_v28  ;;  %v727_v39 = vsel %vm509_vm0, 0, %v726_v30  ;;  %v737_v31 = vshrl.u32 %v703_v36, 16 }
  0x7a   : > { %849 = vmatpush.bf16.xpose.msra.mxu3 %v840_v40  ;;  %907 = vst [vmem:[#allocation1 + $0x1] ss:$4 sm:$0xff] %v742_v38  ;;  %v719_v38 = vsel %vm509_vm0, 0, %v718_v29  ;;  %v736_v40 = vpack.i.b16 %v711_v37, %v703_v36  ;;  %v738_v33 = vshrl.u32 %v711_v37, 16  ;;  %v750_v35 = vshrl.u32 %v727_v39, 16 }
  0x7b   : > { %v748_v41 = vpack.i.b16 %v727_v39, %v719_v38  ;;  %v749_v34 = vshrl.u32 %v719_v38, 16 }
  0x7c   : > { %v739_v44 = vpack.i.b16 %v738_v33, %v737_v31 }
  0x7d   : > { %v751_v45 = vpack.i.b16 %v750_v35, %v749_v34 }
  0x81   : > { %1248 = vmatmul.msk.bf16.vlgmr.msra.gmra.mxu3 %vm764_vm1, %v623_v42  ;;  %v908_v25 = vld.sshfl [vmem:[#allocation1] sm:$0xff pattern:$0x73625140] }
  0x82   : > { %v913_v26 = vsel %vm912_vm3, %v908_v25, 0  ;;  %929 = vst [vmem:[#allocation1] ss:$4 sm:$0xff] %v733_v23 }
  0x83   : > { %922 = vmatpush.bf16.msrb.mxu0 %v913_v26  ;;  %932 = vst [vmem:[#allocation1 + $0x1] ss:$4 sm:$0xff] %v745_v24 }
  0x8a   : > { %v933_v42 = vld.sshfl [vmem:[#allocation1] sm:$0xff pattern:$0x73625140] }
  0x8b   : > { %v937_v43 = vsel %vm912_vm3, %v933_v42, 0  ;;  %953 = vst [vmem:[#allocation1] ss:$4 sm:$0xff] %v736_v40 }
  0x8c   : > { %946 = vmatpush.bf16.msrb.mxu1 %v937_v43  ;;  %956 = vst [vmem:[#allocation1 + $0x1] ss:$4 sm:$0xff] %v748_v41 }
  0xe3   : > { %v779_v47 = vpop.f32.mrf.mxu0 }
  0xe4   : > { %v780_v48 = vadd.f32 %v779_v47, %v756_v46  ;;  %v957_v47 = vld.sshfl [vmem:[#allocation1] sm:$0xff pattern:$0x73625140] }
  0xe5   : > { %977 = vst [vmem:[#allocation1] ss:$4 sm:$0xff] %v739_v44 }
  0xe6   : > { %v855_v49 = vsel %vm764_vm1, %v780_v48, -inf  ;;  %980 = vst [vmem:[#allocation1 + $0x1] ss:$4 sm:$0xff] %v751_v45 }
  0xe7   : > { %856 = vmax.xlane.f32.xlu1 %v855_v49 }
  0xeb   : > { %v781_v50 = vpop.f32.mrf.mxu0 }
  0xec   : > { %v803_v51 = vpop.f32.mrf.mxu1 }
  0xed   : > { %v804_v52 = vadd.f32 %v803_v51, %v756_v46 }
  0xef   : > { %v858_v53 = vsel %vm764_vm1, %v804_v52, -inf }
  0xf0   : > { %859 = vmax.xlane.f32.xlu1 %v858_v53 }
  0xf4   : > { %v805_v54 = vpop.f32.mrf.mxu1 }
  0xfb   : > { %v827_v55 = vpop.f32.mrf.mxu2 }
  0xfc   : > { %v828_v56 = vadd.f32 %v827_v55, %v756_v46 }
  0xfe   : > { %v861_v57 = vsel %vm764_vm1, %v828_v56, -inf }
  0xff   : > { %862 = vmax.xlane.f32.xlu0 %v861_v57 }
 0x103   : > { %v829_v58 = vpop.f32.mrf.mxu2 }
 0x104   : > { %v851_v59 = vpop.f32.mrf.mxu3 }
 0x105   : > { %v852_v60 = vadd.f32 %v851_v59, %v756_v46 }
 0x107   : > { %v864_v61 = vsel %vm764_vm1, %v852_v60, -inf }
 0x108   : > { %865 = vmax.xlane.f32.xlu0 %v864_v61 }
 0x10c   : > { %v853_v62 = vpop.f32.mrf.mxu3 }
 0x15a   : > { %v857_v63 = vpop.xlane.xlu1 %856 }
 0x15b   : > { %v867_v0 = vsub.f32 %v780_v48, %v857_v63  ;;  %v961_v48 = vsel %vm912_vm3, %v957_v47, 0 }
 0x15c   : > { %970 = vmatpush.bf16.msrb.mxu2 %v961_v48 }
 0x15d   : > { %v871_v1 = vmul.f32 1.442695, %v867_v0 }
 0x15f   : > { %1300 = vpow2.f32 %v871_v1 }
 0x163   : > { %v860_v2 = vpop.xlane.xlu1 %859 }
 0x164   : > { %v868_v3 = vsub.f32 %v804_v52, %v860_v2  ;;  %v981_v52 = vld.sshfl [vmem:[#allocation1] sm:$0xff pattern:$0x73625140] }
 0x165   : > { %v1525_v4 = vpop.eup %1300  ;;  %v985_v54 = vsel %vm912_vm3, %v981_v52, 0 }
 0x166   : > { %v873_v5 = vmul.f32 1.442695, %v868_v3  ;;  %v879_v6 = vsel %vm764_vm1, %v1525_v4, 0.0  ;;  %994 = vmatpush.bf16.msrb.mxu3 %v985_v54 }
 0x167   : > { %880 = vadd.xlane.f32.xlu0 %v879_v6  ;;  %v1358_v6 = vmov 1983009808  }
 0x168   : > { %1302 = vpow2.f32 %v873_v5 }
 0x16e   : > { %v1529_v7 = vpop.eup %1302 }
 0x16f   : > { %v882_v8 = vsel %vm764_vm1, %v1529_v7, 0.0 }
 0x170   : > { %883 = vadd.xlane.f32.xlu1 %v882_v8 }
 0x172   : > { %v863_v9 = vpop.xlane.xlu0 %862 }
 0x173   : > { %v869_v10 = vsub.f32 %v828_v56, %v863_v9 }
 0x175   : > { %v875_v11 = vmul.f32 1.442695, %v869_v10 }
 0x177   : > { %1304 = vpow2.f32 %v875_v11 }
 0x17b   : > { %v866_v12 = vpop.xlane.xlu0 %865 }
 0x17c   : > { %v870_v13 = vsub.f32 %v852_v60, %v866_v12 }
 0x17d   : > { %v1533_v14 = vpop.eup %1304 }
 0x17e   : > { %v877_v15 = vmul.f32 1.442695, %v870_v13  ;;  %v885_v16 = vsel %vm764_vm1, %v1533_v14, 0.0 }
 0x17f   : > { %886 = vadd.xlane.f32.xlu2 %v885_v16 }
 0x180   : > { %1306 = vpow2.f32 %v877_v15 }
 0x186   : > { %v1537_v17 = vpop.eup %1306 }
 0x187   : > { %v888_v18 = vsel %vm764_vm1, %v1537_v17, 0.0 }
 0x188   : > { %889 = vadd.xlane.f32.xlu2 %v888_v18 }
 0x1da   : > { %v881_v46 = vpop.xlane.xlu0 %880 }
 0x1db   : > { %1308 = vrcp.f32 %v881_v46 }
 0x1e1   : > { %v1309_v49 = vpop.eup %1308 }
 0x1e2   : > { %v895_v50 = vmul.f32 %v1309_v49, %v1525_v4 }
 0x1e3   : > { %v884_v51 = vpop.xlane.xlu1 %883 }
 0x1e4   : > { %v899_v53 = vpack.c.bf16 %v895_v50, %v895_v50  ;;  %1310 = vrcp.f32 %v884_v51 }
 0x1e6   : > { %1249 = vmatmul.msk.bf16.vlgmr.msrb.gmra.mxu0 %vm764_vm1, %v899_v53 }
 0x1ea   : > { %v1311_v55 = vpop.eup %1310 }
 0x1eb   : > { %v896_v56 = vmul.f32 %v1311_v55, %v1529_v7  ;;  %v1006_v7 = vunpack.c.l.s4 %v1358_v6 }
 0x1ed   : > { %v900_v57 = vpack.c.bf16 %v896_v56, %v896_v56  ;;  %v1007_v11 = vunpack.c.0.s8 %v1006_v7 }
 0x1ef   : > { %1250 = vmatmul.msk.bf16.vlgmr.msrb.gmra.mxu1 %vm764_vm1, %v900_v57 }
 0x1f2   : > { %v887_v58 = vpop.xlane.xlu2 %886 }
 0x1f3   : > { %1312 = vrcp.f32 %v887_v58 }
 0x1f9   : > { %v1313_v59 = vpop.eup %1312 }
 0x1fa   : > { %v897_v60 = vmul.f32 %v1313_v59, %v1533_v14 }
 0x1fb   : > { %v890_v61 = vpop.xlane.xlu2 %889 }
 0x1fc   : > { %1314 = vrcp.f32 %v890_v61  ;;  %v901_v62 = vpack.c.bf16 %v897_v60, %v897_v60 }
 0x1fe   : > { %1251 = vmatmul.msk.bf16.vlgmr.msrb.gmra.mxu2 %vm764_vm1, %v901_v62 }
 0x202   : > { %v1315_v63 = vpop.eup %1314 }
 0x203   : > { %v898_v0 = vmul.f32 %v1315_v63, %v1537_v17 }
 0x205   : > { %v902_v1 = vpack.c.bf16 %v898_v0, %v898_v0 }
 0x207   : > { %1252 = vmatmul.msk.bf16.vlgmr.msrb.gmra.mxu3 %vm764_vm1, %v902_v1 }
 0x263   : > { %v924_v2 = vpop.f32.mrf.mxu0 }
 0x264   : > { %v1003_v9 = vrot.slane %v924_v2, 4 }
 0x26b   : > { %v926_v3 = vpop.f32.mrf.mxu0 }
 0x26c   : > { %v948_v4 = vpop.f32.mrf.mxu1 }
 0x26d   : > { %v1015_v15 = vrot.slane %v948_v4, 4 }
 0x274   : > { %v950_v5 = vpop.f32.mrf.mxu1 }
 0x281   : > { %v972_v8 = vpop.f32.mrf.mxu2 }
 0x282   : > { %v1000_v10 = vrot.slane %v972_v8, 4  ;;  %v1004_v12 = vsel %vm509_vm0, %v972_v8, %v1003_v9 }
 0x283   : > { %v1012_v14 = vperm.slane %v1004_v12, %v1007_v11 }
 0x284   : > { %v1002_v13 = vsel %vm509_vm0, %v1000_v10, %v924_v2 }
 0x285   : > { %v1008_v17 = vperm.slane %v1002_v13, %v1007_v11  ;;  %v1039_v21 = vrot.slane %v1012_v14, 4 }
 0x287   : > { %v1027_v24 = vrot.slane %v1008_v17, 4 }
 0x289   : > { %v974_v16 = vpop.f32.mrf.mxu2 }
 0x28a   : > { %v996_v18 = vpop.f32.mrf.mxu3 }
 0x28b   : > { %v1013_v19 = vrot.slane %v996_v18, 4  ;;  %v1016_v20 = vsel %vm509_vm0, %v996_v18, %v1015_v15 }
 0x28c   : > { %v1024_v22 = vperm.slane %v1016_v20, %v1007_v11 }
 0x28d   : > { %v1014_v23 = vsel %vm509_vm0, %v1013_v19, %v948_v4 }
 0x28e   : > { %v1020_v25 = vperm.slane %v1014_v23, %v1007_v11  ;;  %v1037_v26 = vrot.slane %v1024_v22, 4  ;;  %v1040_v27 = vsel %vm509_vm0, %v1024_v22, %v1039_v21 }
 0x28f   : > { %v1048_v28 = vperm.slane %v1040_v27, %v1453_v32 }
 0x290   : > { %v1025_v29 = vrot.slane %v1020_v25, 4  ;;  %v1028_v30 = vsel %vm509_vm0, %v1020_v25, %v1027_v24  ;;  %v1038_v36 = vsel %vm509_vm0, %v1037_v26, %v1012_v14 }
 0x291   : > { %v1036_v37 = vperm.slane %v1028_v30, %v1453_v32  ;;  %v1044_v38 = vperm.slane %v1038_v36, %v1453_v32  ;;  %v1055_v39 = vrot.slane %v1048_v28, 4  ;;  %v1063_v40 = vpack.c.bf16 %v1048_v28, %v1048_v28 }
 0x292   : > { %v1026_v41 = vsel %vm509_vm0, %v1025_v29, %v1008_v17  ;;  %v998_v42 = vpop.f32.mrf.mxu3 }
 0x293   : > { %v1032_v43 = vperm.slane %v1026_v41, %v1453_v32  ;;  %v1051_v31 = vrot.slane %v1036_v37, 4  ;;  %v1053_v33 = vrot.slane %v1044_v38, 4  ;;  %1072 = vst.msk [vmem:[%s1575_s11 + $0xc] sm:$0x3] %vm1065_vm4, %v1063_v40  ;;  %v1056_v34 = vsel %vm509_vm0, 0.0, %v1055_v39 }
 0x294   : > { %v1059_v35 = vpack.c.bf16 %v1036_v37, %v1036_v37  ;;  %v1061_v44 = vpack.c.bf16 %v1044_v38, %v1044_v38  ;;  %v1064_v52 = vpack.c.bf16 %v1056_v34, %v1056_v34 }
 0x295   : > { %v1049_v45 = vrot.slane %v1032_v43, 4  ;;  %v1052_v46 = vsel %vm509_vm0, 0.0, %v1051_v31  ;;  %v1054_v47 = vsel %vm509_vm0, 0.0, %v1053_v33  ;;  %v1057_v48 = vpack.c.bf16 %v1032_v43, %v1032_v43 }
 0x296   : > { %v1060_v32 = vpack.c.bf16 %v1052_v46, %v1052_v46  ;;  %1068 = vst.msk [vmem:[%s1575_s11 + $0x4] sm:$0x3] %vm1065_vm4, %v1059_v35  ;;  %v1062_v50 = vpack.c.bf16 %v1054_v47, %v1054_v47 }
 0x297   : > { %v1050_v49 = vsel %vm509_vm0, 0.0, %v1049_v45  ;;  %1066 = vst.msk [vmem:[%s1575_s11] sm:$0x3] %vm1065_vm4, %v1057_v48 }
 0x298   : > { %v1058_v51 = vpack.c.bf16 %v1050_v49, %v1050_v49  ;;  %1069 = vst.msk [vmem:[%s1575_s11 + $0x6] sm:$0x3] %vm1065_vm4, %v1060_v32 }
 0x299   : > { %1070 = vst.msk [vmem:[%s1575_s11 + $0x8] sm:$0x3] %vm1065_vm4, %v1061_v44 }
 0x29a   : > { %1067 = vst.msk [vmem:[%s1575_s11 + $0x2] sm:$0x3] %vm1065_vm4, %v1058_v51 }
 0x29b   : > { %1071 = vst.msk [vmem:[%s1575_s11 + $0xa] sm:$0x3] %vm1065_vm4, %v1062_v50 }
 0x29c   : > { %1073 = vst.msk [vmem:[%s1575_s11 + $0xe] sm:$0x3] %vm1065_vm4, %v1064_v52 }
 0x29d PF: > { %s14_s19 = sadd.s32 1, %s1354_s19   ;;  %s1624_s15 = smov %s1342_s16 }
 0x29e   : > { %p11_p10 = scmp.ge.s32.totalorder %s14_s19, 4   ;;  %s1625_s16 = smov %s1423_s24 }
 0x29f   : > { %s1626_s17 = smov %s1350_s18  ;;  %s1627_s18 = smov %s1629_s20 }
 0x2a0   :  { %13 = sbr.rel (!%p11_p10) target bundleno = 3 (0x3), region = 228 }

// kernel: _lambda_.45
= control target key start
LH: loop header
LB: loop body
LE: loop exit
PB: predicated region body
PF: predicated region fallthrough
CT: control target
= control target key end

     0   :  { %vm19_vm0 = vcmask 523264   ;;  %v108_v1 = vmov 0.0   ;;  %vm47_vm1 = vcmask 261120   ;;  %vm84_vm2 = vcmask 519168   ;;  %s151_s1 = inlined_call_operand.vmem [shape: bf16[32,64], index: 1, kind: input, shape index: {}]   ;;  %s152_s0 = inlined_call_operand.vmem [shape: bf16[16,32], index: 0, kind: input, shape index: {}]   ;;  %s153_s2 = inlined_call_operand.vmem [shape: bf16[1,64], index: 2, kind: input, shape index: {}]   ;;  %s154_s3 = inlined_call_operand.vmem [shape: bf16[16,64], index: 3, kind: output, shape index: {}]  }
   0x1   :  { %v106_v0 = vld [vmem:[%s151_s1 + $0x8] sm:$0xff]  ;;  %20 = vst.msk [vmem:[#allocation2] sm:$0xff] %vm19_vm0, %v108_v1  ;;  %v105_v2 = vld [vmem:[%s151_s1] sm:$0xff] }
   0x2   :  { %21 = vst.msk [vmem:[#allocation2 + $0x8] sm:$0xff] %vm19_vm0, %v108_v1  ;;  %57 = vmatpush.bf16.msra.mxu0 %v106_v0  ;;  %v104_v3 = vld [vmem:[%s152_s0] sm:$0xff] }
   0x3   :  { %v75_v6 = vld [vmem:[%s153_s2] sm:$0x1] }
   0x4   :  { %v76_v8 = vunpack.c.l.bf16 %v75_v6 }
   0x6   :  { %58 = vmatpush.bf16.msra.mxu0 %v105_v2  ;;  %v77_v10 = vperm.slane %v76_v8, 0 }
   0x8   :  { %v22_v4 = vld [vmem:[#allocation2] sm:$0xff] }
   0x9   :  { %103 = vmatmul.msk.bf16.vlgmr.msra.gmra.mxu0 %vm47_vm1, %v104_v3  ;;  %v23_v9 = vld [vmem:[#allocation2 + $0x8] sm:$0xff] }
  0x86   :  { %v60_v5 = vpop.f32.mrf.mxu0 }
  0x87   :  { %v65_v7 = vadd.f32 %v60_v5, %v22_v4 }
  0x89   :  { %68 = vst.msk [vmem:[#allocation2] sm:$0xff] %vm19_vm0, %v65_v7 }
  0x8e   :  { %v62_v11 = vpop.f32.mrf.mxu0 }
  0x8f   :  { %v66_v12 = vadd.f32 %v62_v11, %v23_v9 }
  0x90   :  { %v73_v13 = vld [vmem:[#allocation2] sm:$0xff] }
  0x91   :  { %v78_v14 = vadd.f32 %v77_v10, %v73_v13  ;;  %69 = vst.msk [vmem:[#allocation2 + $0x8] sm:$0xff] %vm19_vm0, %v66_v12 }
  0x93   :  { %v80_v15 = vmax.f32 %v78_v14, 0.0 }
  0x95   :  { %v82_v16 = vpack.c.bf16 %v80_v15, %v80_v15 }
  0x97   :  { %85 = vst.msk [vmem:[%s154_s3] sm:$0xf] %vm84_vm2, %v82_v16 }
  0x98   :  { %v74_v17 = vld [vmem:[#allocation2 + $0x8] sm:$0xff] }
  0x99   :  { %v79_v18 = vadd.f32 %v77_v10, %v74_v17 }
  0x9b   :  { %v81_v19 = vmax.f32 %v79_v18, 0.0 }
  0x9d   :  { %v83_v20 = vpack.c.bf16 %v81_v19, %v81_v19 }
  0x9f   :  { %86 = vst.msk [vmem:[%s154_s3 + $0x4] sm:$0xf] %vm84_vm2, %v83_v20 }

// kernel: _lambda_.46
= control target key start
LH: loop header
LB: loop body
LE: loop exit
PB: predicated region body
PF: predicated region fallthrough
CT: control target
= control target key end

     0   :  { %vm19_vm0 = vcmask 261120   ;;  %v132_v1 = vmov 0.0   ;;  %vm63_vm1 = vcmask 523264   ;;  %vm98_vm2 = vcmask 257024   ;;  %s181_s1 = inlined_call_operand.vmem [shape: bf16[64,32], index: 1, kind: input, shape index: {}]   ;;  %s182_s0 = inlined_call_operand.vmem [shape: bf16[16,64], index: 0, kind: input, shape index: {}]   ;;  %s183_s2 = inlined_call_operand.vmem [shape: bf16[1,32], index: 2, kind: input, shape index: {}]   ;;  %s184_s3 = inlined_call_operand.vmem [shape: bf16[16,32], index: 3, kind: output, shape index: {}]  }
   0x1   :  { %v130_v0 = vld [vmem:[%s181_s1 + $0x18] sm:$0xff]  ;;  %20 = vst.msk [vmem:[#allocation2] sm:$0xff] %vm19_vm0, %v132_v1  ;;  %v129_v2 = vld [vmem:[%s181_s1 + $0x10] sm:$0xff]  ;;  %v128_v3 = vld [vmem:[%s181_s1 + $0x8] sm:$0xff] }
   0x2   :  { %21 = vst.msk [vmem:[#allocation2 + $0x8] sm:$0xff] %vm19_vm0, %v132_v1  ;;  %71 = vmatpush.bf16.msra.mxu0 %v130_v0  ;;  %v127_v4 = vld [vmem:[%s181_s1] sm:$0xff] }
   0x3   :  { %v126_v5 = vld [vmem:[%s182_s0] sm:$0xff] }
   0x4   :  { %v91_v8 = vld [vmem:[%s183_s2] sm:$0x1] }
   0x5   :  { %v92_v10 = vunpack.c.l.bf16 %v91_v8 }
   0x6   :  { %72 = vmatpush.bf16.msra.mxu0 %v129_v2 }
   0x7   :  { %v93_v12 = vperm.slane %v92_v10, 0 }
   0x8   :  { %v22_v6 = vld [vmem:[#allocation2] sm:$0xff] }
   0x9   :  { %v23_v11 = vld [vmem:[#allocation2 + $0x8] sm:$0xff] }
   0xa   :  { %73 = vmatpush.bf16.msra.mxu0 %v128_v3 }
   0xe   :  { %74 = vmatpush.bf16.msra.mxu0 %v127_v4 }
  0x11   :  { %125 = vmatmul.msk.bf16.vlgmr.msra.gmra.mxu0 %vm63_vm1, %v126_v5 }
  0x8e   :  { %v76_v7 = vpop.f32.mrf.mxu0 }
  0x8f   :  { %v81_v9 = vadd.f32 %v76_v7, %v22_v6 }
  0x91   :  { %84 = vst.msk [vmem:[#allocation2] sm:$0xff] %vm19_vm0, %v81_v9 }
  0x96   :  { %v78_v13 = vpop.f32.mrf.mxu0 }
  0x97   :  { %v82_v14 = vadd.f32 %v78_v13, %v23_v11 }
  0x98   :  { %v89_v15 = vld [vmem:[#allocation2] sm:$0xff] }
  0x99   :  { %v94_v16 = vadd.f32 %v93_v12, %v89_v15  ;;  %85 = vst.msk [vmem:[#allocation2 + $0x8] sm:$0xff] %vm19_vm0, %v82_v14 }
  0x9b   :  { %v96_v17 = vpack.c.bf16 %v94_v16, %v94_v16 }
  0x9d   :  { %99 = vst.msk [vmem:[%s184_s3] sm:$0xf] %vm98_vm2, %v96_v17 }
  0xa0   :  { %v90_v18 = vld [vmem:[#allocation2 + $0x8] sm:$0xff] }
  0xa1   :  { %v95_v19 = vadd.f32 %v93_v12, %v90_v18 }
  0xa3   :  { %v97_v20 = vpack.c.bf16 %v95_v19, %v95_v19 }
  0xa5   :  { %100 = vst.msk [vmem:[%s184_s3 + $0x4] sm:$0xf] %vm98_vm2, %v97_v20 }

// kernel: _lambda_.61
= control target key start
LH: loop header
LB: loop body
LE: loop exit
PB: predicated region body
PF: predicated region fallthrough
CT: control target
= control target key end

     0   :  { %vm19_vm0 = vcmask 523264   ;;  %v106_v1 = vmov 0.0   ;;  %vm47_vm1 = vcmask 261120   ;;  %vm82_vm2 = vcmask 519168   ;;  %s149_s1 = inlined_call_operand.vmem [shape: bf16[32,64], index: 1, kind: input, shape index: {}]   ;;  %s150_s0 = inlined_call_operand.vmem [shape: bf16[16,32], index: 0, kind: input, shape index: {}]   ;;  %s151_s2 = inlined_call_operand.vmem [shape: bf16[1,64], index: 2, kind: input, shape index: {}]   ;;  %s152_s3 = inlined_call_operand.vmem [shape: bf16[16,64], index: 3, kind: output, shape index: {}]  }
   0x1   :  { %v104_v0 = vld [vmem:[%s149_s1 + $0x8] sm:$0xff]  ;;  %20 = vst.msk [vmem:[#allocation2] sm:$0xff] %vm19_vm0, %v106_v1  ;;  %v103_v2 = vld [vmem:[%s149_s1] sm:$0xff] }
   0x2   :  { %21 = vst.msk [vmem:[#allocation2 + $0x8] sm:$0xff] %vm19_vm0, %v106_v1  ;;  %57 = vmatpush.bf16.msra.mxu0 %v104_v0  ;;  %v102_v3 = vld [vmem:[%s150_s0] sm:$0xff] }
   0x3   :  { %v75_v6 = vld [vmem:[%s151_s2] sm:$0x1] }
   0x4   :  { %v76_v8 = vunpack.c.l.bf16 %v75_v6 }
   0x6   :  { %58 = vmatpush.bf16.msra.mxu0 %v103_v2  ;;  %v77_v10 = vperm.slane %v76_v8, 0 }
   0x8   :  { %v22_v4 = vld [vmem:[#allocation2] sm:$0xff] }
   0x9   :  { %101 = vmatmul.msk.bf16.vlgmr.msra.gmra.mxu0 %vm47_vm1, %v102_v3  ;;  %v23_v9 = vld [vmem:[#allocation2 + $0x8] sm:$0xff] }
  0x86   :  { %v60_v5 = vpop.f32.mrf.mxu0 }
  0x87   :  { %v65_v7 = vadd.f32 %v60_v5, %v22_v4 }
  0x89   :  { %68 = vst.msk [vmem:[#allocation2] sm:$0xff] %vm19_vm0, %v65_v7 }
  0x8e   :  { %v62_v11 = vpop.f32.mrf.mxu0 }
  0x8f   :  { %v66_v12 = vadd.f32 %v62_v11, %v23_v9 }
  0x90   :  { %v73_v13 = vld [vmem:[#allocation2] sm:$0xff] }
  0x91   :  { %v78_v14 = vadd.f32 %v77_v10, %v73_v13  ;;  %69 = vst.msk [vmem:[#allocation2 + $0x8] sm:$0xff] %vm19_vm0, %v66_v12 }
  0x93   :  { %v80_v15 = vpack.c.bf16 %v78_v14, %v78_v14 }
  0x95   :  { %83 = vst.msk [vmem:[%s152_s3] sm:$0xf] %vm82_vm2, %v80_v15 }
  0x98   :  { %v74_v16 = vld [vmem:[#allocation2 + $0x8] sm:$0xff] }
  0x99   :  { %v79_v17 = vadd.f32 %v77_v10, %v74_v16 }
  0x9b   :  { %v81_v18 = vpack.c.bf16 %v79_v17, %v79_v17 }
  0x9d   :  { %84 = vst.msk [vmem:[%s152_s3 + $0x4] sm:$0xf] %vm82_vm2, %v81_v18 }

// kernel: _lambda_.81
= control target key start
LH: loop header
LB: loop body
LE: loop exit
PB: predicated region body
PF: predicated region fallthrough
CT: control target
= control target key end

     0   :  { %vm20_vm0 = vcmask 523264   ;;  %v147_v1 = vmov 0.0   ;;  %s192_s0 = inlined_call_operand.vmem [shape: bf16[16,32], index: 0, kind: input, shape index: {}]   ;;  %s193_s1 = inlined_call_operand.vmem [shape: bf16[32,64], index: 1, kind: input, shape index: {}]   ;;  %s194_s2 = inlined_call_operand.vmem [shape: bf16[1,64], index: 2, kind: input, shape index: {}]   ;;  %s195_s3 = inlined_call_operand.hbm [shape: f32[16,64], index: 3, kind: output, shape index: {}]  }
   0x1   :  { %v116_v0 = vld [vmem:[%s193_s1 + $0x8] sm:$0xff]  ;;  %21 = vst.msk [vmem:[#allocation2] sm:$0xff] %vm20_vm0, %v147_v1 }
   0x2   :  { %8 = vsyncpa [#allocation4], 0  ;;  %58 = vmatpush.bf16.msra.mxu0 %v116_v0  ;;  %v115_v2 = vld [vmem:[%s193_s1] sm:$0xff]  ;;  %22 = vst.msk [vmem:[#allocation2 + $0x8] sm:$0xff] %vm20_vm0, %v147_v1  ;;  %vm48_vm1 = vcmask 261120   ;;  %s149_s22 = smov 128  }
   0x3   :  { %v114_v3 = vld [vmem:[%s192_s0] sm:$0xff]  ;;  %s148_s0 = smov [#allocation3]   ;;  %s150_s23 = smov 8  }
   0x4   :  { %v76_v6 = vld [vmem:[%s194_s2] sm:$0x1]  ;;  %s87_s1 = sshll.u32 %s148_s0, 4  ;;  %s89_s2 = sshll.u32 %s195_s3, 4  ;;  %s88_s1 = int_to_ptr.vmem [resolvable:$true] %s87_s1  ;;  %s90_s2 = int_to_ptr.hbm [resolvable:$true] %s89_s2 }
   0x5   :  { %v77_v8 = vunpack.c.l.bf16 %v76_v6 }
   0x6   :  { %59 = vmatpush.bf16.msra.mxu0 %v115_v2 }
   0x7   :  { %v78_v10 = vperm.slane %v77_v8, 0 }
   0x8   :  { %v23_v4 = vld [vmem:[#allocation2] sm:$0xff] }
   0x9   :  { %113 = vmatmul.msk.bf16.vlgmr.msra.gmra.mxu0 %vm48_vm1, %v114_v3  ;;  %v24_v9 = vld [vmem:[#allocation2 + $0x8] sm:$0xff] }
  0x86   :  { %v61_v5 = vpop.f32.mrf.mxu0 }
  0x87   :  { %v66_v7 = vadd.f32 %v61_v5, %v23_v4 }
  0x89   :  { %69 = vst.msk [vmem:[#allocation2] sm:$0xff] %vm20_vm0, %v66_v7 }
  0x8e   :  { %v63_v11 = vpop.f32.mrf.mxu0 }
  0x8f   :  { %v67_v12 = vadd.f32 %v63_v11, %v24_v9 }
  0x90   :  { %v74_v13 = vld [vmem:[#allocation2] sm:$0xff] }
  0x91   :  { %70 = vst.msk [vmem:[#allocation2 + $0x8] sm:$0xff] %vm20_vm0, %v67_v12  ;;  %v79_v14 = vadd.f32 %v78_v10, %v74_v13 }
  0x93   :  { %81 = vst.msk [vmem:[#allocation3] sm:$0xff] %vm20_vm0, %v79_v14 }
  0x98   :  { %v75_v15 = vld [vmem:[#allocation2 + $0x8] sm:$0xff] }
  0x99   :  { %v80_v16 = vadd.f32 %v78_v10, %v75_v15 }
  0x9b   :  { %82 = vst.msk [vmem:[#allocation3 + $0x8] sm:$0xff] %vm20_vm0, %v80_v16 }
  0x9c   :  { %95 = dma.vmem_to_hbm [thread:$0]  %s88_s1, 256, %s90_s2, [#allocation4], %s149_s22, %s149_s22, %s150_s23  }
  0x9d   :  { %145 = dma.done.wait [#allocation4], 256  }
  0x9e   :  { %146 = vsyncadd [#allocation4], 4294967040 }
  0x9f   :  { %100 = vsyncpa [#allocation4], 1 }

// kernel: _lambda_.62
= control target key start
LH: loop header
LB: loop body
LE: loop exit
PB: predicated region body
PF: predicated region fallthrough
CT: control target
= control target key end

     0   :  { %s1311_s15 = smov 0   ;;  %s1313_s16 = smov 0   ;;  %s1544_s0 = inlined_call_operand.vmem [shape: f32[2,1,8], index: 0, kind: input, shape index: {}]   ;;  %s1545_s1 = inlined_call_operand.vmem [shape: bf16[2,8,1,4,8], index: 1, kind: input, shape index: {}]   ;;  %s1546_s2 = inlined_call_operand.vmem [shape: bf16[2,8,2,4,8], index: 2, kind: input, shape index: {}, may-alias: {2,3}]   ;;  %s1547_s3 = inlined_call_operand.vmem [shape: bf16[2,8,2,4,8], index: 3, kind: input, shape index: {}, may-alias: {2,3}]   ;;  %s1548_s4 = inlined_call_operand.vmem [shape: bf16[2,8,4,8], index: 4, kind: output, shape index: {}]  }
   0x1   :  { %s1315_s17 = smov 0   ;;  %s1317_s18 = smov 0  }
   0x2   :  { %s1319_s19 = smov 0  }
   0x3 LB: > { %s26_s20 = sadd.s32 1, %s1277_s18  ;;  %p94_p1 = scmp.ne.s32.totalorder %s1269_s16, %s1265_s15  ;;  %s1281_s19 = sphi %s1319_s19, %s14_s19   ;;  %s1277_s18 = sphi %s1317_s18, %s1553_s18   ;;  %s1273_s17 = sphi %s1315_s17, %s1552_s17   ;;  %s1269_s16 = sphi %s1313_s16, %s1551_s16   ;;  %s1265_s15 = sphi %s1311_s15, %s1550_s15  }
   0x4   : > { %p28_p0 = scmp.ge.s32.totalorder %s26_s20, 2  ;;  %p95_p2 = scmp.eq.s32.totalorder %s1281_s19, 0 }
   0x5   : > { %s87_s23 = sadd.s32 1, %s1269_s16  ;;  %p1148_p5 = scmp.ge.s32.totalorder %s1281_s19, 2 }
   0x6   : > { %s1555_s20 = smov (%p28_p0, %s26_s20), 0  ;;  %p1342_p3 = por %p95_p2, %p94_p1 }
   0x7   : > { %s84_s22 = ssub.s32 %s1277_s18, %s1555_s20  ;;  %174 = sbr.rel (%p1148_p5) target bundleno = 36 (0x24), region = 16 }
   0x8   : > { %p85_p4 = scmp.eq.s32.totalorder %s84_s22, 0 }
   0xa   : > { %s1350_s24 = scalar_select %p85_p4, %s1269_s16, %s87_s23  }
   0xc   : > { %196 = sbr.rel (!%p1342_p3) target bundleno = 24 (0x18), region = 28  ;;  %s198_s25 = sand.u32 (%p1342_p3), 1, %s1269_s16  }
   0xd   : > { %s1180_s26 = sshll.u32 (%p1342_p3), %s1277_s18, 5  ;;  %s1149_s27 = sshll.u32 (%p1342_p3), %s198_s25, 4 }
   0xe   : > { %s203_s30 = scalar_lea.vmem (%p1342_p3), %s1546_s2, %s1180_s26  ;;  %s200_s5 = scalar_lea.vmem (%p1342_p3), [#allocation2], %s1149_s27 }
   0xf   : > { %v220_v0 = vld [vmem:[%s203_s30] sm:$0x3] (%p1342_p3)  ;;  %v222_v1 = vld [vmem:[%s203_s30 + $0x4] sm:$0x3] (%p1342_p3)  ;;  %v224_v2 = vld [vmem:[%s203_s30 + $0x8] sm:$0x3] (%p1342_p3) }
  0x10   : > { %221 = vst [vmem:[%s200_s5] sm:$0x3] (%p1342_p3), %v220_v0  ;;  %v226_v3 = vld [vmem:[%s203_s30 + $0xc] sm:$0x3] (%p1342_p3)  ;;  %v228_v4 = vld [vmem:[%s203_s30 + $0x10] sm:$0x3] (%p1342_p3) }
  0x11   : > { %223 = vst [vmem:[%s200_s5 + $0x2] sm:$0x3] %v222_v1  ;;  %v230_v5 = vld [vmem:[%s203_s30 + $0x14] sm:$0x3]  ;;  %v232_v6 = vld [vmem:[%s203_s30 + $0x18] sm:$0x3] }
  0x12   : > { %225 = vst [vmem:[%s200_s5 + $0x4] sm:$0x3] %v224_v2  ;;  %v234_v7 = vld [vmem:[%s203_s30 + $0x1c] sm:$0x3] }
  0x13   : > { %227 = vst [vmem:[%s200_s5 + $0x6] sm:$0x3] %v226_v3 }
  0x14   : > { %229 = vst [vmem:[%s200_s5 + $0x8] sm:$0x3] %v228_v4 }
  0x15   : > { %231 = vst [vmem:[%s200_s5 + $0xa] sm:$0x3] %v230_v5 }
  0x16   : > { %233 = vst [vmem:[%s200_s5 + $0xc] sm:$0x3] %v232_v6 }
  0x17   : > { %235 = vst [vmem:[%s200_s5 + $0xe] sm:$0x3] %v234_v7 }
  0x18 PF: > { %275 = sbr.rel (!%p1342_p3) target bundleno = 36 (0x24), region = 69  ;;  %s277_s6 = sand.u32 (%p1342_p3), 1, %s1269_s16  }
  0x19   : > { %s1181_s7 = sshll.u32 (%p1342_p3), %s1277_s18, 5  ;;  %s1152_s8 = sshll.u32 (%p1342_p3), %s277_s6, 4 }
  0x1a   : > { %s1054_s11 = scalar_lea.vmem (%p1342_p3), %s1547_s3, %s1181_s7  ;;  %s279_s12 = scalar_lea.vmem (%p1342_p3), [#allocation3], %s1152_s8 }
  0x1b   : > { %v1155_v8 = vld [vmem:[%s1054_s11 + $0x2] sm:$0x3] (%p1342_p3)  ;;  %v1156_v9 = vld [vmem:[%s1054_s11 + $0x6] sm:$0x3] (%p1342_p3)  ;;  %v1157_v10 = vld [vmem:[%s1054_s11 + $0xa] sm:$0x3] (%p1342_p3) }
  0x1c   : > { %301 = vst [vmem:[%s279_s12] sm:$0x3] (%p1342_p3), %v1155_v8  ;;  %v1158_v11 = vld [vmem:[%s1054_s11 + $0xe] sm:$0x3] (%p1342_p3)  ;;  %v1159_v12 = vld [vmem:[%s1054_s11 + $0x12] sm:$0x3] (%p1342_p3) }
  0x1d   : > { %303 = vst [vmem:[%s279_s12 + $0x2] sm:$0x3] %v1156_v9  ;;  %v1160_v13 = vld [vmem:[%s1054_s11 + $0x16] sm:$0x3]  ;;  %v1161_v14 = vld [vmem:[%s1054_s11 + $0x1a] sm:$0x3] }
  0x1e   : > { %305 = vst [vmem:[%s279_s12 + $0x4] sm:$0x3] %v1157_v10  ;;  %v1162_v15 = vld [vmem:[%s1054_s11 + $0x1e] sm:$0x3] }
  0x1f   : > { %307 = vst [vmem:[%s279_s12 + $0x6] sm:$0x3] %v1158_v11 }
  0x20   : > { %309 = vst [vmem:[%s279_s12 + $0x8] sm:$0x3] %v1159_v12 }
  0x21   : > { %311 = vst [vmem:[%s279_s12 + $0xa] sm:$0x3] %v1160_v13 }
  0x22   : > { %313 = vst [vmem:[%s279_s12 + $0xc] sm:$0x3] %v1161_v14 }
  0x23   : > { %315 = vst [vmem:[%s279_s12 + $0xe] sm:$0x3] %v1162_v15 }
  0x24 PF: > { %p1163_p6 = scmp.ge.s32.totalorder %s1281_s19, 1  ;;  %p354_p7 = scmp.lt.s32.totalorder %s1281_s19, 3 }
  0x26   : > { %p355_p8 = pnand %p1163_p6, %p354_p7 }
  0x27   : > { %s361_s13 = sand.u32 (!%p355_p8), 1, %s1265_s15   ;;  %p413_p9 = scmp.lt.s32.totalorder (!%p355_p8), %s1273_s17, 1 }
  0x28   : > { %358 = sbr.rel (%p355_p8) target bundleno = 656 (0x290), region = 110  ;;  %s1371_s14 = sshll.u32 (!%p355_p8), %s361_s13, 4 }
  0x29   : > { %s363_s15 = scalar_lea.vmem (!%p355_p8), [#allocation2], %s1371_s14  ;;  %s370_s26 = scalar_lea.vmem (!%p355_p8), [#allocation3], %s1371_s14 }
  0x2d   : > { %s1557_s17 = smov (!%p413_p9, %s1273_s17), 1  ;;  %v1283_v16 = vmov 1934713408   ;;  %vm446_vm0 = vcmask 1047556   ;;  %v563_v37 = vld [vmem:[%s363_s15 + $0x4] sm:$0x3] }
  0x2e   : > { %v449_v17 = vunpack.c.l.s4 %v1283_v16  ;;  %s1182_s21 = sshll.u32 %s1557_s17, 4  ;;  %v564_v40 = vld [vmem:[%s363_s15 + $0x6] sm:$0x3]  ;;  %v567_v41 = vld [vmem:[%s363_s15 + $0xc] sm:$0x3]  ;;  %v569_v49 = vrot.slane %v563_v37, 4  ;;  %s415_s29 = scalar_lea.vmem %s1544_s0, %s1557_s17 }
  0x2f   : > { %s424_s25 = scalar_lea.vmem %s1545_s1, %s1182_s21  ;;  %v568_v45 = vld [vmem:[%s363_s15 + $0xe] sm:$0x3]  ;;  %v561_v52 = vld [vmem:[%s363_s15] sm:$0x3]  ;;  %v577_v53 = vrot.slane %v564_v40, 4  ;;  %v585_v54 = vrot.slane %v567_v41, 4  ;;  %s1501_s6 = scalar_lea.vmem %s1548_s4, %s1182_s21 }
  0x30   : > { %v437_v18 = vld [vmem:[%s424_s25] sm:$0x3]  ;;  %v438_v19 = vld [vmem:[%s424_s25 + $0x2] sm:$0x3]  ;;  %v439_v20 = vld [vmem:[%s424_s25 + $0x4] sm:$0x3]  ;;  %v1382_v24 = vunpack.c.0.s8 %v449_v17  ;;  %v570_v1 = vsel %vm446_vm0, %v569_v49, %v561_v52 }
  0x31   : > { %v440_v21 = vld [vmem:[%s424_s25 + $0x6] sm:$0x3]  ;;  %v441_v22 = vld [vmem:[%s424_s25 + $0x8] sm:$0x3]  ;;  %v442_v23 = vld [vmem:[%s424_s25 + $0xa] sm:$0x3] }
  0x32   : > { %v443_v25 = vld [vmem:[%s424_s25 + $0xc] sm:$0x3]  ;;  %v444_v26 = vld [vmem:[%s424_s25 + $0xe] sm:$0x3]  ;;  %v445_v27 = vrot.slane %v439_v20, 4  ;;  %v454_v28 = vrot.slane %v440_v21, 4  ;;  %v574_v9 = vperm.slane %v570_v1, %v1382_v24 }
  0x33   : > { %v462_v29 = vrot.slane %v443_v25, 4  ;;  %v470_v30 = vrot.slane %v444_v26, 4  ;;  %v562_v57 = vld [vmem:[%s363_s15 + $0x2] sm:$0x3]  ;;  %v565_v58 = vld [vmem:[%s363_s15 + $0x8] sm:$0x3] }
  0x34   : > { %v447_v31 = vsel %vm446_vm0, %v445_v27, %v437_v18  ;;  %v455_v32 = vsel %vm446_vm0, %v454_v28, %v438_v19  ;;  %v593_v59 = vrot.slane %v568_v45, 4  ;;  %v566_v62 = vld [vmem:[%s363_s15 + $0xa] sm:$0x3]  ;;  %v578_v3 = vsel %vm446_vm0, %v577_v53, %v562_v57  ;;  %v631_v1 = vld [vmem:[%s370_s26 + $0xc] sm:$0x3] }
  0x35   : > { %v451_v33 = vperm.slane %v447_v31, %v1382_v24  ;;  %v459_v34 = vperm.slane %v455_v32, %v1382_v24  ;;  %v463_v35 = vsel %vm446_vm0, %v462_v29, %v441_v22  ;;  %v471_v36 = vsel %vm446_vm0, %v470_v30, %v442_v23 }
  0x36   : > { %v467_v38 = vperm.slane %v463_v35, %v1382_v24  ;;  %v475_v39 = vperm.slane %v471_v36, %v1382_v24  ;;  %v586_v4 = vsel %vm446_vm0, %v585_v54, %v565_v58  ;;  %v594_v6 = vsel %vm446_vm0, %v593_v59, %v566_v62 }
  0x37   : > { %v480_v42 = vpack.i.b16 %v459_v34, %v451_v33  ;;  %v482_v43 = vshrl.u32 %v451_v33, 16  ;;  %v483_v44 = vshrl.u32 %v459_v34, 16  ;;  %v452_v7 = vrot.slane %v451_v33, 4 }
  0x38   : > { %v496_v46 = vpack.i.b16 %v475_v39, %v467_v38  ;;  %v498_v47 = vshrl.u32 %v467_v38, 16  ;;  %v499_v48 = vshrl.u32 %v475_v39, 16  ;;  %v460_v8 = vrot.slane %v459_v34, 4 }
  0x39   : > { %v484_v50 = vpack.i.b16 %v483_v44, %v482_v43  ;;  %v510_v51 = vunpack.c.l.bf16 %v480_v42  ;;  %v468_v10 = vrot.slane %v467_v38, 4  ;;  %v476_v11 = vrot.slane %v475_v39, 4 }
  0x3a   : > { %v500_v55 = vpack.i.b16 %v499_v48, %v498_v47  ;;  %v511_v56 = vunpack.c.l.bf16 %v496_v46  ;;  %v582_v12 = vperm.slane %v578_v3, %v1382_v24  ;;  %v590_v13 = vperm.slane %v586_v4, %v1382_v24 }
  0x3b   : > { %v512_v60 = vunpack.c.l.bf16 %v484_v50  ;;  %v518_v61 = vmul.f32 0.35351563, %v510_v51  ;;  %v453_v14 = vsel %vm446_vm0, 0, %v452_v7  ;;  %v461_v15 = vsel %vm446_vm0, 0, %v460_v8  ;;  %v625_v8 = vld [vmem:[%s370_s26] sm:$0x3] }
  0x3c   : > { %v513_v63 = vunpack.c.l.bf16 %v500_v55  ;;  %v519_v0 = vmul.f32 0.35351563, %v511_v56  ;;  %v598_v16 = vperm.slane %v594_v6, %v1382_v24  ;;  %v469_v17 = vsel %vm446_vm0, 0, %v468_v10 }
  0x3d   : > { %v520_v2 = vmul.f32 0.35351563, %v512_v60  ;;  %534 = vst [vmem:[#allocation1] ss:$2 sm:$0xff] %v518_v61  ;;  %v477_v18 = vsel %vm446_vm0, 0, %v476_v11  ;;  %v488_v19 = vpack.i.b16 %v461_v15, %v453_v14  ;;  %v490_v21 = vshrl.u32 %v453_v14, 16 }
  0x3e   : > { %v521_v5 = vmul.f32 0.35351563, %v513_v63  ;;  %536 = vst [vmem:[#allocation1 + $0x1] ss:$2 sm:$0xff] %v519_v0  ;;  %v504_v20 = vpack.i.b16 %v477_v18, %v469_v17  ;;  %v491_v23 = vshrl.u32 %v461_v15, 16  ;;  %v506_v25 = vshrl.u32 %v469_v17, 16 }
  0x3f   : > { %539 = vst [vmem:[#allocation1 + $0x10] ss:$2 sm:$0xff] %v520_v2  ;;  %v514_v22 = vunpack.c.l.bf16 %v488_v19  ;;  %v507_v26 = vshrl.u32 %v477_v18, 16  ;;  %v603_v27 = vpack.i.b16 %v582_v12, %v574_v9  ;;  %v615_v30 = vpack.i.b16 %v598_v16, %v590_v13  ;;  %v627_v61 = vld [vmem:[%s370_s26 + $0x4] sm:$0x3] }
  0x40   : > { %541 = vst [vmem:[#allocation1 + $0x11] ss:$2 sm:$0xff] %v521_v5  ;;  %v515_v28 = vunpack.c.l.bf16 %v504_v20  ;;  %v492_v32 = vpack.i.b16 %v491_v23, %v490_v21  ;;  %v604_v38 = vshrl.u32 %v574_v9, 16  ;;  %v605_v39 = vshrl.u32 %v582_v12, 16  ;;  %v628_v0 = vld [vmem:[%s370_s26 + $0x6] sm:$0x3] }
  0x41   : > { %v522_v31 = vmul.f32 0.35351563, %v514_v22  ;;  %v508_v33 = vpack.i.b16 %v507_v26, %v506_v25  ;;  %v616_v40 = vshrl.u32 %v590_v13, 16  ;;  %v617_v41 = vshrl.u32 %v598_v16, 16  ;;  %v632_v2 = vld [vmem:[%s370_s26 + $0xe] sm:$0x3] }
  0x42   : > { %v523_v34 = vmul.f32 0.35351563, %v515_v28  ;;  %v516_v36 = vunpack.c.l.bf16 %v492_v32  ;;  %v606_v44 = vpack.i.b16 %v605_v39, %v604_v38  ;;  %vm701_vm1 = vcmask 64512   ;;  %v630_v14 = vld [vmem:[%s370_s26 + $0xa] sm:$0x3] }
  0x43   : > { %544 = vst [vmem:[#allocation1 + $0x20] ss:$2 sm:$0xff] %v522_v31  ;;  %v517_v37 = vunpack.c.l.bf16 %v508_v33  ;;  %v618_v45 = vpack.i.b16 %v617_v41, %v616_v40  ;;  %v575_v46 = vrot.slane %v574_v9, 4  ;;  %v583_v47 = vrot.slane %v582_v12, 4  ;;  %v626_v9 = vld [vmem:[%s370_s26 + $0x2] sm:$0x3] }
  0x44   : > { %546 = vst [vmem:[#allocation1 + $0x21] ss:$2 sm:$0xff] %v523_v34  ;;  %v524_v42 = vmul.f32 0.35351563, %v516_v36  ;;  %v591_v49 = vrot.slane %v590_v13, 4  ;;  %v599_v50 = vrot.slane %v598_v16, 4  ;;  %v633_v5 = vrot.slane %v627_v61, 4 }
  0x45   : > { %v537_v29 = vld.sshfl [vmem:[#allocation1] sm:$0xff pattern:$0x75316420]  ;;  %v525_v43 = vmul.f32 0.35351563, %v517_v37  ;;  %v576_v52 = vsel %vm446_vm0, 0, %v575_v46  ;;  %v584_v53 = vsel %vm446_vm0, 0, %v583_v47 }
  0x46   : > { %549 = vst [vmem:[#allocation1 + $0x30] ss:$2 sm:$0xff] %v524_v42  ;;  %v592_v54 = vsel %vm446_vm0, 0, %v591_v49  ;;  %v600_v55 = vsel %vm446_vm0, 0, %v599_v50  ;;  %v557_v56 = vpack.c.bf16 %v537_v29, %v537_v29  ;;  %v609_v57 = vpack.i.b16 %v584_v53, %v576_v52  ;;  %v629_v13 = vld [vmem:[%s370_s26 + $0x8] sm:$0x3] }
  0x47   : > { %v1405_v35 = vld.sshfl [vmem:[#allocation1 + $0x10] sm:$0xff pattern:$0x75316420]  ;;  %551 = vst [vmem:[#allocation1 + $0x31] ss:$2 sm:$0xff] %v525_v43  ;;  %v621_v58 = vpack.i.b16 %v600_v55, %v592_v54  ;;  %v610_v60 = vshrl.u32 %v576_v52, 16  ;;  %v634_v16 = vsel %vm446_vm0, %v633_v5, %v625_v8 }
  0x48   : > { %696 = vst [vmem:[#allocation1] ss:$4 sm:$0xff] %v603_v27  ;;  %v611_v63 = vshrl.u32 %v584_v53, 16  ;;  %v622_v3 = vshrl.u32 %v592_v54, 16  ;;  %v623_v4 = vshrl.u32 %v600_v55, 16  ;;  %v641_v6 = vrot.slane %v628_v0, 4 }
  0x49   : > { %699 = vst [vmem:[#allocation1 + $0x1] ss:$4 sm:$0xff] %v615_v30  ;;  %v558_v7 = vpack.c.bf16 %v1405_v35, %v1405_v35  ;;  %v649_v10 = vrot.slane %v631_v1, 4  ;;  %v657_v11 = vrot.slane %v632_v2, 4  ;;  %v1424_v23 = vperm.slane %v634_v16, %v1382_v24  ;;  %v689_v35 = vld [vmem:[%s415_s29] sm:$0x1] }
  0x4a   : > { %v612_v12 = vpack.i.b16 %v611_v63, %v610_v60  ;;  %v624_v15 = vpack.i.b16 %v623_v4, %v622_v3  ;;  %v642_v17 = vsel %vm446_vm0, %v641_v6, %v626_v9  ;;  %vm690_vm2 = vcmp.gt.f32.partialorder %v689_v35, 0.0 }
  0x4b   : > { %v650_v19 = vsel %vm446_vm0, %v649_v10, %v629_v13  ;;  %v658_v20 = vsel %vm446_vm0, %v657_v11, %v630_v14  ;;  %v547_v22 = vld.sshfl [vmem:[#allocation1 + $0x20] sm:$0xff pattern:$0x75316420]  ;;  %v1427_v25 = vperm.slane %v642_v17, %v1382_v24  ;;  %v1284_v36 = vmov -1e+09  }
  0x4c   : > { %v1430_v26 = vperm.slane %v650_v19, %v1382_v24  ;;  %v1433_v27 = vperm.slane %v658_v20, %v1382_v24  ;;  %v559_v28 = vpack.c.bf16 %v547_v22, %v547_v22  ;;  %v691_v37 = vsel %vm690_vm2, 0.0, %v1284_v36 }
  0x4d   : > { %v667_v29 = vpack.i.b16 %v1427_v25, %v1424_v23  ;;  %v693_v38 = vperm.slane %v691_v37, 0  ;;  %v668_v11 = vshrl.u32 %v1424_v23, 16  ;;  %vm849_vm3 = vcmask 1043456  }
  0x4e   : > { %v679_v30 = vpack.i.b16 %v1433_v27, %v1430_v26  ;;  %v552_v33 = vld.sshfl [vmem:[#allocation1 + $0x30] sm:$0xff pattern:$0x75316420]  ;;  %v680_v13 = vshrl.u32 %v1430_v26, 16  ;;  %v681_v14 = vshrl.u32 %v1433_v27, 16  ;;  %v639_v19 = vrot.slane %v1424_v23, 4 }
  0x4f   : > { %v560_v34 = vpack.c.bf16 %v552_v33, %v552_v33  ;;  %v647_v20 = vrot.slane %v1427_v25, 4  ;;  %v663_v22 = vrot.slane %v1433_v27, 4  ;;  %vm1002_vm4 = vcmask 58368  }
  0x50   : > { %v700_v48 = vld.sshfl [vmem:[#allocation1] sm:$0xff pattern:$0x73625140]  ;;  %v682_v16 = vpack.i.b16 %v681_v14, %v680_v13 }
  0x51   : > { %v705_v51 = vsel %vm701_vm1, %v700_v48, 0  ;;  %721 = vst [vmem:[#allocation1] ss:$4 sm:$0xff] %v606_v44 }
  0x52   : > { %714 = vmatpush.bf16.xpose.msra.mxu0 %v705_v51  ;;  %724 = vst [vmem:[#allocation1 + $0x1] ss:$4 sm:$0xff] %v618_v45 }
  0x59   : > { %1170 = vmatmul.msk.bf16.vlgmr.msra.gmra.mxu0 %vm701_vm1, %v557_v56  ;;  %v725_v59 = vld.sshfl [vmem:[#allocation1] sm:$0xff pattern:$0x73625140] }
  0x5a   : > { %v729_v62 = vsel %vm701_vm1, %v725_v59, 0  ;;  %745 = vst [vmem:[#allocation1] ss:$4 sm:$0xff] %v609_v57 }
  0x5b   : > { %738 = vmatpush.bf16.xpose.msra.mxu1 %v729_v62  ;;  %748 = vst [vmem:[#allocation1 + $0x1] ss:$4 sm:$0xff] %v621_v58 }
  0x62   : > { %1171 = vmatmul.msk.bf16.vlgmr.msra.gmra.mxu1 %vm701_vm1, %v558_v7  ;;  %v749_v18 = vld.sshfl [vmem:[#allocation1] sm:$0xff pattern:$0x73625140] }
  0x63   : > { %v753_v21 = vsel %vm701_vm1, %v749_v18, 0  ;;  %769 = vst [vmem:[#allocation1] ss:$4 sm:$0xff] %v612_v12  ;;  %v669_v12 = vshrl.u32 %v1427_v25, 16 }
  0x64   : > { %762 = vmatpush.bf16.xpose.msra.mxu2 %v753_v21  ;;  %772 = vst [vmem:[#allocation1 + $0x1] ss:$4 sm:$0xff] %v624_v15  ;;  %v655_v21 = vrot.slane %v1430_v26, 4 }
  0x65   : > { %v670_v15 = vpack.i.b16 %v669_v12, %v668_v11 }
  0x6b   : > { %1172 = vmatmul.msk.bf16.vlgmr.msra.gmra.mxu2 %vm701_vm1, %v559_v28  ;;  %v773_v31 = vld.sshfl [vmem:[#allocation1] sm:$0xff pattern:$0x73625140]  ;;  %v640_v28 = vsel %vm446_vm0, 0, %v639_v19 }
  0x6c   : > { %v777_v32 = vsel %vm701_vm1, %v773_v31, 0  ;;  %841 = vst [vmem:[#allocation1] ss:$4 sm:$0xff] %v667_v29  ;;  %v648_v29 = vsel %vm446_vm0, 0, %v647_v20  ;;  %v664_v31 = vsel %vm446_vm0, 0, %v663_v22  ;;  %v674_v23 = vshrl.u32 %v640_v28, 16 }
  0x6d   : > { %786 = vmatpush.bf16.xpose.msra.mxu3 %v777_v32  ;;  %844 = vst [vmem:[#allocation1 + $0x1] ss:$4 sm:$0xff] %v679_v30  ;;  %v656_v30 = vsel %vm446_vm0, 0, %v655_v21  ;;  %v673_v32 = vpack.i.b16 %v648_v29, %v640_v28  ;;  %v675_v25 = vshrl.u32 %v648_v29, 16  ;;  %v687_v27 = vshrl.u32 %v664_v31, 16 }
  0x6e   : > { %v685_v33 = vpack.i.b16 %v664_v31, %v656_v30  ;;  %v686_v26 = vshrl.u32 %v656_v30, 16 }
  0x6f   : > { %v676_v36 = vpack.i.b16 %v675_v25, %v674_v23 }
  0x70   : > { %v688_v37 = vpack.i.b16 %v687_v27, %v686_v26 }
  0x74   : > { %1173 = vmatmul.msk.bf16.vlgmr.msra.gmra.mxu3 %vm701_vm1, %v560_v34  ;;  %v845_v17 = vld.sshfl [vmem:[#allocation1] sm:$0xff pattern:$0x73625140] }
  0x75   : > { %v850_v18 = vsel %vm849_vm3, %v845_v17, 0  ;;  %866 = vst [vmem:[#allocation1] ss:$4 sm:$0xff] %v670_v15 }
  0x76   : > { %859 = vmatpush.bf16.msrb.mxu0 %v850_v18  ;;  %869 = vst [vmem:[#allocation1 + $0x1] ss:$4 sm:$0xff] %v682_v16 }
  0x7d   : > { %v870_v34 = vld.sshfl [vmem:[#allocation1] sm:$0xff pattern:$0x73625140] }
  0x7e   : > { %v874_v35 = vsel %vm849_vm3, %v870_v34, 0  ;;  %890 = vst [vmem:[#allocation1] ss:$4 sm:$0xff] %v673_v32 }
  0x7f   : > { %883 = vmatpush.bf16.msrb.mxu1 %v874_v35  ;;  %893 = vst [vmem:[#allocation1 + $0x1] ss:$4 sm:$0xff] %v685_v33 }
  0xd6   : > { %v716_v39 = vpop.f32.mrf.mxu0 }
  0xd7   : > { %v717_v40 = vadd.f32 %v716_v39, %v693_v38  ;;  %v894_v39 = vld.sshfl [vmem:[#allocation1] sm:$0xff pattern:$0x73625140] }
  0xd8   : > { %914 = vst [vmem:[#allocation1] ss:$4 sm:$0xff] %v676_v36 }
  0xd9   : > { %v792_v41 = vsel %vm701_vm1, %v717_v40, -inf  ;;  %917 = vst [vmem:[#allocation1 + $0x1] ss:$4 sm:$0xff] %v688_v37 }
  0xda   : > { %793 = vmax.xlane.f32.xlu1 %v792_v41 }
  0xde   : > { %v718_v42 = vpop.f32.mrf.mxu0 }
  0xdf   : > { %v740_v43 = vpop.f32.mrf.mxu1 }
  0xe0   : > { %v741_v44 = vadd.f32 %v740_v43, %v693_v38 }
  0xe2   : > { %v795_v45 = vsel %vm701_vm1, %v741_v44, -inf }
  0xe3   : > { %796 = vmax.xlane.f32.xlu1 %v795_v45 }
  0xe7   : > { %v742_v46 = vpop.f32.mrf.mxu1 }
  0xee   : > { %v764_v47 = vpop.f32.mrf.mxu2 }
  0xef   : > { %v765_v48 = vadd.f32 %v764_v47, %v693_v38 }
  0xf1   : > { %v798_v49 = vsel %vm701_vm1, %v765_v48, -inf }
  0xf2   : > { %799 = vmax.xlane.f32.xlu0 %v798_v49 }
  0xf6   : > { %v766_v50 = vpop.f32.mrf.mxu2 }
  0xf7   : > { %v788_v51 = vpop.f32.mrf.mxu3 }
  0xf8   : > { %v789_v52 = vadd.f32 %v788_v51, %v693_v38 }
  0xfa   : > { %v801_v53 = vsel %vm701_vm1, %v789_v52, -inf }
  0xfb   : > { %802 = vmax.xlane.f32.xlu0 %v801_v53 }
  0xff   : > { %v790_v54 = vpop.f32.mrf.mxu3 }
 0x14d   : > { %v794_v55 = vpop.xlane.xlu1 %793 }
 0x14e   : > { %v804_v56 = vsub.f32 %v717_v40, %v794_v55  ;;  %v898_v40 = vsel %vm849_vm3, %v894_v39, 0 }
 0x14f   : > { %907 = vmatpush.bf16.msrb.mxu2 %v898_v40 }
 0x150   : > { %v808_v57 = vmul.f32 1.442695, %v804_v56 }
 0x152   : > { %1227 = vpow2.f32 %v808_v57 }
 0x156   : > { %v797_v58 = vpop.xlane.xlu1 %796 }
 0x157   : > { %v805_v59 = vsub.f32 %v741_v44, %v797_v58  ;;  %v918_v44 = vld.sshfl [vmem:[#allocation1] sm:$0xff pattern:$0x73625140] }
 0x158   : > { %v1450_v60 = vpop.eup %1227  ;;  %v922_v46 = vsel %vm849_vm3, %v918_v44, 0 }
 0x159   : > { %v810_v61 = vmul.f32 1.442695, %v805_v59  ;;  %v816_v62 = vsel %vm701_vm1, %v1450_v60, 0.0  ;;  %931 = vmatpush.bf16.msrb.mxu3 %v922_v46 }
 0x15a   : > { %817 = vadd.xlane.f32.xlu0 %v816_v62  ;;  %v1285_v62 = vmov 1983009808  }
 0x15b   : > { %1229 = vpow2.f32 %v810_v61 }
 0x161   : > { %v1454_v63 = vpop.eup %1229 }
 0x162   : > { %v819_v0 = vsel %vm701_vm1, %v1454_v63, 0.0 }
 0x163   : > { %820 = vadd.xlane.f32.xlu1 %v819_v0 }
 0x165   : > { %v800_v1 = vpop.xlane.xlu0 %799 }
 0x166   : > { %v806_v2 = vsub.f32 %v765_v48, %v800_v1 }
 0x168   : > { %v812_v3 = vmul.f32 1.442695, %v806_v2 }
 0x16a   : > { %1231 = vpow2.f32 %v812_v3 }
 0x16e   : > { %v803_v4 = vpop.xlane.xlu0 %802 }
 0x16f   : > { %v807_v5 = vsub.f32 %v789_v52, %v803_v4 }
 0x170   : > { %v1458_v6 = vpop.eup %1231 }
 0x171   : > { %v814_v7 = vmul.f32 1.442695, %v807_v5  ;;  %v822_v8 = vsel %vm701_vm1, %v1458_v6, 0.0 }
 0x172   : > { %823 = vadd.xlane.f32.xlu2 %v822_v8 }
 0x173   : > { %1233 = vpow2.f32 %v814_v7 }
 0x179   : > { %v1462_v9 = vpop.eup %1233 }
 0x17a   : > { %v825_v10 = vsel %vm701_vm1, %v1462_v9, 0.0 }
 0x17b   : > { %826 = vadd.xlane.f32.xlu2 %v825_v10 }
 0x1cd   : > { %v818_v38 = vpop.xlane.xlu0 %817 }
 0x1ce   : > { %1235 = vrcp.f32 %v818_v38 }
 0x1d4   : > { %v1236_v41 = vpop.eup %1235 }
 0x1d5   : > { %v832_v42 = vmul.f32 %v1236_v41, %v1450_v60 }
 0x1d6   : > { %v821_v43 = vpop.xlane.xlu1 %820 }
 0x1d7   : > { %v836_v45 = vpack.c.bf16 %v832_v42, %v832_v42  ;;  %1237 = vrcp.f32 %v821_v43 }
 0x1d9   : > { %1174 = vmatmul.msk.bf16.vlgmr.msrb.gmra.mxu0 %vm701_vm1, %v836_v45 }
 0x1dd   : > { %v1238_v47 = vpop.eup %1237 }
 0x1de   : > { %v833_v48 = vmul.f32 %v1238_v47, %v1454_v63  ;;  %v943_v63 = vunpack.c.l.s4 %v1285_v62 }
 0x1e0   : > { %v837_v49 = vpack.c.bf16 %v833_v48, %v833_v48  ;;  %v944_v3 = vunpack.c.0.s8 %v943_v63 }
 0x1e2   : > { %1175 = vmatmul.msk.bf16.vlgmr.msrb.gmra.mxu1 %vm701_vm1, %v837_v49 }
 0x1e5   : > { %v824_v50 = vpop.xlane.xlu2 %823 }
 0x1e6   : > { %1239 = vrcp.f32 %v824_v50 }
 0x1ec   : > { %v1240_v51 = vpop.eup %1239 }
 0x1ed   : > { %v834_v52 = vmul.f32 %v1240_v51, %v1458_v6 }
 0x1ee   : > { %v827_v53 = vpop.xlane.xlu2 %826 }
 0x1ef   : > { %1241 = vrcp.f32 %v827_v53  ;;  %v838_v54 = vpack.c.bf16 %v834_v52, %v834_v52 }
 0x1f1   : > { %1176 = vmatmul.msk.bf16.vlgmr.msrb.gmra.mxu2 %vm701_vm1, %v838_v54 }
 0x1f5   : > { %v1242_v55 = vpop.eup %1241 }
 0x1f6   : > { %v835_v56 = vmul.f32 %v1242_v55, %v1462_v9 }
 0x1f8   : > { %v839_v57 = vpack.c.bf16 %v835_v56, %v835_v56 }
 0x1fa   : > { %1177 = vmatmul.msk.bf16.vlgmr.msrb.gmra.mxu3 %vm701_vm1, %v839_v57 }
 0x256   : > { %v861_v58 = vpop.f32.mrf.mxu0 }
 0x257   : > { %v940_v1 = vrot.slane %v861_v58, 4 }
 0x25e   : > { %v863_v59 = vpop.f32.mrf.mxu0 }
 0x25f   : > { %v885_v60 = vpop.f32.mrf.mxu1 }
 0x260   : > { %v952_v7 = vrot.slane %v885_v60, 4 }
 0x267   : > { %v887_v61 = vpop.f32.mrf.mxu1 }
 0x274   : > { %v909_v0 = vpop.f32.mrf.mxu2 }
 0x275   : > { %v937_v2 = vrot.slane %v909_v0, 4  ;;  %v941_v4 = vsel %vm446_vm0, %v909_v0, %v940_v1 }
 0x276   : > { %v949_v6 = vperm.slane %v941_v4, %v944_v3 }
 0x277   : > { %v939_v5 = vsel %vm446_vm0, %v937_v2, %v861_v58 }
 0x278   : > { %v945_v9 = vperm.slane %v939_v5, %v944_v3  ;;  %v976_v13 = vrot.slane %v949_v6, 4 }
 0x27a   : > { %v964_v16 = vrot.slane %v945_v9, 4 }
 0x27c   : > { %v911_v8 = vpop.f32.mrf.mxu2 }
 0x27d   : > { %v933_v10 = vpop.f32.mrf.mxu3 }
 0x27e   : > { %v950_v11 = vrot.slane %v933_v10, 4  ;;  %v953_v12 = vsel %vm446_vm0, %v933_v10, %v952_v7 }
 0x27f   : > { %v961_v14 = vperm.slane %v953_v12, %v944_v3 }
 0x280   : > { %v951_v15 = vsel %vm446_vm0, %v950_v11, %v885_v60 }
 0x281   : > { %v957_v17 = vperm.slane %v951_v15, %v944_v3  ;;  %v974_v18 = vrot.slane %v961_v14, 4  ;;  %v977_v19 = vsel %vm446_vm0, %v961_v14, %v976_v13 }
 0x282   : > { %v985_v20 = vperm.slane %v977_v19, %v1382_v24 }
 0x283   : > { %v962_v21 = vrot.slane %v957_v17, 4  ;;  %v965_v22 = vsel %vm446_vm0, %v957_v17, %v964_v16  ;;  %v975_v28 = vsel %vm446_vm0, %v974_v18, %v949_v6 }
 0x284   : > { %v973_v29 = vperm.slane %v965_v22, %v1382_v24  ;;  %v981_v30 = vperm.slane %v975_v28, %v1382_v24  ;;  %v992_v31 = vrot.slane %v985_v20, 4  ;;  %v1000_v32 = vpack.c.bf16 %v985_v20, %v985_v20 }
 0x285   : > { %v963_v33 = vsel %vm446_vm0, %v962_v21, %v945_v9  ;;  %v935_v34 = vpop.f32.mrf.mxu3 }
 0x286   : > { %v969_v35 = vperm.slane %v963_v33, %v1382_v24  ;;  %v988_v23 = vrot.slane %v973_v29, 4  ;;  %v990_v25 = vrot.slane %v981_v30, 4  ;;  %1009 = vst.msk [vmem:[%s1501_s6 + $0xc] sm:$0x3] %vm1002_vm4, %v1000_v32  ;;  %v993_v26 = vsel %vm446_vm0, 0.0, %v992_v31 }
 0x287   : > { %v996_v27 = vpack.c.bf16 %v973_v29, %v973_v29  ;;  %v998_v36 = vpack.c.bf16 %v981_v30, %v981_v30  ;;  %v1001_v44 = vpack.c.bf16 %v993_v26, %v993_v26 }
 0x288   : > { %v986_v37 = vrot.slane %v969_v35, 4  ;;  %v989_v38 = vsel %vm446_vm0, 0.0, %v988_v23  ;;  %v991_v39 = vsel %vm446_vm0, 0.0, %v990_v25  ;;  %v994_v40 = vpack.c.bf16 %v969_v35, %v969_v35 }
 0x289   : > { %v997_v24 = vpack.c.bf16 %v989_v38, %v989_v38  ;;  %1005 = vst.msk [vmem:[%s1501_s6 + $0x4] sm:$0x3] %vm1002_vm4, %v996_v27  ;;  %v999_v42 = vpack.c.bf16 %v991_v39, %v991_v39 }
 0x28a   : > { %v987_v41 = vsel %vm446_vm0, 0.0, %v986_v37  ;;  %1003 = vst.msk [vmem:[%s1501_s6] sm:$0x3] %vm1002_vm4, %v994_v40 }
 0x28b   : > { %v995_v43 = vpack.c.bf16 %v987_v41, %v987_v41  ;;  %1006 = vst.msk [vmem:[%s1501_s6 + $0x6] sm:$0x3] %vm1002_vm4, %v997_v24 }
 0x28c   : > { %1007 = vst.msk [vmem:[%s1501_s6 + $0x8] sm:$0x3] %vm1002_vm4, %v998_v36 }
 0x28d   : > { %1004 = vst.msk [vmem:[%s1501_s6 + $0x2] sm:$0x3] %vm1002_vm4, %v995_v43 }
 0x28e   : > { %1008 = vst.msk [vmem:[%s1501_s6 + $0xa] sm:$0x3] %vm1002_vm4, %v999_v42 }
 0x28f   : > { %1010 = vst.msk [vmem:[%s1501_s6 + $0xe] sm:$0x3] %vm1002_vm4, %v1001_v44 }
 0x290 PF: > { %s14_s19 = sadd.s32 1, %s1281_s19   ;;  %s1550_s15 = smov %s1269_s16 }
 0x291   : > { %p11_p10 = scmp.ge.s32.totalorder %s14_s19, 4   ;;  %s1551_s16 = smov %s1350_s24 }
 0x292   : > { %s1552_s17 = smov %s1277_s18  ;;  %s1553_s18 = smov %s1555_s20 }
 0x293   :  { %13 = sbr.rel (!%p11_p10) target bundleno = 3 (0x3), region = 182 }

</bundles_post_ra>
